<compile_context>
chip_gen: v6e
topology: v6e:2x2x1
jax: 0.10.0
libtpu: 0.0.40
codegen_flags: <defaults>
</compile_context>

<pallas_src>
import functools
import math

import jax
import jax.numpy as jnp
from jax.experimental import pallas as pl
from jax.experimental.pallas import tpu as pltpu

MXU_DTYPE = jnp.bfloat16     # matmul operand dtype (accumulation stays f32)
_LN_EPS = 1e-5
_NEG_INF = -1e9


def _compiler_params():
    return pltpu.CompilerParams(
        dimension_semantics=("parallel",),
        vmem_limit_bytes=48 * 1024 * 1024,   # stays under v7x's 64 MiB physical VMEM
    )


def _row_tile(n):
    # biggest row tile that divides n (keeps VMEM bounded + enables pipelining at real sizes);
    # falls back to a full-slab block (grid=(1,)) for tiny shapes.
    for t in (512, 256, 128):
        if n % t == 0:
            return t
    return n


def _mxu_dot(a, b):
    return jnp.dot(a.astype(MXU_DTYPE), b.astype(MXU_DTYPE),
                   preferred_element_type=jnp.float32)


def _layernorm(y, gamma, beta):
    mu = jnp.mean(y, axis=-1, keepdims=True)
    yc = y - mu
    var = jnp.mean(yc * yc, axis=-1, keepdims=True)
    return yc * jax.lax.rsqrt(var + _LN_EPS) * gamma + beta


# --------------------- K1: head/tail linears + q projections ---------------------

def _ht_q_kernel(x_ref, wl1_ref, bl1_ref, wl2_ref, bl2_ref, wq_ref, bq_ref,
                 head_ref, tail_ref, qi_ref, qo_ref):
    x = x_ref[...]
    head = _mxu_dot(x, wl1_ref[...]) + bl1_ref[...]
    tail = _mxu_dot(x, wl2_ref[...]) + bl2_ref[...]
    head_ref[...] = head
    tail_ref[...] = tail
    wq = wq_ref[...]
    bq = bq_ref[...]
    qi_ref[...] = _mxu_dot(head, wq) + bq     # shared graph_attn q_proj on `head`
    qo_ref[...] = _mxu_dot(tail, wq) + bq     # shared graph_attn q_proj on `tail`


def pallas_head_tail_q(x2d, wl1, bl1, wl2, bl2, wq, bq):
    N, E = x2d.shape
    t = _row_tile(N)
    row = pl.BlockSpec((t, E), lambda i: (i, 0))
    cw = lambda s: pl.BlockSpec(s, lambda i: (0, 0))
    out = jax.ShapeDtypeStruct((N, E), jnp.float32)
    return pl.pallas_call(
        _ht_q_kernel,
        out_shape=(out, out, out, out),
        grid=(N // t,),
        in_specs=[row, cw((E, E)), cw((1, E)), cw((E, E)), cw((1, E)),
                  cw((E, E)), cw((1, E))],
        out_specs=(row, row, row, row),
        compiler_params=_compiler_params(),
    )(x2d, wl1, bl1.reshape(1, E), wl2, bl2.reshape(1, E), wq, bq.reshape(1, E))


# --------------------- K2: edge gates (concat-free) + k/v projections ---------------------

def _edge_kv_kernel(l1_ref, ee_ref, l2_ref, w1_ref, b1_ref, w2_ref, b2_ref,
                    wk_ref, bk_ref, wv_ref, bv_ref,
                    ki_ref, vi_ref, ko_ref, vo_ref):
    l1 = l1_ref[...]
    ee = ee_ref[...]
    l2 = l2_ref[...]
    # e1/e2 on cat([link1, edge_emb, link2]) as three partial matmuls (no HBM concat).
    edges = (_mxu_dot(l1, w1_ref[0]) + _mxu_dot(ee, w1_ref[1]) + _mxu_dot(l2, w1_ref[2])
             + b1_ref[...])
    edges_rev = (_mxu_dot(l1, w2_ref[0]) + _mxu_dot(ee, w2_ref[1]) + _mxu_dot(l2, w2_ref[2])
                 + b2_ref[...])
    wk = wk_ref[...]
    wv = wv_ref[...]
    bk = bk_ref[...]
    bv = bv_ref[...]
    ki_ref[...] = _mxu_dot(edges, wk) + bk
    vi_ref[...] = _mxu_dot(edges, wv) + bv
    ko_ref[...] = _mxu_dot(edges_rev, wk) + bk
    vo_ref[...] = _mxu_dot(edges_rev, wv) + bv


def pallas_edge_kv(l1, ee, l2, w1s, b1, w2s, b2, wk, bk, wv, bv):
    N, E = l1.shape
    t = _row_tile(N)
    row = pl.BlockSpec((t, E), lambda i: (i, 0))
    cw2 = lambda s: pl.BlockSpec(s, lambda i: (0, 0))
    cw3 = lambda s: pl.BlockSpec(s, lambda i: (0, 0, 0))
    out = jax.ShapeDtypeStruct((N, E), jnp.float32)
    return pl.pallas_call(
        _edge_kv_kernel,
        out_shape=(out, out, out, out),
        grid=(N // t,),
        in_specs=[row, row, row,
                  cw3((3, E, E)), cw2((1, E)),
                  cw3((3, E, E)), cw2((1, E)),
                  cw2((E, E)), cw2((1, E)),
                  cw2((E, E)), cw2((1, E))],
        out_specs=(row, row, row, row),
        compiler_params=_compiler_params(),
    )(l1, ee, l2, w1s, b1.reshape(1, E), w2s, b2.reshape(1, E),
      wk, bk.reshape(1, E), wv, bv.reshape(1, E))


# --------------------- K3: dual graph attention + out-proj + fusion gate + add + LN ---------------------

def _graph_attn_fuse_ln_kernel(qi_ref, qo_ref, ki_ref, vi_ref, ko_ref, vo_ref,
                               kpad_ref, gin_ref, gout_ref, qkeep_ref, res_ref,
                               wo_ref, bo_ref, wga_ref, wgb_ref, fgb_ref,
                               gamma_ref, beta_ref, o_ref, *, num_heads, scale):
    _, Lq, E = qi_ref.shape
    hd = E // num_heads

    kpad = kpad_ref[0]          # (1, Lk)   1.0 == padded key (edge)
    qkeep = qkeep_ref[0]        # (Lq, 1)   0.0 == padded query row

    def mha(q, k, v, gmask):
        # q: (Lq, E), k/v: (Lk, E), gmask: (Lq, Lk) 1.0 == disallowed
        bias = jnp.where((kpad + gmask) > 0.5, _NEG_INF, 0.0)     # (Lq, Lk), computed in-kernel
        outs = []
        for h in range(num_heads):
            sl = slice(h * hd, (h + 1) * hd)
            qh = q[:, sl]
            kh = k[:, sl]
            vh = v[:, sl]
            s = jnp.dot(qh.astype(MXU_DTYPE), kh.astype(MXU_DTYPE).T,
                        preferred_element_type=jnp.float32) * scale + bias
            s = s - jnp.max(s, axis=-1, keepdims=True)
            p = jnp.exp(s)
            p = p * pl.reciprocal(jnp.sum(p, axis=-1, keepdims=True), approx=True)
            outs.append(jnp.dot(p.astype(MXU_DTYPE), vh.astype(MXU_DTYPE),
                                preferred_element_type=jnp.float32))
        return jnp.concatenate(outs, axis=-1) * qkeep             # (Lq, E)

    attn_in = mha(qi_ref[0], ki_ref[0], vi_ref[0], gin_ref[0])
    attn_out = mha(qo_ref[0], ko_ref[0], vo_ref[0], gout_ref[0])

    wo = wo_ref[...]
    bo = bo_ref[...]
    gi = _mxu_dot(attn_in, wo) + bo          # shared graph_attn out_proj
    go = _mxu_dot(attn_out, wo) + bo

    # fusion gate: Sigmoid(Linear(2E, 1)) on cat([incoming, outgoing]) as a VPU reduction
    z = (jnp.sum(gi * wga_ref[...], axis=-1, keepdims=True)
         + jnp.sum(go * wgb_ref[...], axis=-1, keepdims=True)
         + fgb_ref[...])
    gate = 1.0 / (1.0 + jnp.exp(-z))
    y = gate * gi + (1.0 - gate) * go + res_ref[0]               # fuse + residual add

    o_ref[0] = _layernorm(y, gamma_ref[...], beta_ref[...])


def pallas_graph_attn_fuse_ln(q_in, q_out, k_in, v_in, k_out, v_out,
                              kpad, gmask_in, gmask_out, qkeep, residual,
                              wo, bo, wga, wgb, fgb, gamma, beta, num_heads):
    B, L, E = q_in.shape
    M = k_in.shape[1]
    hd = E // num_heads
    scale = 1.0 / math.sqrt(hd)
    kern = functools.partial(_graph_attn_fuse_ln_kernel, num_heads=num_heads, scale=scale)
    bLE = pl.BlockSpec((1, L, E), lambda b: (b, 0, 0))
    bME = pl.BlockSpec((1, M, E), lambda b: (b, 0, 0))
    cw = lambda s: pl.BlockSpec(s, lambda b: (0, 0))
    return pl.pallas_call(
        kern,
        out_shape=jax.ShapeDtypeStruct((B, L, E), jnp.float32),
        grid=(B,),
        in_specs=[bLE, bLE, bME, bME, bME, bME,
                  pl.BlockSpec((1, 1, M), lambda b: (b, 0, 0)),
                  pl.BlockSpec((1, L, M), lambda b: (b, 0, 0)),
                  pl.BlockSpec((1, L, M), lambda b: (b, 0, 0)),
                  pl.BlockSpec((1, L, 1), lambda b: (b, 0, 0)),
                  bLE,
                  cw((E, E)), cw((1, E)),
                  cw((1, E)), cw((1, E)), cw((1, 1)),
                  cw((1, E)), cw((1, E))],
        out_specs=bLE,
        compiler_params=_compiler_params(),
    )(q_in, q_out, k_in, v_in, k_out, v_out,
      kpad, gmask_in, gmask_out, qkeep, residual,
      wo, bo, wga, wgb, fgb, gamma, beta)


# --------------------- K4: FFN + residual + final LayerNorm ---------------------

def _ffn_ln_kernel(x_ref, w1_ref, b1_ref, w2_ref, b2_ref, gamma_ref, beta_ref, o_ref):
    x = x_ref[...]
    h = jnp.maximum(_mxu_dot(x, w1_ref[...]) + b1_ref[...], 0.0)   # relu activation_fn
    y = _mxu_dot(h, w2_ref[...]) + b2_ref[...] + x                 # + residual (= x)
    o_ref[...] = _layernorm(y, gamma_ref[...], beta_ref[...])


def pallas_ffn_ln(x2d, w1, b1, w2, b2, gamma, beta):
    N, E = x2d.shape
    F = w1.shape[1]
    t = _row_tile(N)
    row = pl.BlockSpec((t, E), lambda i: (i, 0))
    cw = lambda s: pl.BlockSpec(s, lambda i: (0, 0))
    return pl.pallas_call(
        _ffn_ln_kernel,
        out_shape=jax.ShapeDtypeStruct((N, E), jnp.float32),
        grid=(N // t,),
        in_specs=[row, cw((E, F)), cw((1, F)), cw((F, E)), cw((1, E)),
                  cw((1, E)), cw((1, E))],
        out_specs=row,
        compiler_params=_compiler_params(),
    )(x2d, w1, b1.reshape(1, F), w2, b2.reshape(1, E),
      gamma.reshape(1, E), beta.reshape(1, E))


# ----------------------------- module logic (glue) -----------------------------

def graph_transformer_encoder_layer(x, idx_pairs1, idx_pairs2,
                                    encoder_padding_mask, enc_edge_padding_mask,
                                    graph_mask, graph_mask_rev, enc_edge_emb,
                                    params, num_heads):
    L, B, E = x.shape
    M = enc_edge_emb.shape[0]

    # batch-major working layout: one transpose in, one out.
    xt = jnp.transpose(x, (1, 0, 2))                         # (B, L, E)
    eet = jnp.transpose(enc_edge_emb, (1, 0, 2))             # (B, M, E)

    # normalize_before = False -> maybe_layer_norm(before=True) is identity.
    head2, tail2, qi2, qo2 = pallas_head_tail_q(
        xt.reshape(B * L, E),
        params["l1_w"], params["l1_b"], params["l2_w"], params["l2_b"],
        params["q_w"], params["q_b"])
    head_t = head2.reshape(B, L, E)
    tail_t = tail2.reshape(B, L, E)

    # torch.gather(dim=0): out[m, b, :] = src[idx[m, b], b, :]  (batch-major here; plain JAX glue)
    idx1 = jnp.broadcast_to(idx_pairs1.T[:, :, None], (B, M, E))
    idx2 = jnp.broadcast_to(idx_pairs2.T[:, :, None], (B, M, E))
    link1 = jnp.take_along_axis(head_t, idx1, axis=1).reshape(B * M, E)
    link2 = jnp.take_along_axis(tail_t, idx2, axis=1).reshape(B * M, E)

    ki2, vi2, ko2, vo2 = pallas_edge_kv(
        link1, eet.reshape(B * M, E), link2,
        params["e1_w3"], params["e1_b"], params["e2_w3"], params["e2_b"],
        params["k_w"], params["k_b"], params["v_w"], params["v_b"])

    kpad = enc_edge_padding_mask.astype(jnp.float32).reshape(B, 1, M)    # 1.0 == padded edge
    qkeep = (1.0 - encoder_padding_mask.astype(jnp.float32)).reshape(B, L, 1)
    gin = graph_mask.astype(jnp.float32)                                  # (B, L, M) 1.0 == masked
    gout = graph_mask_rev.astype(jnp.float32)

    x1 = pallas_graph_attn_fuse_ln(
        qi2.reshape(B, L, E), qo2.reshape(B, L, E),
        ki2.reshape(B, M, E), vi2.reshape(B, M, E),
        ko2.reshape(B, M, E), vo2.reshape(B, M, E),
        kpad, gin, gout, qkeep, xt,
        params["o_w"], params["o_b"].reshape(1, E),
        params["fg_wa"], params["fg_wb"], params["fg_b"].reshape(1, 1),
        params["ln1_g"].reshape(1, E), params["ln1_b"].reshape(1, E),
        num_heads)                                           # (B, L, E)  (post add + LN1)

    x2 = pallas_ffn_ln(x1.reshape(B * L, E),
                       params["fc1_w"], params["fc1_b"],
                       params["fc2_w"], params["fc2_b"],
                       params["ln2_g"], params["ln2_b"])     # (B*L, E)

    return jnp.transpose(x2.reshape(B, L, E), (1, 0, 2))     # back to (L, B, E)


# ----------------------------- parameter init -----------------------------

def _xavier_uniform_t(key, out_f, in_f):
    # matches nn.init.xavier_uniform_ on an (out, in) weight; returned transposed (in, out) for x @ W.
    bound = math.sqrt(6.0 / (in_f + out_f))
    w = jax.random.uniform(key, (out_f, in_f), jnp.float32, -bound, bound)
    return w.T


def init_params(key, E, FFN):
    ks = jax.random.split(key, 12)
    z = lambda n: jnp.zeros((n,), jnp.float32)
    p = {}
    p["l1_w"], p["l1_b"] = _xavier_uniform_t(ks[0], E, E), z(E)
    p["l2_w"], p["l2_b"] = _xavier_uniform_t(ks[1], E, E), z(E)
    e1 = _xavier_uniform_t(ks[2], E, 3 * E)                    # (3E, E)
    e2 = _xavier_uniform_t(ks[3], E, 3 * E)
    p["e1_w3"] = jnp.stack([e1[:E], e1[E:2 * E], e1[2 * E:]], axis=0)   # (3, E, E)
    p["e2_w3"] = jnp.stack([e2[:E], e2[E:2 * E], e2[2 * E:]], axis=0)
    p["e1_b"], p["e2_b"] = z(E), z(E)
    # fusion gate: nn.Linear(2E, 1) weight shape (1, 2E); first E cols -> incoming, last E -> outgoing.
    bound = math.sqrt(6.0 / (2 * E + 1))
    fg_w = jax.random.uniform(ks[4], (1, 2 * E), jnp.float32, -bound, bound)
    p["fg_wa"], p["fg_wb"] = fg_w[:, :E], fg_w[:, E:]
    p["fg_b"] = z(1)
    # shared attention projections
    p["q_w"], p["q_b"] = _xavier_uniform_t(ks[5], E, E), z(E)
    p["k_w"], p["k_b"] = _xavier_uniform_t(ks[6], E, E), z(E)
    p["v_w"], p["v_b"] = _xavier_uniform_t(ks[7], E, E), z(E)
    p["o_w"], p["o_b"] = _xavier_uniform_t(ks[8], E, E), z(E)
    # FFN
    p["fc1_w"], p["fc1_b"] = _xavier_uniform_t(ks[9], FFN, E), z(FFN)
    p["fc2_w"], p["fc2_b"] = _xavier_uniform_t(ks[10], E, FFN), z(E)
    # LayerNorms
    p["ln1_g"], p["ln1_b"] = jnp.ones((E,), jnp.float32), z(E)
    p["ln2_g"], p["ln2_b"] = jnp.ones((E,), jnp.float32), z(E)
    return p


# ----------------------------- main -----------------------------

if __name__ == "__main__":
    L, B, E = 8, 2, 32          # seq_len, batch, encoder_embed_dim
    H = 4                       # graph_attention_heads
    FFN = 64                    # encoder_ffn_embed_dim
    M = 8                       # number of edges (edge sequence length)

    key = jax.random.PRNGKey(0)
    k_x, k_e, k_i1, k_i2, k_g1, k_g2, k_p = jax.random.split(key, 7)

    x = jax.random.normal(k_x, (L, B, E), jnp.float32)
    enc_edge_emb = jax.random.normal(k_e, (M, B, E), jnp.float32)
    idx_pairs1 = jax.random.randint(k_i1, (M, B), 0, L, jnp.int32)
    idx_pairs2 = jax.random.randint(k_i2, (M, B), 0, L, jnp.int32)

    # padding masks: True == padded
    encoder_padding_mask = jnp.zeros((B, L), jnp.bool_).at[1, L - 1].set(True)
    enc_edge_padding_mask = jnp.zeros((B, M), jnp.bool_).at[1, M - 2:].set(True)

    # graph masks: True == disallowed edge for that (node, edge) pair; keep edge 0 visible everywhere.
    graph_mask = jax.random.bernoulli(k_g1, 0.3, (B, L, M)).at[:, :, 0].set(False)
    graph_mask_rev = jax.random.bernoulli(k_g2, 0.3, (B, L, M)).at[:, :, 0].set(False)

    params = init_params(k_p, E, FFN)

    fwd = jax.jit(functools.partial(graph_transformer_encoder_layer, num_heads=H))
    out = fwd(x, idx_pairs1, idx_pairs2, encoder_padding_mask, enc_edge_padding_mask,
              graph_mask, graph_mask_rev, enc_edge_emb, params)
    jax.block_until_ready(out)

    assert out.shape == (L, B, E) and out.dtype == jnp.float32
    assert bool(jnp.all(jnp.isfinite(out)))
    print("KERNEL_OK")
</pallas_src>

<mosaic_0001>
module attributes {stable_mosaic.version = 11 : i64} {
  func.func @_ht_q_kernel(%arg0: i32, %arg1: memref<16x32xf32, #tpu.memory_space<vmem>>, %arg2: memref<32x32xf32, #tpu.memory_space<vmem>>, %arg3: memref<1x32xf32, #tpu.memory_space<vmem>>, %arg4: memref<32x32xf32, #tpu.memory_space<vmem>>, %arg5: memref<1x32xf32, #tpu.memory_space<vmem>>, %arg6: memref<32x32xf32, #tpu.memory_space<vmem>>, %arg7: memref<1x32xf32, #tpu.memory_space<vmem>>, %arg8: memref<16x32xf32, #tpu.memory_space<vmem>>, %arg9: memref<16x32xf32, #tpu.memory_space<vmem>>, %arg10: memref<16x32xf32, #tpu.memory_space<vmem>>, %arg11: memref<16x32xf32, #tpu.memory_space<vmem>>) attributes {dimension_semantics = [#tpu.dimension_semantics<parallel>], iteration_bounds = array<i64: 1>, scalar_prefetch = 0 : i64, scratch_operands = 0 : i64, tpu.core_type = #tpu.core_type<tc>, window_params = [{transform_indices = @transform_0, window_bounds = array<i64: 16, 32>}, {pipeline_mode = #tpu.pipeline_mode<synchronous>, transform_indices = @transform_1, window_bounds = array<i64: 32, 32>}, {pipeline_mode = #tpu.pipeline_mode<synchronous>, transform_indices = @transform_2, window_bounds = array<i64: 1, 32>}, {pipeline_mode = #tpu.pipeline_mode<synchronous>, transform_indices = @transform_3, window_bounds = array<i64: 32, 32>}, {pipeline_mode = #tpu.pipeline_mode<synchronous>, transform_indices = @transform_4, window_bounds = array<i64: 1, 32>}, {pipeline_mode = #tpu.pipeline_mode<synchronous>, transform_indices = @transform_5, window_bounds = array<i64: 32, 32>}, {pipeline_mode = #tpu.pipeline_mode<synchronous>, transform_indices = @transform_6, window_bounds = array<i64: 1, 32>}, {transform_indices = @transform_7, window_bounds = array<i64: 16, 32>}, {transform_indices = @transform_8, window_bounds = array<i64: 16, 32>}, {transform_indices = @transform_9, window_bounds = array<i64: 16, 32>}, {transform_indices = @transform_10, window_bounds = array<i64: 16, 32>}]} {
    %c0 = arith.constant 0 : index
    %c0_0 = arith.constant 0 : index
    %0 = vector.load %arg1[%c0, %c0_0] : memref<16x32xf32, #tpu.memory_space<vmem>>, vector<16x32xf32>
    %c0_1 = arith.constant 0 : index
    %c0_2 = arith.constant 0 : index
    %1 = vector.load %arg2[%c0_1, %c0_2] : memref<32x32xf32, #tpu.memory_space<vmem>>, vector<32x32xf32>
    %2 = arith.truncf %0 : vector<16x32xf32> to vector<16x32xbf16>
    %3 = arith.truncf %1 : vector<32x32xf32> to vector<32x32xbf16>
    %cst = arith.constant dense<0.000000e+00> : vector<16x32xf32>
    %4 = tpu.matmul %2, %3, %cst {dimension_numbers = #tpu.dot_dimension_numbers<[1], [0], [0], [1], [0, 0, 1, 1], [], []>} : vector<16x32xbf16>, vector<32x32xbf16>, vector<16x32xf32> -> vector<16x32xf32>
    %c0_3 = arith.constant 0 : index
    %c0_4 = arith.constant 0 : index
    %5 = vector.load %arg3[%c0_3, %c0_4] : memref<1x32xf32, #tpu.memory_space<vmem>>, vector<1x32xf32>
    %6 = vector.broadcast %5 : vector<1x32xf32> to vector<16x32xf32>
    %7 = arith.addf %4, %6 : vector<16x32xf32>
    %c0_5 = arith.constant 0 : index
    %c0_6 = arith.constant 0 : index
    %8 = vector.load %arg4[%c0_5, %c0_6] : memref<32x32xf32, #tpu.memory_space<vmem>>, vector<32x32xf32>
    %9 = arith.truncf %0 : vector<16x32xf32> to vector<16x32xbf16>
    %10 = arith.truncf %8 : vector<32x32xf32> to vector<32x32xbf16>
    %cst_7 = arith.constant dense<0.000000e+00> : vector<16x32xf32>
    %11 = tpu.matmul %9, %10, %cst_7 {dimension_numbers = #tpu.dot_dimension_numbers<[1], [0], [0], [1], [0, 0, 1, 1], [], []>} : vector<16x32xbf16>, vector<32x32xbf16>, vector<16x32xf32> -> vector<16x32xf32>
    %c0_8 = arith.constant 0 : index
    %c0_9 = arith.constant 0 : index
    %12 = vector.load %arg5[%c0_8, %c0_9] : memref<1x32xf32, #tpu.memory_space<vmem>>, vector<1x32xf32>
    %13 = vector.broadcast %12 : vector<1x32xf32> to vector<16x32xf32>
    %14 = arith.addf %11, %13 : vector<16x32xf32>
    %c0_10 = arith.constant 0 : index
    %c0_11 = arith.constant 0 : index
    %15 = vector.load %arg8[%c0_10, %c0_11] : memref<16x32xf32, #tpu.memory_space<vmem>>, vector<16x32xf32>
    tpu.vector_store %arg8[%c0_10, %c0_11], %7 {strides = array<i32>} : memref<16x32xf32, #tpu.memory_space<vmem>>, vector<16x32xf32>,
    %c0_12 = arith.constant 0 : index
    %c0_13 = arith.constant 0 : index
    %16 = vector.load %arg9[%c0_12, %c0_13] : memref<16x32xf32, #tpu.memory_space<vmem>>, vector<16x32xf32>
    tpu.vector_store %arg9[%c0_12, %c0_13], %14 {strides = array<i32>} : memref<16x32xf32, #tpu.memory_space<vmem>>, vector<16x32xf32>,
    %c0_14 = arith.constant 0 : index
    %c0_15 = arith.constant 0 : index
    %17 = vector.load %arg6[%c0_14, %c0_15] : memref<32x32xf32, #tpu.memory_space<vmem>>, vector<32x32xf32>
    %c0_16 = arith.constant 0 : index
    %c0_17 = arith.constant 0 : index
    %18 = vector.load %arg7[%c0_16, %c0_17] : memref<1x32xf32, #tpu.memory_space<vmem>>, vector<1x32xf32>
    %19 = arith.truncf %7 : vector<16x32xf32> to vector<16x32xbf16>
    %20 = arith.truncf %17 : vector<32x32xf32> to vector<32x32xbf16>
    %cst_18 = arith.constant dense<0.000000e+00> : vector<16x32xf32>
    %21 = tpu.matmul %19, %20, %cst_18 {dimension_numbers = #tpu.dot_dimension_numbers<[1], [0], [0], [1], [0, 0, 1, 1], [], []>} : vector<16x32xbf16>, vector<32x32xbf16>, vector<16x32xf32> -> vector<16x32xf32>
    %22 = vector.broadcast %18 : vector<1x32xf32> to vector<16x32xf32>
    %23 = arith.addf %21, %22 : vector<16x32xf32>
    %c0_19 = arith.constant 0 : index
    %c0_20 = arith.constant 0 : index
    %24 = vector.load %arg10[%c0_19, %c0_20] : memref<16x32xf32, #tpu.memory_space<vmem>>, vector<16x32xf32>
    tpu.vector_store %arg10[%c0_19, %c0_20], %23 {strides = array<i32>} : memref<16x32xf32, #tpu.memory_space<vmem>>, vector<16x32xf32>,
    %25 = arith.truncf %14 : vector<16x32xf32> to vector<16x32xbf16>
    %26 = arith.truncf %17 : vector<32x32xf32> to vector<32x32xbf16>
    %cst_21 = arith.constant dense<0.000000e+00> : vector<16x32xf32>
    %27 = tpu.matmul %25, %26, %cst_21 {dimension_numbers = #tpu.dot_dimension_numbers<[1], [0], [0], [1], [0, 0, 1, 1], [], []>} : vector<16x32xbf16>, vector<32x32xbf16>, vector<16x32xf32> -> vector<16x32xf32>
    %28 = vector.broadcast %18 : vector<1x32xf32> to vector<16x32xf32>
    %29 = arith.addf %27, %28 : vector<16x32xf32>
    %c0_22 = arith.constant 0 : index
    %c0_23 = arith.constant 0 : index
    %30 = vector.load %arg11[%c0_22, %c0_23] : memref<16x32xf32, #tpu.memory_space<vmem>>, vector<16x32xf32>
    tpu.vector_store %arg11[%c0_22, %c0_23], %29 {strides = array<i32>} : memref<16x32xf32, #tpu.memory_space<vmem>>, vector<16x32xf32>,
    return
  }
  func.func @transform_0(%arg0: i32) -> (i32, i32) {
    %c0_i32 = arith.constant 0 : i32
    %c0_i32_0 = arith.constant 0 : i32
    return %arg0, %c0_i32 : i32, i32
  }
  func.func @transform_1(%arg0: i32) -> (i32, i32) {
    %c0_i32 = arith.constant 0 : i32
    %c0_i32_0 = arith.constant 0 : i32
    %c0_i32_1 = arith.constant 0 : i32
    return %c0_i32, %c0_i32_0 : i32, i32
  }
  func.func @transform_2(%arg0: i32) -> (i32, i32) {
    %c0_i32 = arith.constant 0 : i32
    %c0_i32_0 = arith.constant 0 : i32
    %c0_i32_1 = arith.constant 0 : i32
    return %c0_i32, %c0_i32_0 : i32, i32
  }
  func.func @transform_3(%arg0: i32) -> (i32, i32) {
    %c0_i32 = arith.constant 0 : i32
    %c0_i32_0 = arith.constant 0 : i32
    %c0_i32_1 = arith.constant 0 : i32
    return %c0_i32, %c0_i32_0 : i32, i32
  }
  func.func @transform_4(%arg0: i32) -> (i32, i32) {
    %c0_i32 = arith.constant 0 : i32
    %c0_i32_0 = arith.constant 0 : i32
    %c0_i32_1 = arith.constant 0 : i32
    return %c0_i32, %c0_i32_0 : i32, i32
  }
  func.func @transform_5(%arg0: i32) -> (i32, i32) {
    %c0_i32 = arith.constant 0 : i32
    %c0_i32_0 = arith.constant 0 : i32
    %c0_i32_1 = arith.constant 0 : i32
    return %c0_i32, %c0_i32_0 : i32, i32
  }
  func.func @transform_6(%arg0: i32) -> (i32, i32) {
    %c0_i32 = arith.constant 0 : i32
    %c0_i32_0 = arith.constant 0 : i32
    %c0_i32_1 = arith.constant 0 : i32
    return %c0_i32, %c0_i32_0 : i32, i32
  }
  func.func @transform_7(%arg0: i32) -> (i32, i32) {
    %c0_i32 = arith.constant 0 : i32
    %c0_i32_0 = arith.constant 0 : i32
    return %arg0, %c0_i32 : i32, i32
  }
  func.func @transform_8(%arg0: i32) -> (i32, i32) {
    %c0_i32 = arith.constant 0 : i32
    %c0_i32_0 = arith.constant 0 : i32
    return %arg0, %c0_i32 : i32, i32
  }
  func.func @transform_9(%arg0: i32) -> (i32, i32) {
    %c0_i32 = arith.constant 0 : i32
    %c0_i32_0 = arith.constant 0 : i32
    return %arg0, %c0_i32 : i32, i32
  }
  func.func @transform_10(%arg0: i32) -> (i32, i32) {
    %c0_i32 = arith.constant 0 : i32
    %c0_i32_0 = arith.constant 0 : i32
    return %arg0, %c0_i32 : i32, i32
  }
}

module attributes {stable_mosaic.version = 11 : i64} {
  func.func @_edge_kv_kernel(%arg0: i32, %arg1: memref<16x32xf32, #tpu.memory_space<vmem>>, %arg2: memref<16x32xf32, #tpu.memory_space<vmem>>, %arg3: memref<16x32xf32, #tpu.memory_space<vmem>>, %arg4: memref<3x32x32xf32, #tpu.memory_space<vmem>>, %arg5: memref<1x32xf32, #tpu.memory_space<vmem>>, %arg6: memref<3x32x32xf32, #tpu.memory_space<vmem>>, %arg7: memref<1x32xf32, #tpu.memory_space<vmem>>, %arg8: memref<32x32xf32, #tpu.memory_space<vmem>>, %arg9: memref<1x32xf32, #tpu.memory_space<vmem>>, %arg10: memref<32x32xf32, #tpu.memory_space<vmem>>, %arg11: memref<1x32xf32, #tpu.memory_space<vmem>>, %arg12: memref<16x32xf32, #tpu.memory_space<vmem>>, %arg13: memref<16x32xf32, #tpu.memory_space<vmem>>, %arg14: memref<16x32xf32, #tpu.memory_space<vmem>>, %arg15: memref<16x32xf32, #tpu.memory_space<vmem>>) attributes {dimension_semantics = [#tpu.dimension_semantics<parallel>], iteration_bounds = array<i64: 1>, scalar_prefetch = 0 : i64, scratch_operands = 0 : i64, tpu.core_type = #tpu.core_type<tc>, window_params = [{transform_indices = @transform_0, window_bounds = array<i64: 16, 32>}, {transform_indices = @transform_1, window_bounds = array<i64: 16, 32>}, {transform_indices = @transform_2, window_bounds = array<i64: 16, 32>}, {pipeline_mode = #tpu.pipeline_mode<synchronous>, transform_indices = @transform_3, window_bounds = array<i64: 3, 32, 32>}, {pipeline_mode = #tpu.pipeline_mode<synchronous>, transform_indices = @transform_4, window_bounds = array<i64: 1, 32>}, {pipeline_mode = #tpu.pipeline_mode<synchronous>, transform_indices = @transform_5, window_bounds = array<i64: 3, 32, 32>}, {pipeline_mode = #tpu.pipeline_mode<synchronous>, transform_indices = @transform_6, window_bounds = array<i64: 1, 32>}, {pipeline_mode = #tpu.pipeline_mode<synchronous>, transform_indices = @transform_7, window_bounds = array<i64: 32, 32>}, {pipeline_mode = #tpu.pipeline_mode<synchronous>, transform_indices = @transform_8, window_bounds = array<i64: 1, 32>}, {pipeline_mode = #tpu.pipeline_mode<synchronous>, transform_indices = @transform_9, window_bounds = array<i64: 32, 32>}, {pipeline_mode = #tpu.pipeline_mode<synchronous>, transform_indices = @transform_10, window_bounds = array<i64: 1, 32>}, {transform_indices = @transform_11, window_bounds = array<i64: 16, 32>}, {transform_indices = @transform_12, window_bounds = array<i64: 16, 32>}, {transform_indices = @transform_13, window_bounds = array<i64: 16, 32>}, {transform_indices = @transform_14, window_bounds = array<i64: 16, 32>}]} {
    %c0 = arith.constant 0 : index
    %c0_0 = arith.constant 0 : index
    %0 = vector.load %arg1[%c0, %c0_0] : memref<16x32xf32, #tpu.memory_space<vmem>>, vector<16x32xf32>
    %c0_1 = arith.constant 0 : index
    %c0_2 = arith.constant 0 : index
    %1 = vector.load %arg2[%c0_1, %c0_2] : memref<16x32xf32, #tpu.memory_space<vmem>>, vector<16x32xf32>
    %c0_3 = arith.constant 0 : index
    %c0_4 = arith.constant 0 : index
    %2 = vector.load %arg3[%c0_3, %c0_4] : memref<16x32xf32, #tpu.memory_space<vmem>>, vector<16x32xf32>
    %c0_5 = arith.constant 0 : index
    %c0_6 = arith.constant 0 : index
    %c0_7 = arith.constant 0 : index
    %3 = vector.load %arg4[%c0_5, %c0_6, %c0_7] : memref<3x32x32xf32, #tpu.memory_space<vmem>>, vector<1x32x32xf32>
    %4 = vector.shape_cast %3 : vector<1x32x32xf32> to vector<32x32xf32>
    %5 = arith.truncf %0 : vector<16x32xf32> to vector<16x32xbf16>
    %6 = arith.truncf %4 : vector<32x32xf32> to vector<32x32xbf16>
    %cst = arith.constant dense<0.000000e+00> : vector<16x32xf32>
    %7 = tpu.matmul %5, %6, %cst {dimension_numbers = #tpu.dot_dimension_numbers<[1], [0], [0], [1], [0, 0, 1, 1], [], []>} : vector<16x32xbf16>, vector<32x32xbf16>, vector<16x32xf32> -> vector<16x32xf32>
    %c1 = arith.constant 1 : index
    %c0_8 = arith.constant 0 : index
    %c0_9 = arith.constant 0 : index
    %8 = vector.load %arg4[%c1, %c0_8, %c0_9] : memref<3x32x32xf32, #tpu.memory_space<vmem>>, vector<1x32x32xf32>
    %9 = vector.shape_cast %8 : vector<1x32x32xf32> to vector<32x32xf32>
    %10 = arith.truncf %1 : vector<16x32xf32> to vector<16x32xbf16>
    %11 = arith.truncf %9 : vector<32x32xf32> to vector<32x32xbf16>
    %cst_10 = arith.constant dense<0.000000e+00> : vector<16x32xf32>
    %12 = tpu.matmul %10, %11, %cst_10 {dimension_numbers = #tpu.dot_dimension_numbers<[1], [0], [0], [1], [0, 0, 1, 1], [], []>} : vector<16x32xbf16>, vector<32x32xbf16>, vector<16x32xf32> -> vector<16x32xf32>
    %13 = arith.addf %7, %12 : vector<16x32xf32>
    %c2 = arith.constant 2 : index
    %c0_11 = arith.constant 0 : index
    %c0_12 = arith.constant 0 : index
    %14 = vector.load %arg4[%c2, %c0_11, %c0_12] : memref<3x32x32xf32, #tpu.memory_space<vmem>>, vector<1x32x32xf32>
    %15 = vector.shape_cast %14 : vector<1x32x32xf32> to vector<32x32xf32>
    %16 = arith.truncf %2 : vector<16x32xf32> to vector<16x32xbf16>
    %17 = arith.truncf %15 : vector<32x32xf32> to vector<32x32xbf16>
    %cst_13 = arith.constant dense<0.000000e+00> : vector<16x32xf32>
    %18 = tpu.matmul %16, %17, %cst_13 {dimension_numbers = #tpu.dot_dimension_numbers<[1], [0], [0], [1], [0, 0, 1, 1], [], []>} : vector<16x32xbf16>, vector<32x32xbf16>, vector<16x32xf32> -> vector<16x32xf32>
    %19 = arith.addf %13, %18 : vector<16x32xf32>
    %c0_14 = arith.constant 0 : index
    %c0_15 = arith.constant 0 : index
    %20 = vector.load %arg5[%c0_14, %c0_15] : memref<1x32xf32, #tpu.memory_space<vmem>>, vector<1x32xf32>
    %21 = vector.broadcast %20 : vector<1x32xf32> to vector<16x32xf32>
    %22 = arith.addf %19, %21 : vector<16x32xf32>
    %c0_16 = arith.constant 0 : index
    %c0_17 = arith.constant 0 : index
    %c0_18 = arith.constant 0 : index
    %23 = vector.load %arg6[%c0_16, %c0_17, %c0_18] : memref<3x32x32xf32, #tpu.memory_space<vmem>>, vector<1x32x32xf32>
    %24 = vector.shape_cast %23 : vector<1x32x32xf32> to vector<32x32xf32>
    %25 = arith.truncf %0 : vector<16x32xf32> to vector<16x32xbf16>
    %26 = arith.truncf %24 : vector<32x32xf32> to vector<32x32xbf16>
    %cst_19 = arith.constant dense<0.000000e+00> : vector<16x32xf32>
    %27 = tpu.matmul %25, %26, %cst_19 {dimension_numbers = #tpu.dot_dimension_numbers<[1], [0], [0], [1], [0, 0, 1, 1], [], []>} : vector<16x32xbf16>, vector<32x32xbf16>, vector<16x32xf32> -> vector<16x32xf32>
    %c1_20 = arith.constant 1 : index
    %c0_21 = arith.constant 0 : index
    %c0_22 = arith.constant 0 : index
    %28 = vector.load %arg6[%c1_20, %c0_21, %c0_22] : memref<3x32x32xf32, #tpu.memory_space<vmem>>, vector<1x32x32xf32>
    %29 = vector.shape_cast %28 : vector<1x32x32xf32> to vector<32x32xf32>
    %30 = arith.truncf %1 : vector<16x32xf32> to vector<16x32xbf16>
    %31 = arith.truncf %29 : vector<32x32xf32> to vector<32x32xbf16>
    %cst_23 = arith.constant dense<0.000000e+00> : vector<16x32xf32>
    %32 = tpu.matmul %30, %31, %cst_23 {dimension_numbers = #tpu.dot_dimension_numbers<[1], [0], [0], [1], [0, 0, 1, 1], [], []>} : vector<16x32xbf16>, vector<32x32xbf16>, vector<16x32xf32> -> vector<16x32xf32>
    %33 = arith.addf %27, %32 : vector<16x32xf32>
    %c2_24 = arith.constant 2 : index
    %c0_25 = arith.constant 0 : index
    %c0_26 = arith.constant 0 : index
    %34 = vector.load %arg6[%c2_24, %c0_25, %c0_26] : memref<3x32x32xf32, #tpu.memory_space<vmem>>, vector<1x32x32xf32>
    %35 = vector.shape_cast %34 : vector<1x32x32xf32> to vector<32x32xf32>
    %36 = arith.truncf %2 : vector<16x32xf32> to vector<16x32xbf16>
    %37 = arith.truncf %35 : vector<32x32xf32> to vector<32x32xbf16>
    %cst_27 = arith.constant dense<0.000000e+00> : vector<16x32xf32>
    %38 = tpu.matmul %36, %37, %cst_27 {dimension_numbers = #tpu.dot_dimension_numbers<[1], [0], [0], [1], [0, 0, 1, 1], [], []>} : vector<16x32xbf16>, vector<32x32xbf16>, vector<16x32xf32> -> vector<16x32xf32>
    %39 = arith.addf %33, %38 : vector<16x32xf32>
    %c0_28 = arith.constant 0 : index
    %c0_29 = arith.constant 0 : index
    %40 = vector.load %arg7[%c0_28, %c0_29] : memref<1x32xf32, #tpu.memory_space<vmem>>, vector<1x32xf32>
    %41 = vector.broadcast %40 : vector<1x32xf32> to vector<16x32xf32>
    %42 = arith.addf %39, %41 : vector<16x32xf32>
    %c0_30 = arith.constant 0 : index
    %c0_31 = arith.constant 0 : index
    %43 = vector.load %arg8[%c0_30, %c0_31] : memref<32x32xf32, #tpu.memory_space<vmem>>, vector<32x32xf32>
    %c0_32 = arith.constant 0 : index
    %c0_33 = arith.constant 0 : index
    %44 = vector.load %arg10[%c0_32, %c0_33] : memref<32x32xf32, #tpu.memory_space<vmem>>, vector<32x32xf32>
    %c0_34 = arith.constant 0 : index
    %c0_35 = arith.constant 0 : index
    %45 = vector.load %arg9[%c0_34, %c0_35] : memref<1x32xf32, #tpu.memory_space<vmem>>, vector<1x32xf32>
    %c0_36 = arith.constant 0 : index
    %c0_37 = arith.constant 0 : index
    %46 = vector.load %arg11[%c0_36, %c0_37] : memref<1x32xf32, #tpu.memory_space<vmem>>, vector<1x32xf32>
    %47 = arith.truncf %22 : vector<16x32xf32> to vector<16x32xbf16>
    %48 = arith.truncf %43 : vector<32x32xf32> to vector<32x32xbf16>
    %cst_38 = arith.constant dense<0.000000e+00> : vector<16x32xf32>
    %49 = tpu.matmul %47, %48, %cst_38 {dimension_numbers = #tpu.dot_dimension_numbers<[1], [0], [0], [1], [0, 0, 1, 1], [], []>} : vector<16x32xbf16>, vector<32x32xbf16>, vector<16x32xf32> -> vector<16x32xf32>
    %50 = vector.broadcast %45 : vector<1x32xf32> to vector<16x32xf32>
    %51 = arith.addf %49, %50 : vector<16x32xf32>
    %c0_39 = arith.constant 0 : index
    %c0_40 = arith.constant 0 : index
    %52 = vector.load %arg12[%c0_39, %c0_40] : memref<16x32xf32, #tpu.memory_space<vmem>>, vector<16x32xf32>
    tpu.vector_store %arg12[%c0_39, %c0_40], %51 {strides = array<i32>} : memref<16x32xf32, #tpu.memory_space<vmem>>, vector<16x32xf32>,
    %53 = arith.truncf %22 : vector<16x32xf32> to vector<16x32xbf16>
    %54 = arith.truncf %44 : vector<32x32xf32> to vector<32x32xbf16>
    %cst_41 = arith.constant dense<0.000000e+00> : vector<16x32xf32>
    %55 = tpu.matmul %53, %54, %cst_41 {dimension_numbers = #tpu.dot_dimension_numbers<[1], [0], [0], [1], [0, 0, 1, 1], [], []>} : vector<16x32xbf16>, vector<32x32xbf16>, vector<16x32xf32> -> vector<16x32xf32>
    %56 = vector.broadcast %46 : vector<1x32xf32> to vector<16x32xf32>
    %57 = arith.addf %55, %56 : vector<16x32xf32>
    %c0_42 = arith.constant 0 : index
    %c0_43 = arith.constant 0 : index
    %58 = vector.load %arg13[%c0_42, %c0_43] : memref<16x32xf32, #tpu.memory_space<vmem>>, vector<16x32xf32>
    tpu.vector_store %arg13[%c0_42, %c0_43], %57 {strides = array<i32>} : memref<16x32xf32, #tpu.memory_space<vmem>>, vector<16x32xf32>,
    %59 = arith.truncf %42 : vector<16x32xf32> to vector<16x32xbf16>
    %60 = arith.truncf %43 : vector<32x32xf32> to vector<32x32xbf16>
    %cst_44 = arith.constant dense<0.000000e+00> : vector<16x32xf32>
    %61 = tpu.matmul %59, %60, %cst_44 {dimension_numbers = #tpu.dot_dimension_numbers<[1], [0], [0], [1], [0, 0, 1, 1], [], []>} : vector<16x32xbf16>, vector<32x32xbf16>, vector<16x32xf32> -> vector<16x32xf32>
    %62 = vector.broadcast %45 : vector<1x32xf32> to vector<16x32xf32>
    %63 = arith.addf %61, %62 : vector<16x32xf32>
    %c0_45 = arith.constant 0 : index
    %c0_46 = arith.constant 0 : index
    %64 = vector.load %arg14[%c0_45, %c0_46] : memref<16x32xf32, #tpu.memory_space<vmem>>, vector<16x32xf32>
    tpu.vector_store %arg14[%c0_45, %c0_46], %63 {strides = array<i32>} : memref<16x32xf32, #tpu.memory_space<vmem>>, vector<16x32xf32>,
    %65 = arith.truncf %42 : vector<16x32xf32> to vector<16x32xbf16>
    %66 = arith.truncf %44 : vector<32x32xf32> to vector<32x32xbf16>
    %cst_47 = arith.constant dense<0.000000e+00> : vector<16x32xf32>
    %67 = tpu.matmul %65, %66, %cst_47 {dimension_numbers = #tpu.dot_dimension_numbers<[1], [0], [0], [1], [0, 0, 1, 1], [], []>} : vector<16x32xbf16>, vector<32x32xbf16>, vector<16x32xf32> -> vector<16x32xf32>
    %68 = vector.broadcast %46 : vector<1x32xf32> to vector<16x32xf32>
    %69 = arith.addf %67, %68 : vector<16x32xf32>
    %c0_48 = arith.constant 0 : index
    %c0_49 = arith.constant 0 : index
    %70 = vector.load %arg15[%c0_48, %c0_49] : memref<16x32xf32, #tpu.memory_space<vmem>>, vector<16x32xf32>
    tpu.vector_store %arg15[%c0_48, %c0_49], %69 {strides = array<i32>} : memref<16x32xf32, #tpu.memory_space<vmem>>, vector<16x32xf32>,
    return
  }
  func.func @transform_0(%arg0: i32) -> (i32, i32) {
    %c0_i32 = arith.constant 0 : i32
    %c0_i32_0 = arith.constant 0 : i32
    return %arg0, %c0_i32 : i32, i32
  }
  func.func @transform_1(%arg0: i32) -> (i32, i32) {
    %c0_i32 = arith.constant 0 : i32
    %c0_i32_0 = arith.constant 0 : i32
    return %arg0, %c0_i32 : i32, i32
  }
  func.func @transform_2(%arg0: i32) -> (i32, i32) {
    %c0_i32 = arith.constant 0 : i32
    %c0_i32_0 = arith.constant 0 : i32
    return %arg0, %c0_i32 : i32, i32
  }
  func.func @transform_3(%arg0: i32) -> (i32, i32, i32) {
    %c0_i32 = arith.constant 0 : i32
    %c0_i32_0 = arith.constant 0 : i32
    %c0_i32_1 = arith.constant 0 : i32
    %c0_i32_2 = arith.constant 0 : i32
    return %c0_i32, %c0_i32_0, %c0_i32_1 : i32, i32, i32
  }
  func.func @transform_4(%arg0: i32) -> (i32, i32) {
    %c0_i32 = arith.constant 0 : i32
    %c0_i32_0 = arith.constant 0 : i32
    %c0_i32_1 = arith.constant 0 : i32
    return %c0_i32, %c0_i32_0 : i32, i32
  }
  func.func @transform_5(%arg0: i32) -> (i32, i32, i32) {
    %c0_i32 = arith.constant 0 : i32
    %c0_i32_0 = arith.constant 0 : i32
    %c0_i32_1 = arith.constant 0 : i32
    %c0_i32_2 = arith.constant 0 : i32
    return %c0_i32, %c0_i32_0, %c0_i32_1 : i32, i32, i32
  }
  func.func @transform_6(%arg0: i32) -> (i32, i32) {
    %c0_i32 = arith.constant 0 : i32
    %c0_i32_0 = arith.constant 0 : i32
    %c0_i32_1 = arith.constant 0 : i32
    return %c0_i32, %c0_i32_0 : i32, i32
  }
  func.func @transform_7(%arg0: i32) -> (i32, i32) {
    %c0_i32 = arith.constant 0 : i32
    %c0_i32_0 = arith.constant 0 : i32
    %c0_i32_1 = arith.constant 0 : i32
    return %c0_i32, %c0_i32_0 : i32, i32
  }
  func.func @transform_8(%arg0: i32) -> (i32, i32) {
    %c0_i32 = arith.constant 0 : i32
    %c0_i32_0 = arith.constant 0 : i32
    %c0_i32_1 = arith.constant 0 : i32
    return %c0_i32, %c0_i32_0 : i32, i32
  }
  func.func @transform_9(%arg0: i32) -> (i32, i32) {
    %c0_i32 = arith.constant 0 : i32
    %c0_i32_0 = arith.constant 0 : i32
    %c0_i32_1 = arith.constant 0 : i32
    return %c0_i32, %c0_i32_0 : i32, i32
  }
  func.func @transform_10(%arg0: i32) -> (i32, i32) {
    %c0_i32 = arith.constant 0 : i32
    %c0_i32_0 = arith.constant 0 : i32
    %c0_i32_1 = arith.constant 0 : i32
    return %c0_i32, %c0_i32_0 : i32, i32
  }
  func.func @transform_11(%arg0: i32) -> (i32, i32) {
    %c0_i32 = arith.constant 0 : i32
    %c0_i32_0 = arith.constant 0 : i32
    return %arg0, %c0_i32 : i32, i32
  }
  func.func @transform_12(%arg0: i32) -> (i32, i32) {
    %c0_i32 = arith.constant 0 : i32
    %c0_i32_0 = arith.constant 0 : i32
    return %arg0, %c0_i32 : i32, i32
  }
  func.func @transform_13(%arg0: i32) -> (i32, i32) {
    %c0_i32 = arith.constant 0 : i32
    %c0_i32_0 = arith.constant 0 : i32
    return %arg0, %c0_i32 : i32, i32
  }
  func.func @transform_14(%arg0: i32) -> (i32, i32) {
    %c0_i32 = arith.constant 0 : i32
    %c0_i32_0 = arith.constant 0 : i32
    return %arg0, %c0_i32 : i32, i32
  }
}

module attributes {stable_mosaic.version = 11 : i64} {
  func.func @_ffn_ln_kernel(%arg0: i32, %arg1: memref<16x32xf32, #tpu.memory_space<vmem>>, %arg2: memref<32x64xf32, #tpu.memory_space<vmem>>, %arg3: memref<1x64xf32, #tpu.memory_space<vmem>>, %arg4: memref<64x32xf32, #tpu.memory_space<vmem>>, %arg5: memref<1x32xf32, #tpu.memory_space<vmem>>, %arg6: memref<1x32xf32, #tpu.memory_space<vmem>>, %arg7: memref<1x32xf32, #tpu.memory_space<vmem>>, %arg8: memref<16x32xf32, #tpu.memory_space<vmem>>) attributes {dimension_semantics = [#tpu.dimension_semantics<parallel>], iteration_bounds = array<i64: 1>, scalar_prefetch = 0 : i64, scratch_operands = 0 : i64, tpu.core_type = #tpu.core_type<tc>, window_params = [{transform_indices = @transform_0, window_bounds = array<i64: 16, 32>}, {pipeline_mode = #tpu.pipeline_mode<synchronous>, transform_indices = @transform_1, window_bounds = array<i64: 32, 64>}, {pipeline_mode = #tpu.pipeline_mode<synchronous>, transform_indices = @transform_2, window_bounds = array<i64: 1, 64>}, {pipeline_mode = #tpu.pipeline_mode<synchronous>, transform_indices = @transform_3, window_bounds = array<i64: 64, 32>}, {pipeline_mode = #tpu.pipeline_mode<synchronous>, transform_indices = @transform_4, window_bounds = array<i64: 1, 32>}, {pipeline_mode = #tpu.pipeline_mode<synchronous>, transform_indices = @transform_5, window_bounds = array<i64: 1, 32>}, {pipeline_mode = #tpu.pipeline_mode<synchronous>, transform_indices = @transform_6, window_bounds = array<i64: 1, 32>}, {transform_indices = @transform_7, window_bounds = array<i64: 16, 32>}]} {
    %c0 = arith.constant 0 : index
    %c0_0 = arith.constant 0 : index
    %0 = vector.load %arg1[%c0, %c0_0] : memref<16x32xf32, #tpu.memory_space<vmem>>, vector<16x32xf32>
    %c0_1 = arith.constant 0 : index
    %c0_2 = arith.constant 0 : index
    %1 = vector.load %arg2[%c0_1, %c0_2] : memref<32x64xf32, #tpu.memory_space<vmem>>, vector<32x64xf32>
    %2 = arith.truncf %0 : vector<16x32xf32> to vector<16x32xbf16>
    %3 = arith.truncf %1 : vector<32x64xf32> to vector<32x64xbf16>
    %cst = arith.constant dense<0.000000e+00> : vector<16x64xf32>
    %4 = tpu.matmul %2, %3, %cst {dimension_numbers = #tpu.dot_dimension_numbers<[1], [0], [0], [1], [0, 0, 1, 1], [], []>} : vector<16x32xbf16>, vector<32x64xbf16>, vector<16x64xf32> -> vector<16x64xf32>
    %c0_3 = arith.constant 0 : index
    %c0_4 = arith.constant 0 : index
    %5 = vector.load %arg3[%c0_3, %c0_4] : memref<1x64xf32, #tpu.memory_space<vmem>>, vector<1x64xf32>
    %6 = vector.broadcast %5 : vector<1x64xf32> to vector<16x64xf32>
    %7 = arith.addf %4, %6 : vector<16x64xf32>
    %cst_5 = arith.constant 0.000000e+00 : f32
    %8 = vector.broadcast %cst_5 : f32 to vector<16x64xf32>
    %9 = arith.maximumf %7, %8 : vector<16x64xf32>
    %c0_6 = arith.constant 0 : index
    %c0_7 = arith.constant 0 : index
    %10 = vector.load %arg4[%c0_6, %c0_7] : memref<64x32xf32, #tpu.memory_space<vmem>>, vector<64x32xf32>
    %11 = arith.truncf %9 : vector<16x64xf32> to vector<16x64xbf16>
    %12 = arith.truncf %10 : vector<64x32xf32> to vector<64x32xbf16>
    %cst_8 = arith.constant dense<0.000000e+00> : vector<16x32xf32>
    %13 = tpu.matmul %11, %12, %cst_8 {dimension_numbers = #tpu.dot_dimension_numbers<[1], [0], [0], [1], [0, 0, 1, 1], [], []>} : vector<16x64xbf16>, vector<64x32xbf16>, vector<16x32xf32> -> vector<16x32xf32>
    %c0_9 = arith.constant 0 : index
    %c0_10 = arith.constant 0 : index
    %14 = vector.load %arg5[%c0_9, %c0_10] : memref<1x32xf32, #tpu.memory_space<vmem>>, vector<1x32xf32>
    %15 = vector.broadcast %14 : vector<1x32xf32> to vector<16x32xf32>
    %16 = arith.addf %13, %15 : vector<16x32xf32>
    %17 = arith.addf %16, %0 : vector<16x32xf32>
    %c0_11 = arith.constant 0 : index
    %c0_12 = arith.constant 0 : index
    %18 = vector.load %arg6[%c0_11, %c0_12] : memref<1x32xf32, #tpu.memory_space<vmem>>, vector<1x32xf32>
    %c0_13 = arith.constant 0 : index
    %c0_14 = arith.constant 0 : index
    %19 = vector.load %arg7[%c0_13, %c0_14] : memref<1x32xf32, #tpu.memory_space<vmem>>, vector<1x32xf32>
    %cst_15 = arith.constant dense<0.000000e+00> : vector<16xf32>
    %20 = vector.multi_reduction <add>, %17, %cst_15 [1] : vector<16x32xf32> to vector<16xf32>
    %21 = vector.shape_cast %20 : vector<16xf32> to vector<16x1xf32>
    %cst_16 = arith.constant 3.200000e+01 : f32
    %22 = vector.broadcast %cst_16 : f32 to vector<16x1xf32>
    %23 = arith.divf %21, %22 : vector<16x1xf32>
    %24 = vector.broadcast %23 : vector<16x1xf32> to vector<16x32xf32>
    %25 = arith.subf %17, %24 : vector<16x32xf32>
    %26 = arith.mulf %25, %25 : vector<16x32xf32>
    %cst_17 = arith.constant dense<0.000000e+00> : vector<16xf32>
    %27 = vector.multi_reduction <add>, %26, %cst_17 [1] : vector<16x32xf32> to vector<16xf32>
    %28 = vector.shape_cast %27 : vector<16xf32> to vector<16x1xf32>
    %cst_18 = arith.constant 3.200000e+01 : f32
    %29 = vector.broadcast %cst_18 : f32 to vector<16x1xf32>
    %30 = arith.divf %28, %29 : vector<16x1xf32>
    %cst_19 = arith.constant 9.99999974E-6 : f32
    %31 = vector.broadcast %cst_19 : f32 to vector<16x1xf32>
    %32 = arith.addf %30, %31 : vector<16x1xf32>
    %33 = math.rsqrt %32 : vector<16x1xf32>
    %34 = vector.broadcast %33 : vector<16x1xf32> to vector<16x32xf32>
    %35 = arith.mulf %25, %34 : vector<16x32xf32>
    %36 = vector.broadcast %18 : vector<1x32xf32> to vector<16x32xf32>
    %37 = arith.mulf %35, %36 : vector<16x32xf32>
    %38 = vector.broadcast %19 : vector<1x32xf32> to vector<16x32xf32>
    %39 = arith.addf %37, %38 : vector<16x32xf32>
    %c0_20 = arith.constant 0 : index
    %c0_21 = arith.constant 0 : index
    %40 = vector.load %arg8[%c0_20, %c0_21] : memref<16x32xf32, #tpu.memory_space<vmem>>, vector<16x32xf32>
    tpu.vector_store %arg8[%c0_20, %c0_21], %39 {strides = array<i32>} : memref<16x32xf32, #tpu.memory_space<vmem>>, vector<16x32xf32>,
    return
  }
  func.func @transform_0(%arg0: i32) -> (i32, i32) {
    %c0_i32 = arith.constant 0 : i32
    %c0_i32_0 = arith.constant 0 : i32
    return %arg0, %c0_i32 : i32, i32
  }
  func.func @transform_1(%arg0: i32) -> (i32, i32) {
    %c0_i32 = arith.constant 0 : i32
    %c0_i32_0 = arith.constant 0 : i32
    %c0_i32_1 = arith.constant 0 : i32
    return %c0_i32, %c0_i32_0 : i32, i32
  }
  func.func @transform_2(%arg0: i32) -> (i32, i32) {
    %c0_i32 = arith.constant 0 : i32
    %c0_i32_0 = arith.constant 0 : i32
    %c0_i32_1 = arith.constant 0 : i32
    return %c0_i32, %c0_i32_0 : i32, i32
  }
  func.func @transform_3(%arg0: i32) -> (i32, i32) {
    %c0_i32 = arith.constant 0 : i32
    %c0_i32_0 = arith.constant 0 : i32
    %c0_i32_1 = arith.constant 0 : i32
    return %c0_i32, %c0_i32_0 : i32, i32
  }
  func.func @transform_4(%arg0: i32) -> (i32, i32) {
    %c0_i32 = arith.constant 0 : i32
    %c0_i32_0 = arith.constant 0 : i32
    %c0_i32_1 = arith.constant 0 : i32
    return %c0_i32, %c0_i32_0 : i32, i32
  }
  func.func @transform_5(%arg0: i32) -> (i32, i32) {
    %c0_i32 = arith.constant 0 : i32
    %c0_i32_0 = arith.constant 0 : i32
    %c0_i32_1 = arith.constant 0 : i32
    return %c0_i32, %c0_i32_0 : i32, i32
  }
  func.func @transform_6(%arg0: i32) -> (i32, i32) {
    %c0_i32 = arith.constant 0 : i32
    %c0_i32_0 = arith.constant 0 : i32
    %c0_i32_1 = arith.constant 0 : i32
    return %c0_i32, %c0_i32_0 : i32, i32
  }
  func.func @transform_7(%arg0: i32) -> (i32, i32) {
    %c0_i32 = arith.constant 0 : i32
    %c0_i32_0 = arith.constant 0 : i32
    return %arg0, %c0_i32 : i32, i32
  }
}

module attributes {stable_mosaic.version = 11 : i64} {
  func.func @_graph_attn_fuse_ln_kernel(%arg0: i32, %arg1: memref<1x8x32xf32, #tpu.memory_space<vmem>>, %arg2: memref<1x8x32xf32, #tpu.memory_space<vmem>>, %arg3: memref<1x8x32xf32, #tpu.memory_space<vmem>>, %arg4: memref<1x8x32xf32, #tpu.memory_space<vmem>>, %arg5: memref<1x8x32xf32, #tpu.memory_space<vmem>>, %arg6: memref<1x8x32xf32, #tpu.memory_space<vmem>>, %arg7: memref<1x1x8xf32, #tpu.memory_space<vmem>>, %arg8: memref<1x8x8xf32, #tpu.memory_space<vmem>>, %arg9: memref<1x8x8xf32, #tpu.memory_space<vmem>>, %arg10: memref<1x8x1xf32, #tpu.memory_space<vmem>>, %arg11: memref<1x8x32xf32, #tpu.memory_space<vmem>>, %arg12: memref<32x32xf32, #tpu.memory_space<vmem>>, %arg13: memref<1x32xf32, #tpu.memory_space<vmem>>, %arg14: memref<1x32xf32, #tpu.memory_space<vmem>>, %arg15: memref<1x32xf32, #tpu.memory_space<vmem>>, %arg16: memref<1x1xf32, #tpu.memory_space<vmem>>, %arg17: memref<1x32xf32, #tpu.memory_space<vmem>>, %arg18: memref<1x32xf32, #tpu.memory_space<vmem>>, %arg19: memref<1x8x32xf32, #tpu.memory_space<vmem>>) attributes {dimension_semantics = [#tpu.dimension_semantics<parallel>], iteration_bounds = array<i64: 2>, scalar_prefetch = 0 : i64, scratch_operands = 0 : i64, tpu.core_type = #tpu.core_type<tc>, window_params = [{transform_indices = @transform_0, window_bounds = array<i64: 1, 8, 32>}, {transform_indices = @transform_1, window_bounds = array<i64: 1, 8, 32>}, {transform_indices = @transform_2, window_bounds = array<i64: 1, 8, 32>}, {transform_indices = @transform_3, window_bounds = array<i64: 1, 8, 32>}, {transform_indices = @transform_4, window_bounds = array<i64: 1, 8, 32>}, {transform_indices = @transform_5, window_bounds = array<i64: 1, 8, 32>}, {transform_indices = @transform_6, window_bounds = array<i64: 1, 1, 8>}, {transform_indices = @transform_7, window_bounds = array<i64: 1, 8, 8>}, {transform_indices = @transform_8, window_bounds = array<i64: 1, 8, 8>}, {transform_indices = @transform_9, window_bounds = array<i64: 1, 8, 1>}, {transform_indices = @transform_10, window_bounds = array<i64: 1, 8, 32>}, {pipeline_mode = #tpu.pipeline_mode<synchronous>, transform_indices = @transform_11, window_bounds = array<i64: 32, 32>}, {pipeline_mode = #tpu.pipeline_mode<synchronous>, transform_indices = @transform_12, window_bounds = array<i64: 1, 32>}, {pipeline_mode = #tpu.pipeline_mode<synchronous>, transform_indices = @transform_13, window_bounds = array<i64: 1, 32>}, {pipeline_mode = #tpu.pipeline_mode<synchronous>, transform_indices = @transform_14, window_bounds = array<i64: 1, 32>}, {pipeline_mode = #tpu.pipeline_mode<synchronous>, transform_indices = @transform_15, window_bounds = array<i64: 1, 1>}, {pipeline_mode = #tpu.pipeline_mode<synchronous>, transform_indices = @transform_16, window_bounds = array<i64: 1, 32>}, {pipeline_mode = #tpu.pipeline_mode<synchronous>, transform_indices = @transform_17, window_bounds = array<i64: 1, 32>}, {transform_indices = @transform_18, window_bounds = array<i64: 1, 8, 32>}]} {
    %c0 = arith.constant 0 : index
    %c0_0 = arith.constant 0 : index
    %c0_1 = arith.constant 0 : index
    %0 = vector.load %arg7[%c0, %c0_0, %c0_1] : memref<1x1x8xf32, #tpu.memory_space<vmem>>, vector<1x1x8xf32>
    %1 = vector.shape_cast %0 : vector<1x1x8xf32> to vector<1x8xf32>
    %c0_2 = arith.constant 0 : index
    %c0_3 = arith.constant 0 : index
    %c0_4 = arith.constant 0 : index
    %2 = vector.load %arg10[%c0_2, %c0_3, %c0_4] : memref<1x8x1xf32, #tpu.memory_space<vmem>>, vector<1x8x1xf32>
    %3 = vector.shape_cast %2 : vector<1x8x1xf32> to vector<8x1xf32>
    %c0_5 = arith.constant 0 : index
    %c0_6 = arith.constant 0 : index
    %c0_7 = arith.constant 0 : index
    %4 = vector.load %arg1[%c0_5, %c0_6, %c0_7] : memref<1x8x32xf32, #tpu.memory_space<vmem>>, vector<1x8x32xf32>
    %5 = vector.shape_cast %4 : vector<1x8x32xf32> to vector<8x32xf32>
    %c0_8 = arith.constant 0 : index
    %c0_9 = arith.constant 0 : index
    %c0_10 = arith.constant 0 : index
    %6 = vector.load %arg3[%c0_8, %c0_9, %c0_10] : memref<1x8x32xf32, #tpu.memory_space<vmem>>, vector<1x8x32xf32>
    %7 = vector.shape_cast %6 : vector<1x8x32xf32> to vector<8x32xf32>
    %c0_11 = arith.constant 0 : index
    %c0_12 = arith.constant 0 : index
    %c0_13 = arith.constant 0 : index
    %8 = vector.load %arg4[%c0_11, %c0_12, %c0_13] : memref<1x8x32xf32, #tpu.memory_space<vmem>>, vector<1x8x32xf32>
    %9 = vector.shape_cast %8 : vector<1x8x32xf32> to vector<8x32xf32>
    %c0_14 = arith.constant 0 : index
    %c0_15 = arith.constant 0 : index
    %c0_16 = arith.constant 0 : index
    %10 = vector.load %arg8[%c0_14, %c0_15, %c0_16] : memref<1x8x8xf32, #tpu.memory_space<vmem>>, vector<1x8x8xf32>
    %11 = vector.shape_cast %10 : vector<1x8x8xf32> to vector<8x8xf32>
    %12 = vector.broadcast %1 : vector<1x8xf32> to vector<8x8xf32>
    %13 = arith.addf %12, %11 : vector<8x8xf32>
    %cst = arith.constant 5.000000e-01 : f32
    %14 = vector.broadcast %cst : f32 to vector<8x8xf32>
    %15 = arith.cmpf ogt, %13, %14 : vector<8x8xf32>
    %cst_17 = arith.constant -1.000000e+09 : f32
    %cst_18 = arith.constant 0.000000e+00 : f32
    %16 = vector.broadcast %cst_17 : f32 to vector<8x8xf32>
    %17 = vector.broadcast %cst_18 : f32 to vector<8x8xf32>
    %18 = arith.select %15, %16, %17 : vector<8x8xi1>, vector<8x8xf32>
    %19 = vector.extract_strided_slice %5 {offsets = [0, 0], sizes = [8, 8], strides = [1, 1]} : vector<8x32xf32> to vector<8x8xf32>
    %20 = vector.extract_strided_slice %7 {offsets = [0, 0], sizes = [8, 8], strides = [1, 1]} : vector<8x32xf32> to vector<8x8xf32>
    %21 = vector.extract_strided_slice %9 {offsets = [0, 0], sizes = [8, 8], strides = [1, 1]} : vector<8x32xf32> to vector<8x8xf32>
    %22 = arith.truncf %19 : vector<8x8xf32> to vector<8x8xbf16>
    %23 = arith.truncf %20 : vector<8x8xf32> to vector<8x8xbf16>
    %24 = tpu.transpose %23, [1, 0] : vector<8x8xbf16> -> vector<8x8xbf16>
    %cst_19 = arith.constant dense<0.000000e+00> : vector<8x8xf32>
    %25 = tpu.matmul %22, %24, %cst_19 {dimension_numbers = #tpu.dot_dimension_numbers<[1], [0], [0], [1], [0, 0, 1, 1], [], []>} : vector<8x8xbf16>, vector<8x8xbf16>, vector<8x8xf32> -> vector<8x8xf32>
    %cst_20 = arith.constant 0.353553385 : f32
    %26 = vector.broadcast %cst_20 : f32 to vector<8x8xf32>
    %27 = arith.mulf %25, %26 : vector<8x8xf32>
    %28 = arith.addf %27, %18 : vector<8x8xf32>
    %cst_21 = arith.constant dense<0xFF800000> : vector<8xf32>
    %29 = vector.multi_reduction <maximumf>, %28, %cst_21 [1] : vector<8x8xf32> to vector<8xf32>
    %30 = vector.shape_cast %29 : vector<8xf32> to vector<8x1xf32>
    %31 = vector.broadcast %30 : vector<8x1xf32> to vector<8x8xf32>
    %32 = arith.subf %28, %31 : vector<8x8xf32>
    %33 = math.exp %32 : vector<8x8xf32>
    %cst_22 = arith.constant dense<0.000000e+00> : vector<8xf32>
    %34 = vector.multi_reduction <add>, %33, %cst_22 [1] : vector<8x8xf32> to vector<8xf32>
    %35 = vector.shape_cast %34 : vector<8xf32> to vector<8x1xf32>
    %36 = tpu.reciprocal %35 {approx = true} : vector<8x1xf32> -> vector<8x1xf32>
    %37 = vector.broadcast %36 : vector<8x1xf32> to vector<8x8xf32>
    %38 = arith.mulf %33, %37 : vector<8x8xf32>
    %39 = arith.truncf %38 : vector<8x8xf32> to vector<8x8xbf16>
    %40 = arith.truncf %21 : vector<8x8xf32> to vector<8x8xbf16>
    %cst_23 = arith.constant dense<0.000000e+00> : vector<8x8xf32>
    %41 = tpu.matmul %39, %40, %cst_23 {dimension_numbers = #tpu.dot_dimension_numbers<[1], [0], [0], [1], [0, 0, 1, 1], [], []>} : vector<8x8xbf16>, vector<8x8xbf16>, vector<8x8xf32> -> vector<8x8xf32>
    %42 = vector.extract_strided_slice %5 {offsets = [0, 8], sizes = [8, 8], strides = [1, 1]} : vector<8x32xf32> to vector<8x8xf32>
    %43 = vector.extract_strided_slice %7 {offsets = [0, 8], sizes = [8, 8], strides = [1, 1]} : vector<8x32xf32> to vector<8x8xf32>
    %44 = vector.extract_strided_slice %9 {offsets = [0, 8], sizes = [8, 8], strides = [1, 1]} : vector<8x32xf32> to vector<8x8xf32>
    %45 = arith.truncf %42 : vector<8x8xf32> to vector<8x8xbf16>
    %46 = arith.truncf %43 : vector<8x8xf32> to vector<8x8xbf16>
    %47 = tpu.transpose %46, [1, 0] : vector<8x8xbf16> -> vector<8x8xbf16>
    %cst_24 = arith.constant dense<0.000000e+00> : vector<8x8xf32>
    %48 = tpu.matmul %45, %47, %cst_24 {dimension_numbers = #tpu.dot_dimension_numbers<[1], [0], [0], [1], [0, 0, 1, 1], [], []>} : vector<8x8xbf16>, vector<8x8xbf16>, vector<8x8xf32> -> vector<8x8xf32>
    %cst_25 = arith.constant 0.353553385 : f32
    %49 = vector.broadcast %cst_25 : f32 to vector<8x8xf32>
    %50 = arith.mulf %48, %49 : vector<8x8xf32>
    %51 = arith.addf %50, %18 : vector<8x8xf32>
    %cst_26 = arith.constant dense<0xFF800000> : vector<8xf32>
    %52 = vector.multi_reduction <maximumf>, %51, %cst_26 [1] : vector<8x8xf32> to vector<8xf32>
    %53 = vector.shape_cast %52 : vector<8xf32> to vector<8x1xf32>
    %54 = vector.broadcast %53 : vector<8x1xf32> to vector<8x8xf32>
    %55 = arith.subf %51, %54 : vector<8x8xf32>
    %56 = math.exp %55 : vector<8x8xf32>
    %cst_27 = arith.constant dense<0.000000e+00> : vector<8xf32>
    %57 = vector.multi_reduction <add>, %56, %cst_27 [1] : vector<8x8xf32> to vector<8xf32>
    %58 = vector.shape_cast %57 : vector<8xf32> to vector<8x1xf32>
    %59 = tpu.reciprocal %58 {approx = true} : vector<8x1xf32> -> vector<8x1xf32>
    %60 = vector.broadcast %59 : vector<8x1xf32> to vector<8x8xf32>
    %61 = arith.mulf %56, %60 : vector<8x8xf32>
    %62 = arith.truncf %61 : vector<8x8xf32> to vector<8x8xbf16>
    %63 = arith.truncf %44 : vector<8x8xf32> to vector<8x8xbf16>
    %cst_28 = arith.constant dense<0.000000e+00> : vector<8x8xf32>
    %64 = tpu.matmul %62, %63, %cst_28 {dimension_numbers = #tpu.dot_dimension_numbers<[1], [0], [0], [1], [0, 0, 1, 1], [], []>} : vector<8x8xbf16>, vector<8x8xbf16>, vector<8x8xf32> -> vector<8x8xf32>
    %65 = vector.extract_strided_slice %5 {offsets = [0, 16], sizes = [8, 8], strides = [1, 1]} : vector<8x32xf32> to vector<8x8xf32>
    %66 = vector.extract_strided_slice %7 {offsets = [0, 16], sizes = [8, 8], strides = [1, 1]} : vector<8x32xf32> to vector<8x8xf32>
    %67 = vector.extract_strided_slice %9 {offsets = [0, 16], sizes = [8, 8], strides = [1, 1]} : vector<8x32xf32> to vector<8x8xf32>
    %68 = arith.truncf %65 : vector<8x8xf32> to vector<8x8xbf16>
    %69 = arith.truncf %66 : vector<8x8xf32> to vector<8x8xbf16>
    %70 = tpu.transpose %69, [1, 0] : vector<8x8xbf16> -> vector<8x8xbf16>
    %cst_29 = arith.constant dense<0.000000e+00> : vector<8x8xf32>
    %71 = tpu.matmul %68, %70, %cst_29 {dimension_numbers = #tpu.dot_dimension_numbers<[1], [0], [0], [1], [0, 0, 1, 1], [], []>} : vector<8x8xbf16>, vector<8x8xbf16>, vector<8x8xf32> -> vector<8x8xf32>
    %cst_30 = arith.constant 0.353553385 : f32
    %72 = vector.broadcast %cst_30 : f32 to vector<8x8xf32>
    %73 = arith.mulf %71, %72 : vector<8x8xf32>
    %74 = arith.addf %73, %18 : vector<8x8xf32>
    %cst_31 = arith.constant dense<0xFF800000> : vector<8xf32>
    %75 = vector.multi_reduction <maximumf>, %74, %cst_31 [1] : vector<8x8xf32> to vector<8xf32>
    %76 = vector.shape_cast %75 : vector<8xf32> to vector<8x1xf32>
    %77 = vector.broadcast %76 : vector<8x1xf32> to vector<8x8xf32>
    %78 = arith.subf %74, %77 : vector<8x8xf32>
    %79 = math.exp %78 : vector<8x8xf32>
    %cst_32 = arith.constant dense<0.000000e+00> : vector<8xf32>
    %80 = vector.multi_reduction <add>, %79, %cst_32 [1] : vector<8x8xf32> to vector<8xf32>
    %81 = vector.shape_cast %80 : vector<8xf32> to vector<8x1xf32>
    %82 = tpu.reciprocal %81 {approx = true} : vector<8x1xf32> -> vector<8x1xf32>
    %83 = vector.broadcast %82 : vector<8x1xf32> to vector<8x8xf32>
    %84 = arith.mulf %79, %83 : vector<8x8xf32>
    %85 = arith.truncf %84 : vector<8x8xf32> to vector<8x8xbf16>
    %86 = arith.truncf %67 : vector<8x8xf32> to vector<8x8xbf16>
    %cst_33 = arith.constant dense<0.000000e+00> : vector<8x8xf32>
    %87 = tpu.matmul %85, %86, %cst_33 {dimension_numbers = #tpu.dot_dimension_numbers<[1], [0], [0], [1], [0, 0, 1, 1], [], []>} : vector<8x8xbf16>, vector<8x8xbf16>, vector<8x8xf32> -> vector<8x8xf32>
    %88 = vector.extract_strided_slice %5 {offsets = [0, 24], sizes = [8, 8], strides = [1, 1]} : vector<8x32xf32> to vector<8x8xf32>
    %89 = vector.extract_strided_slice %7 {offsets = [0, 24], sizes = [8, 8], strides = [1, 1]} : vector<8x32xf32> to vector<8x8xf32>
    %90 = vector.extract_strided_slice %9 {offsets = [0, 24], sizes = [8, 8], strides = [1, 1]} : vector<8x32xf32> to vector<8x8xf32>
    %91 = arith.truncf %88 : vector<8x8xf32> to vector<8x8xbf16>
    %92 = arith.truncf %89 : vector<8x8xf32> to vector<8x8xbf16>
    %93 = tpu.transpose %92, [1, 0] : vector<8x8xbf16> -> vector<8x8xbf16>
    %cst_34 = arith.constant dense<0.000000e+00> : vector<8x8xf32>
    %94 = tpu.matmul %91, %93, %cst_34 {dimension_numbers = #tpu.dot_dimension_numbers<[1], [0], [0], [1], [0, 0, 1, 1], [], []>} : vector<8x8xbf16>, vector<8x8xbf16>, vector<8x8xf32> -> vector<8x8xf32>
    %cst_35 = arith.constant 0.353553385 : f32
    %95 = vector.broadcast %cst_35 : f32 to vector<8x8xf32>
    %96 = arith.mulf %94, %95 : vector<8x8xf32>
    %97 = arith.addf %96, %18 : vector<8x8xf32>
    %cst_36 = arith.constant dense<0xFF800000> : vector<8xf32>
    %98 = vector.multi_reduction <maximumf>, %97, %cst_36 [1] : vector<8x8xf32> to vector<8xf32>
    %99 = vector.shape_cast %98 : vector<8xf32> to vector<8x1xf32>
    %100 = vector.broadcast %99 : vector<8x1xf32> to vector<8x8xf32>
    %101 = arith.subf %97, %100 : vector<8x8xf32>
    %102 = math.exp %101 : vector<8x8xf32>
    %cst_37 = arith.constant dense<0.000000e+00> : vector<8xf32>
    %103 = vector.multi_reduction <add>, %102, %cst_37 [1] : vector<8x8xf32> to vector<8xf32>
    %104 = vector.shape_cast %103 : vector<8xf32> to vector<8x1xf32>
    %105 = tpu.reciprocal %104 {approx = true} : vector<8x1xf32> -> vector<8x1xf32>
    %106 = vector.broadcast %105 : vector<8x1xf32> to vector<8x8xf32>
    %107 = arith.mulf %102, %106 : vector<8x8xf32>
    %108 = arith.truncf %107 : vector<8x8xf32> to vector<8x8xbf16>
    %109 = arith.truncf %90 : vector<8x8xf32> to vector<8x8xbf16>
    %cst_38 = arith.constant dense<0.000000e+00> : vector<8x8xf32>
    %110 = tpu.matmul %108, %109, %cst_38 {dimension_numbers = #tpu.dot_dimension_numbers<[1], [0], [0], [1], [0, 0, 1, 1], [], []>} : vector<8x8xbf16>, vector<8x8xbf16>, vector<8x8xf32> -> vector<8x8xf32>
    %111 = tpu.concatenate %41, %64, %87, %110 in 1 : vector<8x8xf32>, vector<8x8xf32>, vector<8x8xf32>, vector<8x8xf32> -> vector<8x32xf32>
    %112 = vector.broadcast %3 : vector<8x1xf32> to vector<8x32xf32>
    %113 = arith.mulf %111, %112 : vector<8x32xf32>
    %c0_39 = arith.constant 0 : index
    %c0_40 = arith.constant 0 : index
    %c0_41 = arith.constant 0 : index
    %114 = vector.load %arg2[%c0_39, %c0_40, %c0_41] : memref<1x8x32xf32, #tpu.memory_space<vmem>>, vector<1x8x32xf32>
    %115 = vector.shape_cast %114 : vector<1x8x32xf32> to vector<8x32xf32>
    %c0_42 = arith.constant 0 : index
    %c0_43 = arith.constant 0 : index
    %c0_44 = arith.constant 0 : index
    %116 = vector.load %arg5[%c0_42, %c0_43, %c0_44] : memref<1x8x32xf32, #tpu.memory_space<vmem>>, vector<1x8x32xf32>
    %117 = vector.shape_cast %116 : vector<1x8x32xf32> to vector<8x32xf32>
    %c0_45 = arith.constant 0 : index
    %c0_46 = arith.constant 0 : index
    %c0_47 = arith.constant 0 : index
    %118 = vector.load %arg6[%c0_45, %c0_46, %c0_47] : memref<1x8x32xf32, #tpu.memory_space<vmem>>, vector<1x8x32xf32>
    %119 = vector.shape_cast %118 : vector<1x8x32xf32> to vector<8x32xf32>
    %c0_48 = arith.constant 0 : index
    %c0_49 = arith.constant 0 : index
    %c0_50 = arith.constant 0 : index
    %120 = vector.load %arg9[%c0_48, %c0_49, %c0_50] : memref<1x8x8xf32, #tpu.memory_space<vmem>>, vector<1x8x8xf32>
    %121 = vector.shape_cast %120 : vector<1x8x8xf32> to vector<8x8xf32>
    %122 = vector.broadcast %1 : vector<1x8xf32> to vector<8x8xf32>
    %123 = arith.addf %122, %121 : vector<8x8xf32>
    %cst_51 = arith.constant 5.000000e-01 : f32
    %124 = vector.broadcast %cst_51 : f32 to vector<8x8xf32>
    %125 = arith.cmpf ogt, %123, %124 : vector<8x8xf32>
    %cst_52 = arith.constant -1.000000e+09 : f32
    %cst_53 = arith.constant 0.000000e+00 : f32
    %126 = vector.broadcast %cst_52 : f32 to vector<8x8xf32>
    %127 = vector.broadcast %cst_53 : f32 to vector<8x8xf32>
    %128 = arith.select %125, %126, %127 : vector<8x8xi1>, vector<8x8xf32>
    %129 = vector.extract_strided_slice %115 {offsets = [0, 0], sizes = [8, 8], strides = [1, 1]} : vector<8x32xf32> to vector<8x8xf32>
    %130 = vector.extract_strided_slice %117 {offsets = [0, 0], sizes = [8, 8], strides = [1, 1]} : vector<8x32xf32> to vector<8x8xf32>
    %131 = vector.extract_strided_slice %119 {offsets = [0, 0], sizes = [8, 8], strides = [1, 1]} : vector<8x32xf32> to vector<8x8xf32>
    %132 = arith.truncf %129 : vector<8x8xf32> to vector<8x8xbf16>
    %133 = arith.truncf %130 : vector<8x8xf32> to vector<8x8xbf16>
    %134 = tpu.transpose %133, [1, 0] : vector<8x8xbf16> -> vector<8x8xbf16>
    %cst_54 = arith.constant dense<0.000000e+00> : vector<8x8xf32>
    %135 = tpu.matmul %132, %134, %cst_54 {dimension_numbers = #tpu.dot_dimension_numbers<[1], [0], [0], [1], [0, 0, 1, 1], [], []>} : vector<8x8xbf16>, vector<8x8xbf16>, vector<8x8xf32> -> vector<8x8xf32>
    %cst_55 = arith.constant 0.353553385 : f32
    %136 = vector.broadcast %cst_55 : f32 to vector<8x8xf32>
    %137 = arith.mulf %135, %136 : vector<8x8xf32>
    %138 = arith.addf %137, %128 : vector<8x8xf32>
    %cst_56 = arith.constant dense<0xFF800000> : vector<8xf32>
    %139 = vector.multi_reduction <maximumf>, %138, %cst_56 [1] : vector<8x8xf32> to vector<8xf32>
    %140 = vector.shape_cast %139 : vector<8xf32> to vector<8x1xf32>
    %141 = vector.broadcast %140 : vector<8x1xf32> to vector<8x8xf32>
    %142 = arith.subf %138, %141 : vector<8x8xf32>
    %143 = math.exp %142 : vector<8x8xf32>
    %cst_57 = arith.constant dense<0.000000e+00> : vector<8xf32>
    %144 = vector.multi_reduction <add>, %143, %cst_57 [1] : vector<8x8xf32> to vector<8xf32>
    %145 = vector.shape_cast %144 : vector<8xf32> to vector<8x1xf32>
    %146 = tpu.reciprocal %145 {approx = true} : vector<8x1xf32> -> vector<8x1xf32>
    %147 = vector.broadcast %146 : vector<8x1xf32> to vector<8x8xf32>
    %148 = arith.mulf %143, %147 : vector<8x8xf32>
    %149 = arith.truncf %148 : vector<8x8xf32> to vector<8x8xbf16>
    %150 = arith.truncf %131 : vector<8x8xf32> to vector<8x8xbf16>
    %cst_58 = arith.constant dense<0.000000e+00> : vector<8x8xf32>
    %151 = tpu.matmul %149, %150, %cst_58 {dimension_numbers = #tpu.dot_dimension_numbers<[1], [0], [0], [1], [0, 0, 1, 1], [], []>} : vector<8x8xbf16>, vector<8x8xbf16>, vector<8x8xf32> -> vector<8x8xf32>
    %152 = vector.extract_strided_slice %115 {offsets = [0, 8], sizes = [8, 8], strides = [1, 1]} : vector<8x32xf32> to vector<8x8xf32>
    %153 = vector.extract_strided_slice %117 {offsets = [0, 8], sizes = [8, 8], strides = [1, 1]} : vector<8x32xf32> to vector<8x8xf32>
    %154 = vector.extract_strided_slice %119 {offsets = [0, 8], sizes = [8, 8], strides = [1, 1]} : vector<8x32xf32> to vector<8x8xf32>
    %155 = arith.truncf %152 : vector<8x8xf32> to vector<8x8xbf16>
    %156 = arith.truncf %153 : vector<8x8xf32> to vector<8x8xbf16>
    %157 = tpu.transpose %156, [1, 0] : vector<8x8xbf16> -> vector<8x8xbf16>
    %cst_59 = arith.constant dense<0.000000e+00> : vector<8x8xf32>
    %158 = tpu.matmul %155, %157, %cst_59 {dimension_numbers = #tpu.dot_dimension_numbers<[1], [0], [0], [1], [0, 0, 1, 1], [], []>} : vector<8x8xbf16>, vector<8x8xbf16>, vector<8x8xf32> -> vector<8x8xf32>
    %cst_60 = arith.constant 0.353553385 : f32
    %159 = vector.broadcast %cst_60 : f32 to vector<8x8xf32>
    %160 = arith.mulf %158, %159 : vector<8x8xf32>
    %161 = arith.addf %160, %128 : vector<8x8xf32>
    %cst_61 = arith.constant dense<0xFF800000> : vector<8xf32>
    %162 = vector.multi_reduction <maximumf>, %161, %cst_61 [1] : vector<8x8xf32> to vector<8xf32>
    %163 = vector.shape_cast %162 : vector<8xf32> to vector<8x1xf32>
    %164 = vector.broadcast %163 : vector<8x1xf32> to vector<8x8xf32>
    %165 = arith.subf %161, %164 : vector<8x8xf32>
    %166 = math.exp %165 : vector<8x8xf32>
    %cst_62 = arith.constant dense<0.000000e+00> : vector<8xf32>
    %167 = vector.multi_reduction <add>, %166, %cst_62 [1] : vector<8x8xf32> to vector<8xf32>
    %168 = vector.shape_cast %167 : vector<8xf32> to vector<8x1xf32>
    %169 = tpu.reciprocal %168 {approx = true} : vector<8x1xf32> -> vector<8x1xf32>
    %170 = vector.broadcast %169 : vector<8x1xf32> to vector<8x8xf32>
    %171 = arith.mulf %166, %170 : vector<8x8xf32>
    %172 = arith.truncf %171 : vector<8x8xf32> to vector<8x8xbf16>
    %173 = arith.truncf %154 : vector<8x8xf32> to vector<8x8xbf16>
    %cst_63 = arith.constant dense<0.000000e+00> : vector<8x8xf32>
    %174 = tpu.matmul %172, %173, %cst_63 {dimension_numbers = #tpu.dot_dimension_numbers<[1], [0], [0], [1], [0, 0, 1, 1], [], []>} : vector<8x8xbf16>, vector<8x8xbf16>, vector<8x8xf32> -> vector<8x8xf32>
    %175 = vector.extract_strided_slice %115 {offsets = [0, 16], sizes = [8, 8], strides = [1, 1]} : vector<8x32xf32> to vector<8x8xf32>
    %176 = vector.extract_strided_slice %117 {offsets = [0, 16], sizes = [8, 8], strides = [1, 1]} : vector<8x32xf32> to vector<8x8xf32>
    %177 = vector.extract_strided_slice %119 {offsets = [0, 16], sizes = [8, 8], strides = [1, 1]} : vector<8x32xf32> to vector<8x8xf32>
    %178 = arith.truncf %175 : vector<8x8xf32> to vector<8x8xbf16>
    %179 = arith.truncf %176 : vector<8x8xf32> to vector<8x8xbf16>
    %180 = tpu.transpose %179, [1, 0] : vector<8x8xbf16> -> vector<8x8xbf16>
    %cst_64 = arith.constant dense<0.000000e+00> : vector<8x8xf32>
    %181 = tpu.matmul %178, %180, %cst_64 {dimension_numbers = #tpu.dot_dimension_numbers<[1], [0], [0], [1], [0, 0, 1, 1], [], []>} : vector<8x8xbf16>, vector<8x8xbf16>, vector<8x8xf32> -> vector<8x8xf32>
    %cst_65 = arith.constant 0.353553385 : f32
    %182 = vector.broadcast %cst_65 : f32 to vector<8x8xf32>
    %183 = arith.mulf %181, %182 : vector<8x8xf32>
    %184 = arith.addf %183, %128 : vector<8x8xf32>
    %cst_66 = arith.constant dense<0xFF800000> : vector<8xf32>
    %185 = vector.multi_reduction <maximumf>, %184, %cst_66 [1] : vector<8x8xf32> to vector<8xf32>
    %186 = vector.shape_cast %185 : vector<8xf32> to vector<8x1xf32>
    %187 = vector.broadcast %186 : vector<8x1xf32> to vector<8x8xf32>
    %188 = arith.subf %184, %187 : vector<8x8xf32>
    %189 = math.exp %188 : vector<8x8xf32>
    %cst_67 = arith.constant dense<0.000000e+00> : vector<8xf32>
    %190 = vector.multi_reduction <add>, %189, %cst_67 [1] : vector<8x8xf32> to vector<8xf32>
    %191 = vector.shape_cast %190 : vector<8xf32> to vector<8x1xf32>
    %192 = tpu.reciprocal %191 {approx = true} : vector<8x1xf32> -> vector<8x1xf32>
    %193 = vector.broadcast %192 : vector<8x1xf32> to vector<8x8xf32>
    %194 = arith.mulf %189, %193 : vector<8x8xf32>
    %195 = arith.truncf %194 : vector<8x8xf32> to vector<8x8xbf16>
    %196 = arith.truncf %177 : vector<8x8xf32> to vector<8x8xbf16>
    %cst_68 = arith.constant dense<0.000000e+00> : vector<8x8xf32>
    %197 = tpu.matmul %195, %196, %cst_68 {dimension_numbers = #tpu.dot_dimension_numbers<[1], [0], [0], [1], [0, 0, 1, 1], [], []>} : vector<8x8xbf16>, vector<8x8xbf16>, vector<8x8xf32> -> vector<8x8xf32>
    %198 = vector.extract_strided_slice %115 {offsets = [0, 24], sizes = [8, 8], strides = [1, 1]} : vector<8x32xf32> to vector<8x8xf32>
    %199 = vector.extract_strided_slice %117 {offsets = [0, 24], sizes = [8, 8], strides = [1, 1]} : vector<8x32xf32> to vector<8x8xf32>
    %200 = vector.extract_strided_slice %119 {offsets = [0, 24], sizes = [8, 8], strides = [1, 1]} : vector<8x32xf32> to vector<8x8xf32>
    %201 = arith.truncf %198 : vector<8x8xf32> to vector<8x8xbf16>
    %202 = arith.truncf %199 : vector<8x8xf32> to vector<8x8xbf16>
    %203 = tpu.transpose %202, [1, 0] : vector<8x8xbf16> -> vector<8x8xbf16>
    %cst_69 = arith.constant dense<0.000000e+00> : vector<8x8xf32>
    %204 = tpu.matmul %201, %203, %cst_69 {dimension_numbers = #tpu.dot_dimension_numbers<[1], [0], [0], [1], [0, 0, 1, 1], [], []>} : vector<8x8xbf16>, vector<8x8xbf16>, vector<8x8xf32> -> vector<8x8xf32>
    %cst_70 = arith.constant 0.353553385 : f32
    %205 = vector.broadcast %cst_70 : f32 to vector<8x8xf32>
    %206 = arith.mulf %204, %205 : vector<8x8xf32>
    %207 = arith.addf %206, %128 : vector<8x8xf32>
    %cst_71 = arith.constant dense<0xFF800000> : vector<8xf32>
    %208 = vector.multi_reduction <maximumf>, %207, %cst_71 [1] : vector<8x8xf32> to vector<8xf32>
    %209 = vector.shape_cast %208 : vector<8xf32> to vector<8x1xf32>
    %210 = vector.broadcast %209 : vector<8x1xf32> to vector<8x8xf32>
    %211 = arith.subf %207, %210 : vector<8x8xf32>
    %212 = math.exp %211 : vector<8x8xf32>
    %cst_72 = arith.constant dense<0.000000e+00> : vector<8xf32>
    %213 = vector.multi_reduction <add>, %212, %cst_72 [1] : vector<8x8xf32> to vector<8xf32>
    %214 = vector.shape_cast %213 : vector<8xf32> to vector<8x1xf32>
    %215 = tpu.reciprocal %214 {approx = true} : vector<8x1xf32> -> vector<8x1xf32>
    %216 = vector.broadcast %215 : vector<8x1xf32> to vector<8x8xf32>
    %217 = arith.mulf %212, %216 : vector<8x8xf32>
    %218 = arith.truncf %217 : vector<8x8xf32> to vector<8x8xbf16>
    %219 = arith.truncf %200 : vector<8x8xf32> to vector<8x8xbf16>
    %cst_73 = arith.constant dense<0.000000e+00> : vector<8x8xf32>
    %220 = tpu.matmul %218, %219, %cst_73 {dimension_numbers = #tpu.dot_dimension_numbers<[1], [0], [0], [1], [0, 0, 1, 1], [], []>} : vector<8x8xbf16>, vector<8x8xbf16>, vector<8x8xf32> -> vector<8x8xf32>
    %221 = tpu.concatenate %151, %174, %197, %220 in 1 : vector<8x8xf32>, vector<8x8xf32>, vector<8x8xf32>, vector<8x8xf32> -> vector<8x32xf32>
    %222 = vector.broadcast %3 : vector<8x1xf32> to vector<8x32xf32>
    %223 = arith.mulf %221, %222 : vector<8x32xf32>
    %c0_74 = arith.constant 0 : index
    %c0_75 = arith.constant 0 : index
    %224 = vector.load %arg12[%c0_74, %c0_75] : memref<32x32xf32, #tpu.memory_space<vmem>>, vector<32x32xf32>
    %c0_76 = arith.constant 0 : index
    %c0_77 = arith.constant 0 : index
    %225 = vector.load %arg13[%c0_76, %c0_77] : memref<1x32xf32, #tpu.memory_space<vmem>>, vector<1x32xf32>
    %226 = arith.truncf %113 : vector<8x32xf32> to vector<8x32xbf16>
    %227 = arith.truncf %224 : vector<32x32xf32> to vector<32x32xbf16>
    %cst_78 = arith.constant dense<0.000000e+00> : vector<8x32xf32>
    %228 = tpu.matmul %226, %227, %cst_78 {dimension_numbers = #tpu.dot_dimension_numbers<[1], [0], [0], [1], [0, 0, 1, 1], [], []>} : vector<8x32xbf16>, vector<32x32xbf16>, vector<8x32xf32> -> vector<8x32xf32>
    %229 = vector.broadcast %225 : vector<1x32xf32> to vector<8x32xf32>
    %230 = arith.addf %228, %229 : vector<8x32xf32>
    %231 = arith.truncf %223 : vector<8x32xf32> to vector<8x32xbf16>
    %232 = arith.truncf %224 : vector<32x32xf32> to vector<32x32xbf16>
    %cst_79 = arith.constant dense<0.000000e+00> : vector<8x32xf32>
    %233 = tpu.matmul %231, %232, %cst_79 {dimension_numbers = #tpu.dot_dimension_numbers<[1], [0], [0], [1], [0, 0, 1, 1], [], []>} : vector<8x32xbf16>, vector<32x32xbf16>, vector<8x32xf32> -> vector<8x32xf32>
    %234 = vector.broadcast %225 : vector<1x32xf32> to vector<8x32xf32>
    %235 = arith.addf %233, %234 : vector<8x32xf32>
    %c0_80 = arith.constant 0 : index
    %c0_81 = arith.constant 0 : index
    %236 = vector.load %arg14[%c0_80, %c0_81] : memref<1x32xf32, #tpu.memory_space<vmem>>, vector<1x32xf32>
    %237 = vector.broadcast %236 : vector<1x32xf32> to vector<8x32xf32>
    %238 = arith.mulf %230, %237 : vector<8x32xf32>
    %cst_82 = arith.constant dense<0.000000e+00> : vector<8xf32>
    %239 = vector.multi_reduction <add>, %238, %cst_82 [1] : vector<8x32xf32> to vector<8xf32>
    %240 = vector.shape_cast %239 : vector<8xf32> to vector<8x1xf32>
    %c0_83 = arith.constant 0 : index
    %c0_84 = arith.constant 0 : index
    %241 = vector.load %arg15[%c0_83, %c0_84] : memref<1x32xf32, #tpu.memory_space<vmem>>, vector<1x32xf32>
    %242 = vector.broadcast %241 : vector<1x32xf32> to vector<8x32xf32>
    %243 = arith.mulf %235, %242 : vector<8x32xf32>
    %cst_85 = arith.constant dense<0.000000e+00> : vector<8xf32>
    %244 = vector.multi_reduction <add>, %243, %cst_85 [1] : vector<8x32xf32> to vector<8xf32>
    %245 = vector.shape_cast %244 : vector<8xf32> to vector<8x1xf32>
    %246 = arith.addf %240, %245 : vector<8x1xf32>
    %c0_86 = arith.constant 0 : index
    %c0_87 = arith.constant 0 : index
    %247 = vector.load %arg16[%c0_86, %c0_87] : memref<1x1xf32, #tpu.memory_space<vmem>>, vector<1x1xf32>
    %248 = vector.broadcast %247 : vector<1x1xf32> to vector<8x1xf32>
    %249 = arith.addf %246, %248 : vector<8x1xf32>
    %cst_88 = arith.constant 0.000000e+00 : f32
    %250 = vector.broadcast %cst_88 : f32 to vector<8x1xf32>
    %251 = arith.subf %250, %249 : vector<8x1xf32>
    %252 = math.exp %251 : vector<8x1xf32>
    %cst_89 = arith.constant 1.000000e+00 : f32
    %253 = vector.broadcast %cst_89 : f32 to vector<8x1xf32>
    %254 = arith.addf %253, %252 : vector<8x1xf32>
    %cst_90 = arith.constant 1.000000e+00 : f32
    %255 = vector.broadcast %cst_90 : f32 to vector<8x1xf32>
    %256 = arith.divf %255, %254 : vector<8x1xf32>
    %257 = vector.broadcast %256 : vector<8x1xf32> to vector<8x32xf32>
    %258 = arith.mulf %257, %230 : vector<8x32xf32>
    %cst_91 = arith.constant 1.000000e+00 : f32
    %259 = vector.broadcast %cst_91 : f32 to vector<8x1xf32>
    %260 = arith.subf %259, %256 : vector<8x1xf32>
    %261 = vector.broadcast %260 : vector<8x1xf32> to vector<8x32xf32>
    %262 = arith.mulf %261, %235 : vector<8x32xf32>
    %263 = arith.addf %258, %262 : vector<8x32xf32>
    %c0_92 = arith.constant 0 : index
    %c0_93 = arith.constant 0 : index
    %c0_94 = arith.constant 0 : index
    %264 = vector.load %arg11[%c0_92, %c0_93, %c0_94] : memref<1x8x32xf32, #tpu.memory_space<vmem>>, vector<1x8x32xf32>
    %265 = vector.shape_cast %264 : vector<1x8x32xf32> to vector<8x32xf32>
    %266 = arith.addf %263, %265 : vector<8x32xf32>
    %c0_95 = arith.constant 0 : index
    %c0_96 = arith.constant 0 : index
    %267 = vector.load %arg17[%c0_95, %c0_96] : memref<1x32xf32, #tpu.memory_space<vmem>>, vector<1x32xf32>
    %c0_97 = arith.constant 0 : index
    %c0_98 = arith.constant 0 : index
    %268 = vector.load %arg18[%c0_97, %c0_98] : memref<1x32xf32, #tpu.memory_space<vmem>>, vector<1x32xf32>
    %cst_99 = arith.constant dense<0.000000e+00> : vector<8xf32>
    %269 = vector.multi_reduction <add>, %266, %cst_99 [1] : vector<8x32xf32> to vector<8xf32>
    %270 = vector.shape_cast %269 : vector<8xf32> to vector<8x1xf32>
    %cst_100 = arith.constant 3.200000e+01 : f32
    %271 = vector.broadcast %cst_100 : f32 to vector<8x1xf32>
    %272 = arith.divf %270, %271 : vector<8x1xf32>
    %273 = vector.broadcast %272 : vector<8x1xf32> to vector<8x32xf32>
    %274 = arith.subf %266, %273 : vector<8x32xf32>
    %275 = arith.mulf %274, %274 : vector<8x32xf32>
    %cst_101 = arith.constant dense<0.000000e+00> : vector<8xf32>
    %276 = vector.multi_reduction <add>, %275, %cst_101 [1] : vector<8x32xf32> to vector<8xf32>
    %277 = vector.shape_cast %276 : vector<8xf32> to vector<8x1xf32>
    %cst_102 = arith.constant 3.200000e+01 : f32
    %278 = vector.broadcast %cst_102 : f32 to vector<8x1xf32>
    %279 = arith.divf %277, %278 : vector<8x1xf32>
    %cst_103 = arith.constant 9.99999974E-6 : f32
    %280 = vector.broadcast %cst_103 : f32 to vector<8x1xf32>
    %281 = arith.addf %279, %280 : vector<8x1xf32>
    %282 = math.rsqrt %281 : vector<8x1xf32>
    %283 = vector.broadcast %282 : vector<8x1xf32> to vector<8x32xf32>
    %284 = arith.mulf %274, %283 : vector<8x32xf32>
    %285 = vector.broadcast %267 : vector<1x32xf32> to vector<8x32xf32>
    %286 = arith.mulf %284, %285 : vector<8x32xf32>
    %287 = vector.broadcast %268 : vector<1x32xf32> to vector<8x32xf32>
    %288 = arith.addf %286, %287 : vector<8x32xf32>
    %c0_104 = arith.constant 0 : index
    %c0_105 = arith.constant 0 : index
    %c0_106 = arith.constant 0 : index
    %289 = vector.load %arg19[%c0_104, %c0_105, %c0_106] : memref<1x8x32xf32, #tpu.memory_space<vmem>>, vector<1x8x32xf32>
    %290 = vector.shape_cast %289 : vector<1x8x32xf32> to vector<8x32xf32>
    %291 = vector.shape_cast %288 : vector<8x32xf32> to vector<1x8x32xf32>
    tpu.vector_store %arg19[%c0_104, %c0_105, %c0_106], %291 {strides = array<i32>} : memref<1x8x32xf32, #tpu.memory_space<vmem>>, vector<1x8x32xf32>,
    return
  }
  func.func @transform_0(%arg0: i32) -> (i32, i32, i32) {
    %c0_i32 = arith.constant 0 : i32
    %c0_i32_0 = arith.constant 0 : i32
    %c0_i32_1 = arith.constant 0 : i32
    return %arg0, %c0_i32, %c0_i32_0 : i32, i32, i32
  }
  func.func @transform_1(%arg0: i32) -> (i32, i32, i32) {
    %c0_i32 = arith.constant 0 : i32
    %c0_i32_0 = arith.constant 0 : i32
    %c0_i32_1 = arith.constant 0 : i32
    return %arg0, %c0_i32, %c0_i32_0 : i32, i32, i32
  }
  func.func @transform_2(%arg0: i32) -> (i32, i32, i32) {
    %c0_i32 = arith.constant 0 : i32
    %c0_i32_0 = arith.constant 0 : i32
    %c0_i32_1 = arith.constant 0 : i32
    return %arg0, %c0_i32, %c0_i32_0 : i32, i32, i32
  }
  func.func @transform_3(%arg0: i32) -> (i32, i32, i32) {
    %c0_i32 = arith.constant 0 : i32
    %c0_i32_0 = arith.constant 0 : i32
    %c0_i32_1 = arith.constant 0 : i32
    return %arg0, %c0_i32, %c0_i32_0 : i32, i32, i32
  }
  func.func @transform_4(%arg0: i32) -> (i32, i32, i32) {
    %c0_i32 = arith.constant 0 : i32
    %c0_i32_0 = arith.constant 0 : i32
    %c0_i32_1 = arith.constant 0 : i32
    return %arg0, %c0_i32, %c0_i32_0 : i32, i32, i32
  }
  func.func @transform_5(%arg0: i32) -> (i32, i32, i32) {
    %c0_i32 = arith.constant 0 : i32
    %c0_i32_0 = arith.constant 0 : i32
    %c0_i32_1 = arith.constant 0 : i32
    return %arg0, %c0_i32, %c0_i32_0 : i32, i32, i32
  }
  func.func @transform_6(%arg0: i32) -> (i32, i32, i32) {
    %c0_i32 = arith.constant 0 : i32
    %c0_i32_0 = arith.constant 0 : i32
    %c0_i32_1 = arith.constant 0 : i32
    return %arg0, %c0_i32, %c0_i32_0 : i32, i32, i32
  }
  func.func @transform_7(%arg0: i32) -> (i32, i32, i32) {
    %c0_i32 = arith.constant 0 : i32
    %c0_i32_0 = arith.constant 0 : i32
    %c0_i32_1 = arith.constant 0 : i32
    return %arg0, %c0_i32, %c0_i32_0 : i32, i32, i32
  }
  func.func @transform_8(%arg0: i32) -> (i32, i32, i32) {
    %c0_i32 = arith.constant 0 : i32
    %c0_i32_0 = arith.constant 0 : i32
    %c0_i32_1 = arith.constant 0 : i32
    return %arg0, %c0_i32, %c0_i32_0 : i32, i32, i32
  }
  func.func @transform_9(%arg0: i32) -> (i32, i32, i32) {
    %c0_i32 = arith.constant 0 : i32
    %c0_i32_0 = arith.constant 0 : i32
    %c0_i32_1 = arith.constant 0 : i32
    return %arg0, %c0_i32, %c0_i32_0 : i32, i32, i32
  }
  func.func @transform_10(%arg0: i32) -> (i32, i32, i32) {
    %c0_i32 = arith.constant 0 : i32
    %c0_i32_0 = arith.constant 0 : i32
    %c0_i32_1 = arith.constant 0 : i32
    return %arg0, %c0_i32, %c0_i32_0 : i32, i32, i32
  }
  func.func @transform_11(%arg0: i32) -> (i32, i32) {
    %c0_i32 = arith.constant 0 : i32
    %c0_i32_0 = arith.constant 0 : i32
    %c0_i32_1 = arith.constant 0 : i32
    return %c0_i32, %c0_i32_0 : i32, i32
  }
  func.func @transform_12(%arg0: i32) -> (i32, i32) {
    %c0_i32 = arith.constant 0 : i32
    %c0_i32_0 = arith.constant 0 : i32
    %c0_i32_1 = arith.constant 0 : i32
    return %c0_i32, %c0_i32_0 : i32, i32
  }
  func.func @transform_13(%arg0: i32) -> (i32, i32) {
    %c0_i32 = arith.constant 0 : i32
    %c0_i32_0 = arith.constant 0 : i32
    %c0_i32_1 = arith.constant 0 : i32
    return %c0_i32, %c0_i32_0 : i32, i32
  }
  func.func @transform_14(%arg0: i32) -> (i32, i32) {
    %c0_i32 = arith.constant 0 : i32
    %c0_i32_0 = arith.constant 0 : i32
    %c0_i32_1 = arith.constant 0 : i32
    return %c0_i32, %c0_i32_0 : i32, i32
  }
  func.func @transform_15(%arg0: i32) -> (i32, i32) {
    %c0_i32 = arith.constant 0 : i32
    %c0_i32_0 = arith.constant 0 : i32
    %c0_i32_1 = arith.constant 0 : i32
    return %c0_i32, %c0_i32_0 : i32, i32
  }
  func.func @transform_16(%arg0: i32) -> (i32, i32) {
    %c0_i32 = arith.constant 0 : i32
    %c0_i32_0 = arith.constant 0 : i32
    %c0_i32_1 = arith.constant 0 : i32
    return %c0_i32, %c0_i32_0 : i32, i32
  }
  func.func @transform_17(%arg0: i32) -> (i32, i32) {
    %c0_i32 = arith.constant 0 : i32
    %c0_i32_0 = arith.constant 0 : i32
    %c0_i32_1 = arith.constant 0 : i32
    return %c0_i32, %c0_i32_0 : i32, i32
  }
  func.func @transform_18(%arg0: i32) -> (i32, i32, i32) {
    %c0_i32 = arith.constant 0 : i32
    %c0_i32_0 = arith.constant 0 : i32
    %c0_i32_1 = arith.constant 0 : i32
    return %arg0, %c0_i32, %c0_i32_0 : i32, i32, i32
  }
}

</mosaic_0001>

<bundles_post_ra>
// kernel: graph_transformer_encoder_layer.4
= control target key start
LH: loop header
LB: loop body
LE: loop exit
PB: predicated region body
PF: predicated region fallthrough
CT: control target
= control target key end

     0   :  { %16 = vsyncpa [#allocation3], 0  ;;  %s548_s0 = inlined_call_operand.vmem [shape: f32[16,32], index: 0, kind: input, shape index: {}]   ;;  %s549_s1 = inlined_call_operand.vmem [shape: f32[32,32], index: 1, kind: input, shape index: {}]   ;;  %s550_s2 = inlined_call_operand.vmem [shape: f32[1,32], index: 2, kind: input, shape index: {}]   ;;  %s551_s3 = inlined_call_operand.vmem [shape: f32[32,32], index: 3, kind: input, shape index: {}]   ;;  %s552_s4 = inlined_call_operand.hbm [shape: f32[1,32], index: 4, kind: input, shape index: {}]   ;;  %s553_s5 = inlined_call_operand.vmem [shape: f32[32,32], index: 5, kind: input, shape index: {}]   ;;  %s554_s6 = inlined_call_operand.hbm [shape: f32[1,32], index: 6, kind: input, shape index: {}]   ;;  %s555_s7 = inlined_call_operand.vmem [shape: f32[16,32], index: 7, kind: output, shape index: {0}]   ;;  %s556_s8 = inlined_call_operand.vmem [shape: f32[16,32], index: 8, kind: output, shape index: {1}]   ;;  %s557_s9 = inlined_call_operand.vmem [shape: f32[16,32], index: 9, kind: output, shape index: {2}]   ;;  %s558_s10 = inlined_call_operand.vmem [shape: f32[16,32], index: 10, kind: output, shape index: {3}]  }
   0x1   :  { %17 = vsyncpa [#allocation5], 0  ;;  %s398_s13 = smov [#allocation2]   ;;  %s399_s15 = smov [#allocation4]  }
   0x2   :  { %s32_s14 = sshll.u32 %s398_s13, 4  ;;  %s44_s16 = sshll.u32 %s399_s15, 4  ;;  %s33_s14 = int_to_ptr.vmem [resolvable:$true] %s32_s14  ;;  %s45_s16 = int_to_ptr.vmem [resolvable:$true] %s44_s16 }
   0x3   :  { %s362_s17 = scalar_lea.vmem %s33_s14, 16  ;;  %s366_s18 = scalar_lea.vmem %s33_s14, 32 }
   0x4   :  { %p363_p0 = scmp.ne.s32.totalorder %s33_s14, %s362_s17  ;;  %p367_p1 = scmp.lt.s32.totalorder %s33_s14, %s33_s14 }
   0x5   :  { %p368_p2 = scmp.lt.s32.totalorder %s366_s18, %s362_s17 }
   0x7   :  { %p369_p3 = por %p368_p2, %p367_p1 }
   0x9   :  { %p370_p4 = pnand %p369_p3, %p363_p0 }
   0xb   :  { %373 = shalt.err (!%p370_p4)
}
   0xc   :  { %35 = dma.hbm_to_vmem [thread:$0]  %s552_s4, 16, %s33_s14, [#allocation3]  }
   0xd   :  { %s382_s21 = scalar_lea.vmem %s45_s16, 16  ;;  %s386_s22 = scalar_lea.vmem %s45_s16, 32 }
   0xe   :  { %p383_p5 = scmp.ne.s32.totalorder %s45_s16, %s382_s21  ;;  %p387_p6 = scmp.lt.s32.totalorder %s45_s16, %s45_s16 }
   0xf   :  { %p388_p7 = scmp.lt.s32.totalorder %s386_s22, %s382_s21 }
  0x11   :  { %p389_p8 = por %p388_p7, %p387_p6 }
  0x13   :  { %p390_p9 = pnand %p389_p8, %p383_p5 }
  0x15   :  { %393 = shalt.err (!%p390_p9)
}
  0x16   :  { %47 = dma.hbm_to_vmem [thread:$0]  %s554_s6, 16, %s45_s16, [#allocation5]  }
  0x17   :  { %394 = dma.done.wait [#allocation3], 16  }
  0x18   :  { %395 = vsyncadd [#allocation3], 4294967280 }
  0x19   :  { %396 = dma.done.wait [#allocation5], 16  }
  0x1a   :  { %397 = vsyncadd [#allocation5], 4294967280  ;;  %v400_v0 = vmov 0.0   ;;  %vm401_vm0 = vmmov 0   ;;  %v59_v1 = vld [vmem:[%s549_s1 + $0x10] sm:$0xff]  ;;  %v60_v2 = vld [vmem:[%s549_s1 + $0x18] sm:$0xff] }
  0x1b   :  { %318 = vmatprep.subr.bf16.mxu0 %v400_v0  ;;  %326 = vmatprep.subr.bf16.mxu1 %v400_v0  ;;  %v118_v3 = vld [vmem:[%s551_s3 + $0x10] sm:$0xff]  ;;  %v63_v4 = vpack.c.bf16 %v60_v2, %v59_v1  ;;  %v119_v5 = vld [vmem:[%s551_s3 + $0x18] sm:$0xff]  ;;  %v57_v6 = vld [vmem:[%s549_s1] sm:$0xff]  ;;  %vm71_vm1 = vcmask 261120  }
  0x1c   :  { %322 = vmatprep.mubr.msk.bf16.mxu0 %vm401_vm0, %v400_v0  ;;  %330 = vmatprep.mubr.msk.bf16.mxu1 %vm401_vm0, %v400_v0  ;;  %v58_v7 = vld [vmem:[%s549_s1 + $0x8] sm:$0xff]  ;;  %v121_v8 = vpack.c.bf16 %v119_v5, %v118_v3  ;;  %v116_v9 = vld [vmem:[%s551_s3] sm:$0xff]  ;;  %v176_v16 = vld [vmem:[%s553_s5 + $0x10] sm:$0xff] }
  0x1d   :  { %v117_v10 = vld [vmem:[%s551_s3 + $0x8] sm:$0xff]  ;;  %319 = vmatpush3.bf16.msra.mxu0 %v63_v4  ;;  %v62_v11 = vpack.c.bf16 %v58_v7, %v57_v6  ;;  %v55_v12 = vld [vmem:[%s548_s0] sm:$0xff]  ;;  %v177_v17 = vld [vmem:[%s553_s5 + $0x18] sm:$0xff] }
  0x1e   :  { %v56_v13 = vld [vmem:[%s548_s0 + $0x8] sm:$0xff]  ;;  %327 = vmatpush3.bf16.msra.mxu1 %v121_v8  ;;  %320 = vmatprep.subr.bf16.mxu0 %v400_v0  ;;  %v120_v14 = vpack.c.bf16 %v117_v10, %v116_v9  ;;  %v181_v18 = vpack.c.bf16 %v177_v17, %v176_v16  ;;  %v174_v19 = vld [vmem:[%s553_s5] sm:$0xff] }
  0x1f   :  { %328 = vmatprep.subr.bf16.mxu1 %v400_v0  ;;  %v61_v15 = vpack.c.bf16 %v56_v13, %v55_v12  ;;  %v175_v20 = vld [vmem:[%s553_s5 + $0x8] sm:$0xff]  ;;  %v299_v22 = vld [vmem:[%s550_s2] ss:$0 sm:$0xff]  ;;  %v303_v38 = vld [vmem:[#allocation4] ss:$0 sm:$0xff] }
  0x20   :  { %v180_v21 = vpack.c.bf16 %v175_v20, %v174_v19  ;;  %v301_v23 = vld [vmem:[#allocation2] ss:$0 sm:$0xff] }
  0x21   :  { %321 = vmatpush3.bf16.msra.mxu0 %v62_v11 }
  0x22   :  { %329 = vmatpush3.bf16.msra.mxu1 %v120_v14  ;;  %334 = vmatprep.subr.bf16.mxu0 %v400_v0 }
  0x23   :  { %342 = vmatprep.subr.bf16.mxu1 %v400_v0 }
  0x24   :  { %323 = vmatmul.mubr.msk.bf16.vlgmr.msra.gmra.mxu0 %vm71_vm1, %v61_v15 }
  0x25   :  { %331 = vmatmul.mubr.msk.bf16.vlgmr.msra.gmra.mxu1 %vm71_vm1, %v61_v15  ;;  %338 = vmatprep.mubr.msk.bf16.mxu0 %vm401_vm0, %v400_v0 }
  0x26   :  { %346 = vmatprep.mubr.msk.bf16.mxu1 %vm401_vm0, %v400_v0  ;;  %335 = vmatpush3.bf16.msra.mxu0 %v181_v18 }
  0x27   :  { %343 = vmatpush3.bf16.msra.mxu1 %v181_v18  ;;  %336 = vmatprep.subr.bf16.mxu0 %v400_v0 }
  0x28   :  { %344 = vmatprep.subr.bf16.mxu1 %v400_v0 }
  0x2a   :  { %337 = vmatpush3.bf16.msra.mxu0 %v180_v21 }
  0x2b   :  { %345 = vmatpush3.bf16.msra.mxu1 %v180_v21 }
  0xe4   :  { %v109_v24 = vpop.f32.mrf.mxu0 }
  0xe5   :  { %v110_v25 = vadd.f32 %v299_v22, %v109_v24  ;;  %v163_v26 = vpop.f32.mrf.mxu1 }
  0xe6   :  { %v164_v27 = vadd.f32 %v301_v23, %v163_v26  ;;  %v324_v28 = vpop.f32.mrf.mxu0 }
  0xe7   :  { %170 = vst.msk [vmem:[%s555_s7] sm:$0xff] %vm71_vm1, %v110_v25  ;;  %v332_v29 = vpop.f32.mrf.mxu1 }
  0xe8   :  { %172 = vst.msk [vmem:[%s556_s8] sm:$0xff] %vm71_vm1, %v164_v27  ;;  %v112_v30 = vpop.f32.mrf.mxu0 }
  0xe9   :  { %v113_v31 = vadd.f32 %v299_v22, %v112_v30  ;;  %v166_v32 = vpop.f32.mrf.mxu1 }
  0xea   :  { %v167_v33 = vadd.f32 %v301_v23, %v166_v32  ;;  %v325_v34 = vpop.f32.mrf.mxu0 }
  0xeb   :  { %171 = vst.msk [vmem:[%s555_s7 + $0x8] sm:$0xff] %vm71_vm1, %v113_v31  ;;  %v179_v35 = vpack.c.bf16 %v113_v31, %v110_v25  ;;  %v333_v36 = vpop.f32.mrf.mxu1 }
  0xec   :  { %173 = vst.msk [vmem:[%s556_s8 + $0x8] sm:$0xff] %vm71_vm1, %v167_v33  ;;  %v234_v37 = vpack.c.bf16 %v167_v33, %v164_v27 }
  0xed   :  { %339 = vmatmul.mubr.msk.bf16.vlgmr.msra.gmra.mxu0 %vm71_vm1, %v179_v35 }
  0xee   :  { %347 = vmatmul.mubr.msk.bf16.vlgmr.msra.gmra.mxu1 %vm71_vm1, %v234_v37 }
 0x1ad   :  { %v225_v39 = vpop.f32.mrf.mxu0 }
 0x1ae   :  { %v226_v40 = vadd.f32 %v303_v38, %v225_v39  ;;  %v272_v41 = vpop.f32.mrf.mxu1 }
 0x1af   :  { %v273_v42 = vadd.f32 %v303_v38, %v272_v41  ;;  %v340_v43 = vpop.f32.mrf.mxu0 }
 0x1b0   :  { %232 = vst.msk [vmem:[%s557_s9] sm:$0xff] %vm71_vm1, %v226_v40  ;;  %v348_v44 = vpop.f32.mrf.mxu1 }
 0x1b1   :  { %279 = vst.msk [vmem:[%s558_s10] sm:$0xff] %vm71_vm1, %v273_v42  ;;  %v228_v45 = vpop.f32.mrf.mxu0 }
 0x1b2   :  { %v229_v46 = vadd.f32 %v303_v38, %v228_v45  ;;  %v275_v47 = vpop.f32.mrf.mxu1 }
 0x1b3   :  { %v276_v48 = vadd.f32 %v303_v38, %v275_v47  ;;  %v341_v49 = vpop.f32.mrf.mxu0 }
 0x1b4   :  { %233 = vst.msk [vmem:[%s557_s9 + $0x8] sm:$0xff] %vm71_vm1, %v229_v46  ;;  %v349_v50 = vpop.f32.mrf.mxu1 }
 0x1b5   :  { %280 = vst.msk [vmem:[%s558_s10 + $0x8] sm:$0xff] %vm71_vm1, %v276_v48 }
 0x1b6   :  { %297 = vsyncpa [#allocation3], 1 }
 0x1b7   :  { %298 = vsyncpa [#allocation5], 1 }

// kernel: graph_transformer_encoder_layer.7
= control target key start
LH: loop header
LB: loop body
LE: loop exit
PB: predicated region body
PF: predicated region fallthrough
CT: control target
= control target key end

     0   :  { %v248_v0 = vmov 0.0   ;;  %vm249_vm0 = vmmov 0   ;;  %vm43_vm1 = vcmask 261120   ;;  %vm110_vm2 = vcmask 523264   ;;  %s357_s1 = inlined_call_operand.vmem [shape: f32[32,64], index: 1, kind: input, shape index: {}]   ;;  %s358_s3 = inlined_call_operand.vmem [shape: f32[64,32], index: 3, kind: input, shape index: {}]   ;;  %s359_s0 = inlined_call_operand.vmem [shape: f32[16,32], index: 0, kind: input, shape index: {}]   ;;  %s360_s2 = inlined_call_operand.vmem [shape: f32[1,64], index: 2, kind: input, shape index: {}]   ;;  %s361_s4 = inlined_call_operand.vmem [shape: f32[1,32], index: 4, kind: input, shape index: {}]   ;;  %s362_s5 = inlined_call_operand.vmem [shape: f32[1,32], index: 5, kind: input, shape index: {}]   ;;  %s363_s6 = inlined_call_operand.vmem [shape: f32[1,32], index: 6, kind: input, shape index: {}]   ;;  %s364_s7 = inlined_call_operand.vmem [shape: f32[16,32], index: 7, kind: output, shape index: {}]  }
   0x1   :  { %222 = vmatprep.subr.bf16.mxu0 %v248_v0  ;;  %v31_v1 = vld [vmem:[%s357_s1 + $0x10] sm:$0xff]  ;;  %v32_v2 = vld [vmem:[%s357_s1 + $0x18] sm:$0xff]  ;;  %v29_v3 = vld [vmem:[%s357_s1] sm:$0xff]  ;;  %226 = vmatprep.mubr.msk.bf16.mxu0 %vm249_vm0, %v248_v0 }
   0x2   :  { %v35_v4 = vpack.c.bf16 %v32_v2, %v31_v1  ;;  %v30_v5 = vld [vmem:[%s357_s1 + $0x8] sm:$0xff]  ;;  %230 = vmatprep.subr.bf16.mxu1 %v248_v0  ;;  %238 = vmatprep.mubr.msk.bf16.mxu1 %vm249_vm0, %v248_v0  ;;  %v96_v6 = vld [vmem:[%s358_s3 + $0x30] sm:$0xff]  ;;  %v97_v7 = vld [vmem:[%s358_s3 + $0x38] sm:$0xff] }
   0x3   :  { %v34_v8 = vpack.c.bf16 %v30_v5, %v29_v3  ;;  %v27_v9 = vld [vmem:[%s359_s0] sm:$0xff]  ;;  %v28_v10 = vld [vmem:[%s359_s0 + $0x8] sm:$0xff]  ;;  %v102_v11 = vpack.c.bf16 %v97_v7, %v96_v6  ;;  %v92_v16 = vld [vmem:[%s358_s3 + $0x10] sm:$0xff] }
   0x4   :  { %223 = vmatpush3.bf16.msra.mxu0 %v35_v4  ;;  %v33_v12 = vpack.c.bf16 %v28_v10, %v27_v9  ;;  %v94_v13 = vld [vmem:[%s358_s3 + $0x20] sm:$0xff]  ;;  %v95_v14 = vld [vmem:[%s358_s3 + $0x28] sm:$0xff]  ;;  %v93_v17 = vld [vmem:[%s358_s3 + $0x18] sm:$0xff] }
   0x5   :  { %224 = vmatprep.subr.bf16.mxu0 %v248_v0  ;;  %231 = vmatpush3.bf16.msra.mxu1 %v102_v11  ;;  %v101_v15 = vpack.c.bf16 %v95_v14, %v94_v13  ;;  %v100_v18 = vpack.c.bf16 %v93_v17, %v92_v16  ;;  %v90_v19 = vld [vmem:[%s358_s3] sm:$0xff]  ;;  %v91_v20 = vld [vmem:[%s358_s3 + $0x8] sm:$0xff] }
   0x6   :  { %232 = vmatprep.subr.bf16.mxu1 %v248_v0  ;;  %v99_v21 = vpack.c.bf16 %v91_v20, %v90_v19  ;;  %v208_v22 = vld [vmem:[%s360_s2] ss:$0 sm:$0xff] }
   0x7   :  { %v210_v32 = vld [vmem:[%s361_s4] ss:$0 sm:$0xff] }
   0x8   :  { %225 = vmatpush3.bf16.msra.mxu0 %v34_v8  ;;  %v212_v60 = vld [vmem:[%s362_s5] ss:$0 sm:$0xff] }
   0x9   :  { %233 = vmatpush3.bf16.msra.mxu1 %v101_v15  ;;  %v213_v62 = vld [vmem:[%s363_s6] ss:$0 sm:$0xff] }
   0xa   :  { %234 = vmatprep.subr.bf16.mxu1 %v248_v0 }
   0xb   :  { %227 = vmatmul.mubr.msk.bf16.vlgmr.msra.gmra.mxu0 %vm43_vm1, %v33_v12 }
   0xd   :  { %235 = vmatpush3.bf16.msra.mxu1 %v100_v18 }
   0xe   :  { %236 = vmatprep.subr.bf16.mxu1 %v248_v0 }
  0x11   :  { %237 = vmatpush3.bf16.msra.mxu1 %v99_v21 }
  0xcb   :  { %v81_v23 = vpop.f32.mrf.mxu0 }
  0xcc   :  { %v82_v25 = vadd.f32 %v208_v22, %v81_v23 }
  0xcd   :  { %v228_v24 = vpop.f32.mrf.mxu0 }
  0xce   :  { %v88_v29 = vmax.f32 %v82_v25, 0.0 }
  0xcf   :  { %v84_v26 = vpop.f32.mrf.mxu0 }
  0xd0   :  { %v85_v27 = vadd.f32 %v208_v22, %v84_v26 }
  0xd1   :  { %v229_v28 = vpop.f32.mrf.mxu0 }
  0xd2   :  { %v89_v30 = vmax.f32 %v85_v27, 0.0 }
  0xd4   :  { %v98_v31 = vpack.c.bf16 %v89_v30, %v88_v29 }
  0xd6   :  { %239 = vmatmul.mubr.msk.bf16.vlgmr.msra.gmra.mxu1 %vm110_vm2, %v98_v31 }
 0x196   :  { %v148_v33 = vpop.f32.mrf.mxu1 }
 0x197   :  { %v149_v34 = vadd.f32 %v210_v32, %v148_v33 }
 0x198   :  { %v240_v35 = vpop.f32.mrf.mxu1 }
 0x199   :  { %v155_v36 = vadd.f32 %v149_v34, %v27_v9 }
 0x19a   :  { %v151_v37 = vpop.f32.mrf.mxu1 }
 0x19b   :  { %v152_v38 = vadd.f32 %v210_v32, %v151_v37  ;;  %v159_v39 = vsel %vm43_vm1, %v155_v36, 0.0 }
 0x19c   :  { %160 = vadd.xlane.f32.xlu0 %v159_v39  ;;  %v241_v40 = vpop.f32.mrf.mxu1 }
 0x19d   :  { %v156_v41 = vadd.f32 %v152_v38, %v28_v10 }
 0x19f   :  { %v162_v42 = vsel %vm43_vm1, %v156_v41, 0.0 }
 0x1a0   :  { %163 = vadd.xlane.f32.xlu0 %v162_v42 }
 0x225   :  { %v161_v43 = vpop.xlane.xlu0 %160 }
 0x226   :  { %v166_v44 = vmul.f32 0.03125, %v161_v43 }
 0x228   :  { %v168_v45 = vsub.f32 %v155_v36, %v166_v44 }
 0x229   :  { %v164_v46 = vpop.xlane.xlu0 %163 }
 0x22a   :  { %v167_v47 = vmul.f32 0.03125, %v164_v46  ;;  %v170_v48 = vmul.f32 %v168_v45, %v168_v45 }
 0x22c   :  { %v169_v49 = vsub.f32 %v156_v41, %v167_v47  ;;  %v172_v50 = vsel %vm43_vm1, %v170_v48, 0.0 }
 0x22d   :  { %173 = vadd.xlane.f32.xlu1 %v172_v50 }
 0x22e   :  { %v171_v51 = vmul.f32 %v169_v49, %v169_v49 }
 0x230   :  { %v175_v52 = vsel %vm43_vm1, %v171_v51, 0.0 }
 0x231   :  { %176 = vadd.xlane.f32.xlu1 %v175_v52 }
 0x2b6   :  { %v174_v53 = vpop.xlane.xlu1 %173 }
 0x2b7   :  { %v178_v54 = vmul.f32 0.03125, %v174_v53 }
 0x2b9   :  { %v180_v55 = vadd.f32 1e-05, %v178_v54 }
 0x2ba   :  { %v177_v56 = vpop.xlane.xlu1 %176 }
 0x2bb   :  { %244 = vrsqrt.f32 %v180_v55  ;;  %v179_v57 = vmul.f32 0.03125, %v177_v56 }
 0x2bd   :  { %v181_v58 = vadd.f32 1e-05, %v179_v57 }
 0x2bf   :  { %246 = vrsqrt.f32 %v181_v58 }
 0x2c8   :  { %v245_v59 = vpop.eup %244 }
 0x2c9   :  { %v184_v61 = vmul.f32 %v245_v59, %v168_v45 }
 0x2cb   :  { %v192_v63 = vmul.f32 %v212_v60, %v184_v61 }
 0x2cc   :  { %v247_v0 = vpop.eup %246 }
 0x2cd   :  { %v200_v1 = vadd.f32 %v213_v62, %v192_v63  ;;  %v185_v2 = vmul.f32 %v247_v0, %v169_v49 }
 0x2cf   :  { %202 = vst.msk [vmem:[%s364_s7] sm:$0xff] %vm43_vm1, %v200_v1  ;;  %v193_v3 = vmul.f32 %v212_v60, %v185_v2 }
 0x2d1   :  { %v201_v4 = vadd.f32 %v213_v62, %v193_v3 }
 0x2d3   :  { %203 = vst.msk [vmem:[%s364_s7 + $0x8] sm:$0xff] %vm43_vm1, %v201_v4 }

// kernel: graph_transformer_encoder_layer.5
= control target key start
LH: loop header
LB: loop body
LE: loop exit
PB: predicated region body
PF: predicated region fallthrough
CT: control target
= control target key end

     0   :  { %v734_v0 = vmov 0.0   ;;  %vm735_vm0 = vmmov 0   ;;  %vm64_vm1 = vcmask 261120   ;;  %s1019_s3 = inlined_call_operand.vmem [shape: f32[3,32,32], index: 3, kind: input, shape index: {}]   ;;  %s1020_s1 = inlined_call_operand.vmem [shape: f32[16,32], index: 1, kind: input, shape index: {}]   ;;  %s1021_s0 = inlined_call_operand.vmem [shape: f32[16,32], index: 0, kind: input, shape index: {}]   ;;  %s1022_s5 = inlined_call_operand.vmem [shape: f32[3,32,32], index: 5, kind: input, shape index: {}]   ;;  %s1023_s2 = inlined_call_operand.vmem [shape: f32[16,32], index: 2, kind: input, shape index: {}]   ;;  %s1024_s7 = inlined_call_operand.vmem [shape: f32[32,32], index: 7, kind: input, shape index: {}]   ;;  %s1025_s9 = inlined_call_operand.vmem [shape: f32[32,32], index: 9, kind: input, shape index: {}]   ;;  %s1026_s4 = inlined_call_operand.vmem [shape: f32[1,32], index: 4, kind: input, shape index: {}]   ;;  %s1027_s6 = inlined_call_operand.vmem [shape: f32[1,32], index: 6, kind: input, shape index: {}]   ;;  %s1028_s8 = inlined_call_operand.vmem [shape: f32[1,32], index: 8, kind: input, shape index: {}]   ;;  %s1029_s10 = inlined_call_operand.vmem [shape: f32[1,32], index: 10, kind: input, shape index: {}]   ;;  %s1030_s11 = inlined_call_operand.vmem [shape: f32[16,32], index: 11, kind: output, shape index: {0}]   ;;  %s1031_s12 = inlined_call_operand.vmem [shape: f32[16,32], index: 12, kind: output, shape index: {1}]   ;;  %s1032_s13 = inlined_call_operand.vmem [shape: f32[16,32], index: 13, kind: output, shape index: {2}]   ;;  %s1033_s14 = inlined_call_operand.vmem [shape: f32[16,32], index: 14, kind: output, shape index: {3}]  }
   0x1   :  { %652 = vmatprep.subr.bf16.mxu0 %v734_v0  ;;  %660 = vmatprep.subr.bf16.mxu1 %v734_v0  ;;  %v594_v1 = vld [vmem:[%s1019_s3 + $0x30] sm:$0xff]  ;;  %v595_v2 = vld [vmem:[%s1019_s3 + $0x38] sm:$0xff]  ;;  %v592_v6 = vld [vmem:[%s1019_s3 + $0x20] sm:$0xff] }
   0x2   :  { %v51_v3 = vld [vmem:[%s1019_s3 + $0x10] sm:$0xff]  ;;  %v63_v4 = vpack.c.bf16 %v595_v2, %v594_v1  ;;  %v52_v5 = vld [vmem:[%s1019_s3 + $0x18] sm:$0xff]  ;;  %v593_v7 = vld [vmem:[%s1019_s3 + $0x28] sm:$0xff]  ;;  %656 = vmatprep.mubr.msk.bf16.mxu0 %vm735_vm0, %v734_v0  ;;  %664 = vmatprep.mubr.msk.bf16.mxu1 %vm735_vm0, %v734_v0 }
   0x3   :  { %v55_v8 = vpack.c.bf16 %v52_v5, %v51_v3  ;;  %v49_v9 = vld [vmem:[%s1019_s3] sm:$0xff]  ;;  %v50_v10 = vld [vmem:[%s1019_s3 + $0x8] sm:$0xff]  ;;  %v62_v11 = vpack.c.bf16 %v593_v7, %v592_v6  ;;  %v600_v17 = vld [vmem:[%s1019_s3 + $0x50] sm:$0xff] }
   0x4   :  { %653 = vmatpush3.bf16.msra.mxu0 %v63_v4  ;;  %v45_v12 = vld [vmem:[%s1020_s1] sm:$0xff]  ;;  %v46_v13 = vld [vmem:[%s1020_s1 + $0x8] sm:$0xff]  ;;  %v54_v15 = vpack.c.bf16 %v50_v10, %v49_v9  ;;  %v601_v18 = vld [vmem:[%s1019_s3 + $0x58] sm:$0xff] }
   0x5   :  { %v43_v14 = vld [vmem:[%s1021_s0] sm:$0xff]  ;;  %661 = vmatpush3.bf16.msra.mxu1 %v55_v8  ;;  %654 = vmatprep.subr.bf16.mxu0 %v734_v0  ;;  %v44_v16 = vld [vmem:[%s1021_s0 + $0x8] sm:$0xff]  ;;  %v606_v19 = vld [vmem:[%s1022_s5 + $0x30] sm:$0xff]  ;;  %v61_v21 = vpack.c.bf16 %v46_v13, %v45_v12  ;;  %v160_v23 = vpack.c.bf16 %v601_v18, %v600_v17 }
   0x6   :  { %662 = vmatprep.subr.bf16.mxu1 %v734_v0  ;;  %v607_v20 = vld [vmem:[%s1022_s5 + $0x38] sm:$0xff]  ;;  %v53_v22 = vpack.c.bf16 %v44_v16, %v43_v14  ;;  %v598_v25 = vld [vmem:[%s1019_s3 + $0x40] sm:$0xff]  ;;  %v599_v26 = vld [vmem:[%s1019_s3 + $0x48] sm:$0xff] }
   0x7   :  { %v228_v24 = vpack.c.bf16 %v607_v20, %v606_v19  ;;  %v604_v27 = vld [vmem:[%s1022_s5 + $0x20] sm:$0xff]  ;;  %v605_v28 = vld [vmem:[%s1022_s5 + $0x28] sm:$0xff]  ;;  %v159_v29 = vpack.c.bf16 %v599_v26, %v598_v25  ;;  %v218_v33 = vld [vmem:[%s1022_s5 + $0x10] sm:$0xff] }
   0x8   :  { %655 = vmatpush3.bf16.msra.mxu0 %v62_v11  ;;  %v47_v30 = vld [vmem:[%s1023_s2] sm:$0xff]  ;;  %v48_v31 = vld [vmem:[%s1023_s2 + $0x8] sm:$0xff]  ;;  %v227_v32 = vpack.c.bf16 %v605_v28, %v604_v27  ;;  %v219_v34 = vld [vmem:[%s1022_s5 + $0x18] sm:$0xff] }
   0x9   :  { %663 = vmatpush3.bf16.msra.mxu1 %v54_v15  ;;  %668 = vmatprep.subr.bf16.mxu0 %v734_v0  ;;  %v612_v35 = vld [vmem:[%s1022_s5 + $0x50] sm:$0xff]  ;;  %v613_v36 = vld [vmem:[%s1022_s5 + $0x58] sm:$0xff]  ;;  %v158_v37 = vpack.c.bf16 %v48_v31, %v47_v30  ;;  %v221_v38 = vpack.c.bf16 %v219_v34, %v218_v33  ;;  %v216_v40 = vld [vmem:[%s1022_s5] sm:$0xff] }
   0xa   :  { %676 = vmatprep.subr.bf16.mxu1 %v734_v0  ;;  %v317_v39 = vpack.c.bf16 %v613_v36, %v612_v35  ;;  %v217_v41 = vld [vmem:[%s1022_s5 + $0x8] sm:$0xff]  ;;  %v610_v42 = vld [vmem:[%s1022_s5 + $0x40] sm:$0xff]  ;;  %v372_v46 = vld [vmem:[%s1024_s7 + $0x10] sm:$0xff] }
   0xb   :  { %657 = vmatmul.mubr.msk.bf16.vlgmr.msra.gmra.mxu0 %vm64_vm1, %v61_v21  ;;  %v611_v43 = vld [vmem:[%s1022_s5 + $0x48] sm:$0xff]  ;;  %v220_v44 = vpack.c.bf16 %v217_v41, %v216_v40  ;;  %v373_v47 = vld [vmem:[%s1024_s7 + $0x18] sm:$0xff]  ;;  %v376_v48 = vld [vmem:[%s1025_s9 + $0x10] sm:$0xff] }
   0xc   :  { %665 = vmatmul.mubr.msk.bf16.vlgmr.msra.gmra.mxu1 %vm64_vm1, %v53_v22  ;;  %669 = vmatpush3.bf16.msra.mxu0 %v160_v23  ;;  %v316_v45 = vpack.c.bf16 %v611_v43, %v610_v42  ;;  %v382_v49 = vpack.c.bf16 %v373_v47, %v372_v46  ;;  %v377_v50 = vld [vmem:[%s1025_s9 + $0x18] sm:$0xff]  ;;  %v370_v52 = vld [vmem:[%s1024_s7] sm:$0xff]  ;;  %v371_v53 = vld [vmem:[%s1024_s7 + $0x8] sm:$0xff] }
   0xd   :  { %677 = vmatpush3.bf16.msra.mxu1 %v228_v24  ;;  %670 = vmatprep.subr.bf16.mxu0 %v734_v0  ;;  %v436_v51 = vpack.c.bf16 %v377_v50, %v376_v48  ;;  %v374_v54 = vld [vmem:[%s1025_s9] sm:$0xff]  ;;  %v381_v55 = vpack.c.bf16 %v371_v53, %v370_v52  ;;  %v375_v56 = vld [vmem:[%s1025_s9 + $0x8] sm:$0xff] }
   0xe   :  { %678 = vmatprep.subr.bf16.mxu1 %v734_v0  ;;  %672 = vmatprep.mubr.msk.bf16.mxu0 %vm735_vm0, %v734_v0  ;;  %v435_v57 = vpack.c.bf16 %v375_v56, %v374_v54  ;;  %v603_v10 = vld [vmem:[%s1026_s4] ss:$0 sm:$0xff] }
   0xf   :  { %680 = vmatprep.mubr.msk.bf16.mxu1 %vm735_vm0, %v734_v0  ;;  %v615_v28 = vld [vmem:[%s1027_s6] ss:$0 sm:$0xff] }
  0x10   :  { %671 = vmatpush3.bf16.msra.mxu0 %v159_v29  ;;  %v616_v35 = vld [vmem:[%s1028_s8] ss:$0 sm:$0xff] }
  0x11   :  { %679 = vmatpush3.bf16.msra.mxu1 %v227_v32  ;;  %684 = vmatprep.subr.bf16.mxu0 %v734_v0  ;;  %v618_v36 = vld [vmem:[%s1029_s10] ss:$0 sm:$0xff] }
  0x12   :  { %692 = vmatprep.subr.bf16.mxu1 %v734_v0 }
  0x13   :  { %673 = vmatmul.mubr.msk.bf16.vlgmr.msra.gmra.mxu0 %vm64_vm1, %v158_v37 }
  0x14   :  { %681 = vmatmul.mubr.msk.bf16.vlgmr.msra.gmra.mxu1 %vm64_vm1, %v61_v21  ;;  %685 = vmatpush3.bf16.msra.mxu0 %v221_v38 }
  0x15   :  { %693 = vmatpush3.bf16.msra.mxu1 %v317_v39  ;;  %686 = vmatprep.subr.bf16.mxu0 %v734_v0 }
  0x16   :  { %694 = vmatprep.subr.bf16.mxu1 %v734_v0  ;;  %688 = vmatprep.mubr.msk.bf16.mxu0 %vm735_vm0, %v734_v0 }
  0x17   :  { %696 = vmatprep.mubr.msk.bf16.mxu1 %vm735_vm0, %v734_v0 }
  0x18   :  { %687 = vmatpush3.bf16.msra.mxu0 %v220_v44 }
  0x19   :  { %695 = vmatpush3.bf16.msra.mxu1 %v316_v45  ;;  %700 = vmatprep.subr.bf16.mxu0 %v734_v0 }
  0x1a   :  { %708 = vmatprep.subr.bf16.mxu1 %v734_v0 }
  0x1b   :  { %689 = vmatmul.mubr.msk.bf16.vlgmr.msra.gmra.mxu0 %vm64_vm1, %v53_v22 }
  0x1c   :  { %697 = vmatmul.mubr.msk.bf16.vlgmr.msra.gmra.mxu1 %vm64_vm1, %v158_v37  ;;  %704 = vmatprep.mubr.msk.bf16.mxu0 %vm735_vm0, %v734_v0 }
  0x1d   :  { %712 = vmatprep.mubr.msk.bf16.mxu1 %vm735_vm0, %v734_v0  ;;  %701 = vmatpush3.bf16.msra.mxu0 %v382_v49 }
  0x1e   :  { %709 = vmatpush3.bf16.msra.mxu1 %v436_v51  ;;  %702 = vmatprep.subr.bf16.mxu0 %v734_v0 }
  0x1f   :  { %710 = vmatprep.subr.bf16.mxu1 %v734_v0 }
  0x21   :  { %703 = vmatpush3.bf16.msra.mxu0 %v381_v55 }
  0x22   :  { %711 = vmatpush3.bf16.msra.mxu1 %v435_v57  ;;  %716 = vmatprep.subr.bf16.mxu0 %v734_v0 }
  0x23   :  { %724 = vmatprep.subr.bf16.mxu1 %v734_v0 }
  0xcb   :  { %v102_v58 = vpop.f32.mrf.mxu0 }
  0xcc   :  { %v146_v59 = vpop.f32.mrf.mxu1 }
  0xcd   :  { %v658_v60 = vpop.f32.mrf.mxu0  ;;  %v147_v4 = vadd.f32 %v146_v59, %v102_v58 }
  0xce   :  { %v666_v61 = vpop.f32.mrf.mxu1 }
  0xcf   :  { %v105_v62 = vpop.f32.mrf.mxu0 }
  0xd0   :  { %v149_v63 = vpop.f32.mrf.mxu1 }
  0xd1   :  { %v659_v1 = vpop.f32.mrf.mxu0  ;;  %v150_v7 = vadd.f32 %v149_v63, %v105_v62 }
  0xd2   :  { %v667_v2 = vpop.f32.mrf.mxu1 }
  0xd3   :  { %v198_v3 = vpop.f32.mrf.mxu0 }
  0xd4   :  { %v263_v5 = vpop.f32.mrf.mxu1  ;;  %v205_v8 = vadd.f32 %v198_v3, %v147_v4 }
  0xd5   :  { %v674_v6 = vpop.f32.mrf.mxu0 }
  0xd6   :  { %v682_v9 = vpop.f32.mrf.mxu1  ;;  %v214_v15 = vadd.f32 %v603_v10, %v205_v8 }
  0xd7   :  { %v201_v11 = vpop.f32.mrf.mxu0 }
  0xd8   :  { %v206_v12 = vadd.f32 %v201_v11, %v150_v7  ;;  %v266_v13 = vpop.f32.mrf.mxu1 }
  0xd9   :  { %v675_v14 = vpop.f32.mrf.mxu0 }
  0xda   :  { %v215_v16 = vadd.f32 %v603_v10, %v206_v12  ;;  %v683_v17 = vpop.f32.mrf.mxu1 }
  0xdb   :  { %v304_v18 = vpop.f32.mrf.mxu0 }
  0xdc   :  { %v380_v19 = vpack.c.bf16 %v215_v16, %v214_v15  ;;  %v305_v20 = vadd.f32 %v304_v18, %v263_v5  ;;  %v352_v21 = vpop.f32.mrf.mxu1 }
  0xdd   :  { %v690_v22 = vpop.f32.mrf.mxu0 }
  0xde   :  { %v698_v23 = vpop.f32.mrf.mxu1  ;;  %705 = vmatmul.mubr.msk.bf16.vlgmr.msra.gmra.mxu0 %vm64_vm1, %v380_v19  ;;  %713 = vmatmul.mubr.msk.bf16.vlgmr.msra.gmra.mxu1 %vm64_vm1, %v380_v19  ;;  %v359_v25 = vadd.f32 %v352_v21, %v305_v20 }
  0xdf   :  { %v307_v24 = vpop.f32.mrf.mxu0  ;;  %717 = vmatpush3.bf16.msra.mxu0 %v382_v49  ;;  %725 = vmatpush3.bf16.msra.mxu1 %v436_v51 }
  0xe0   :  { %v308_v26 = vadd.f32 %v307_v24, %v266_v13  ;;  %v355_v27 = vpop.f32.mrf.mxu1  ;;  %718 = vmatprep.subr.bf16.mxu0 %v734_v0  ;;  %726 = vmatprep.subr.bf16.mxu1 %v734_v0  ;;  %v368_v32 = vadd.f32 %v615_v28, %v359_v25 }
  0xe1   :  { %v691_v29 = vpop.f32.mrf.mxu0  ;;  %720 = vmatprep.mubr.msk.bf16.mxu0 %vm735_vm0, %v734_v0  ;;  %728 = vmatprep.mubr.msk.bf16.mxu1 %vm735_vm0, %v734_v0 }
  0xe2   :  { %v360_v30 = vadd.f32 %v355_v27, %v308_v26  ;;  %v699_v31 = vpop.f32.mrf.mxu1 }
  0xe3   :  { %719 = vmatpush3.bf16.msra.mxu0 %v381_v55  ;;  %727 = vmatpush3.bf16.msra.mxu1 %v435_v57 }
  0xe4   :  { %v369_v33 = vadd.f32 %v615_v28, %v360_v30 }
  0xe6   :  { %v486_v34 = vpack.c.bf16 %v369_v33, %v368_v32 }
  0xe8   :  { %721 = vmatmul.mubr.msk.bf16.vlgmr.msra.gmra.mxu0 %vm64_vm1, %v486_v34  ;;  %729 = vmatmul.mubr.msk.bf16.vlgmr.msra.gmra.mxu1 %vm64_vm1, %v486_v34 }
 0x19e   :  { %v426_v0 = vpop.f32.mrf.mxu0  ;;  %v477_v37 = vpop.f32.mrf.mxu1 }
 0x19f   :  { %v427_v38 = vadd.f32 %v616_v35, %v426_v0  ;;  %v478_v39 = vadd.f32 %v618_v36, %v477_v37 }
 0x1a0   :  { %v706_v40 = vpop.f32.mrf.mxu0  ;;  %v714_v41 = vpop.f32.mrf.mxu1 }
 0x1a1   :  { %433 = vst.msk [vmem:[%s1030_s11] sm:$0xff] %vm64_vm1, %v427_v38  ;;  %484 = vst.msk [vmem:[%s1031_s12] sm:$0xff] %vm64_vm1, %v478_v39 }
 0x1a2   :  { %v429_v42 = vpop.f32.mrf.mxu0  ;;  %v480_v43 = vpop.f32.mrf.mxu1 }
 0x1a3   :  { %v430_v44 = vadd.f32 %v616_v35, %v429_v42  ;;  %v481_v45 = vadd.f32 %v618_v36, %v480_v43 }
 0x1a4   :  { %v707_v46 = vpop.f32.mrf.mxu0  ;;  %v715_v47 = vpop.f32.mrf.mxu1 }
 0x1a5   :  { %434 = vst.msk [vmem:[%s1030_s11 + $0x8] sm:$0xff] %vm64_vm1, %v430_v44  ;;  %485 = vst.msk [vmem:[%s1031_s12 + $0x8] sm:$0xff] %vm64_vm1, %v481_v45 }
 0x1a8   :  { %v524_v48 = vpop.f32.mrf.mxu0  ;;  %v567_v49 = vpop.f32.mrf.mxu1 }
 0x1a9   :  { %v525_v50 = vadd.f32 %v616_v35, %v524_v48  ;;  %v568_v51 = vadd.f32 %v618_v36, %v567_v49 }
 0x1aa   :  { %v722_v52 = vpop.f32.mrf.mxu0  ;;  %v730_v53 = vpop.f32.mrf.mxu1 }
 0x1ab   :  { %531 = vst.msk [vmem:[%s1032_s13] sm:$0xff] %vm64_vm1, %v525_v50  ;;  %574 = vst.msk [vmem:[%s1033_s14] sm:$0xff] %vm64_vm1, %v568_v51 }
 0x1ac   :  { %v527_v54 = vpop.f32.mrf.mxu0  ;;  %v570_v55 = vpop.f32.mrf.mxu1 }
 0x1ad   :  { %v528_v56 = vadd.f32 %v616_v35, %v527_v54  ;;  %v571_v57 = vadd.f32 %v618_v36, %v570_v55 }
 0x1ae   :  { %v723_v58 = vpop.f32.mrf.mxu0  ;;  %v731_v59 = vpop.f32.mrf.mxu1 }
 0x1af   :  { %532 = vst.msk [vmem:[%s1032_s13 + $0x8] sm:$0xff] %vm64_vm1, %v528_v56  ;;  %575 = vst.msk [vmem:[%s1033_s14 + $0x8] sm:$0xff] %vm64_vm1, %v571_v57 }

// kernel: graph_transformer_encoder_layer.6
= control target key start
LH: loop header
LB: loop body
LE: loop exit
PB: predicated region body
PF: predicated region fallthrough
CT: control target
= control target key end

     0   :  { %s2421_s29 = smov 0   ;;  %s2688_s0 = inlined_call_operand.vmem [shape: f32[2,8,32], index: 0, kind: input, shape index: {}]   ;;  %s2689_s1 = inlined_call_operand.vmem [shape: f32[2,8,32], index: 1, kind: input, shape index: {}]   ;;  %s2690_s2 = inlined_call_operand.vmem [shape: f32[2,8,32], index: 2, kind: input, shape index: {}]   ;;  %s2691_s3 = inlined_call_operand.vmem [shape: f32[2,8,32], index: 3, kind: input, shape index: {}]   ;;  %s2692_s4 = inlined_call_operand.vmem [shape: f32[2,8,32], index: 4, kind: input, shape index: {}]   ;;  %s2693_s5 = inlined_call_operand.vmem [shape: f32[2,8,32], index: 5, kind: input, shape index: {}]   ;;  %s2694_s6 = inlined_call_operand.vmem [shape: f32[2,1,8], index: 6, kind: input, shape index: {}]   ;;  %s2695_s7 = inlined_call_operand.vmem [shape: f32[2,8,8], index: 7, kind: input, shape index: {}]   ;;  %s2696_s8 = inlined_call_operand.vmem [shape: f32[2,8,8], index: 8, kind: input, shape index: {}]   ;;  %s2697_s9 = inlined_call_operand.vmem [shape: f32[2,8,1], index: 9, kind: input, shape index: {}]   ;;  %s2698_s10 = inlined_call_operand.vmem [shape: f32[2,8,32], index: 10, kind: input, shape index: {}]   ;;  %s2699_s11 = inlined_call_operand.vmem [shape: f32[32,32], index: 11, kind: input, shape index: {}]   ;;  %s2700_s12 = inlined_call_operand.vmem [shape: f32[1,32], index: 12, kind: input, shape index: {}]   ;;  %s2701_s13 = inlined_call_operand.vmem [shape: f32[1,32], index: 13, kind: input, shape index: {}]   ;;  %s2702_s14 = inlined_call_operand.vmem [shape: f32[1,32], index: 14, kind: input, shape index: {}]   ;;  %s2703_s15 = inlined_call_operand.<no memory space> [shape: f32[1,1], index: 15, kind: input, shape index: {}]   ;;  %s2704_s16 = inlined_call_operand.vmem [shape: f32[1,32], index: 16, kind: input, shape index: {}]   ;;  %s2705_s17 = inlined_call_operand.vmem [shape: f32[1,32], index: 17, kind: input, shape index: {}]   ;;  %s2706_s18 = inlined_call_operand.vmem [shape: f32[2,8,32], index: 18, kind: output, shape index: {}]  }
   0x1   :  { %2707 = sst [smem:[#allocation3_spill]] %s2688_s0  ;;  %v23_v0 = vstv %s2703_s15 }
   0x2   :  { %2708 = sst [smem:[#allocation4_spill]] %s2689_s1  ;;  %24 = vst [vmem:[#allocation2] sm:$0x1] %v23_v0 }
   0x3   :  { %2709 = sst [smem:[#allocation5_spill]] %s2690_s2 }
   0x4 LB: > { %s2056_s30 = sadd.s32 4294967295, %s2312_s29   ;;  %p2060_p0 = scmp.ge.s32.totalorder %s2312_s29, 1  ;;  %s2312_s29 = sphi %s2421_s29, %s30_s29  }
   0x5   : > { %p602_p1 = scmp.lt.s32.totalorder %s2312_s29, 3 }
   0x7   : > { %p603_p2 = pnand %p2060_p0, %p602_p1 }
   0x8   : > { %p693_p3 = scmp.lt.s32.totalorder (!%p603_p2), %s2056_s30, 1  ;;  %s2710_s1 = sld [smem:[#allocation5_spill]] (!%p603_p2) }
   0x9   : > { %606 = sbr.rel (%p603_p2) target bundleno = 2279 (0x8e7), region = 92  ;;  %s2711_s2 = sld [smem:[#allocation3_spill]] (!%p603_p2) }
   0xa   : > { %s2317_s19 = smov (!%p603_p2), 112   ;;  %s2318_s22 = smov (!%p603_p2), 104  }
   0xb   : > { %s2712_s24 = sld [smem:[#allocation4_spill]] (!%p603_p2) }
   0xe   : > { %v2314_v1 = vmov 0.0   ;;  %vm2315_vm0 = vmmov 0   ;;  %s2714_s30 = smov (!%p693_p3, %s2056_s30), 1  ;;  %vm758_vm1 = vcmask 64512   ;;  %vm823_vm3 = vcmask 1043456  }
   0xf   : > { %2137 = vmatprep.subr.bf16.mxu0 %v2314_v1  ;;  %2139 = vmatprep.mubr.msk.bf16.mxu0 %vm2315_vm0, %v2314_v1  ;;  %s2435_s15 = sshll.u32 %s2714_s30, 3  ;;  %s719_s26 = scalar_lea.vmem %s2694_s6, %s2714_s30  ;;  %vm1219_vm5 = vcmask 130048   ;;  %vm1221_vm6 = vcmask 195584   ;;  %vm1714_vm7 = vcmask 261120  }
  0x10   : > { %2143 = vmatprep.subr.bf16.mxu1 %v2314_v1  ;;  %2145 = vmatprep.mubr.msk.bf16.mxu1 %vm2315_vm0, %v2314_v1  ;;  %s704_s20 = scalar_lea.vmem %s2710_s1, %s2435_s15  ;;  %s696_s23 = scalar_lea.vmem %s2711_s2, %s2435_s15  ;;  %v2457_v7 = vld [vmem:[%s719_s26] ss:$0 sm:$0xff] }
  0x11   : > { %v744_v2 = vld [vmem:[%s704_s20] sm:$0xff]  ;;  %s723_s0 = scalar_lea.vmem %s2695_s7, %s2435_s15  ;;  %s2316_s30 = smov 120  }
  0x12   : > { %v757_v3 = vpack.c.bf16 %v744_v2, %v744_v2  ;;  %v743_v5 = vld [vmem:[%s696_s23] sm:$0xff]  ;;  %s712_s21 = scalar_lea.vmem %s2692_s4, %s2435_s15  ;;  %s700_s25 = scalar_lea.vmem %s2712_s24, %s2435_s15 }
  0x13   : > { %v756_v6 = vpack.c.bf16 %v743_v5, %v743_v5  ;;  %v746_v8 = vld [vmem:[%s723_s0] sm:$0xff]  ;;  %s708_s28 = scalar_lea.vmem %s2691_s3, %s2435_s15  ;;  %s727_s20 = scalar_lea.vmem %s2696_s8, %s2435_s15 }
  0x14   : > { %v763_v4 = vsel %vm758_vm1, %v757_v3, 0  ;;  %v753_v9 = vadd.f32 %v2457_v7, %v746_v8  ;;  %871 = vrot.lane.b32.xlu1 %v757_v3, %s2316_s30  ;;  %v1230_v18 = vld [vmem:[%s712_s21] sm:$0xff]  ;;  %s716_s23 = scalar_lea.vmem %s2693_s5, %s2435_s15  ;;  %s2321_s2 = smov 16  }
  0x15   : > { %2138 = vmatpush3.bf16.xpose.msra.mxu0 %v763_v4  ;;  %v1237_v19 = vpack.c.bf16 %v1230_v18, %v1230_v18  ;;  %v1229_v20 = vld [vmem:[%s700_s25] sm:$0xff]  ;;  %s731_s25 = scalar_lea.vmem %s2697_s9, %s2435_s15  ;;  %s735_s0 = scalar_lea.vmem %s2698_s10, %s2435_s15 }
  0x16   : > { %2155 = vmatprep.subr.bf16.mxu0 %v2314_v1  ;;  %vm754_vm2 = vcmp.gt.f32.partialorder %v753_v9, 0.5  ;;  %v1236_v21 = vpack.c.bf16 %v1229_v20, %v1229_v20  ;;  %v745_v27 = vld [vmem:[%s708_s28] sm:$0xff]  ;;  %s2320_s28 = smov 8   ;;  %s739_s24 = scalar_lea.vmem %s2706_s18, %s2435_s15 }
  0x17   : > { %v2461_v11 = vsel %vm754_vm2, -1e+09, %v2314_v1  ;;  %v2487_v28 = vpack.c.bf16 %v745_v27, %v745_v27  ;;  %v1242_v43 = vsel %vm758_vm1, %v1237_v19, 0  ;;  %v1232_v9 = vld [vmem:[%s727_s20] sm:$0xff] }
  0x18   : > { %868 = vrot.lane.b32.xlu1 %v756_v6, %s2316_s30 }
  0x19   : > { %v825_v29 = vsel %vm823_vm3, %v2487_v28, 0 }
  0x1a   : > { %2144 = vmatpush3.bf16.msra.mxu1 %v825_v29 }
  0x1b   : > { %2149 = vmatprep.subr.bf16.mxu1 %v2314_v1 }
  0x1c   : > { %2140 = vmatmul.mubr.msk.bf16.vlgmr.msra.gmra.mxu0 %vm758_vm1, %v756_v6  ;;  %982 = vrot.lane.b32.xlu1 %v756_v6, %s2317_s19 }
  0x1d   : > { %2157 = vmatprep.mubr.msk.bf16.mxu0 %vm2315_vm0, %v2314_v1 }
  0x20   : > { %1096 = vrot.lane.b32.xlu1 %v757_v3, %s2318_s22 }
  0x24   : > { %1094 = vrot.lane.b32.xlu1 %v756_v6, %s2318_s22 }
  0x28   : > { %1349 = vrot.lane.b32.xlu1 %v1237_v19, %s2316_s30 }
  0x2c   : > { %1346 = vrot.lane.b32.xlu1 %v1236_v21, %s2316_s30 }
  0x30   : > { %1462 = vrot.lane.b32.xlu1 %v1237_v19, %s2317_s19 }
  0x34   : > { %1574 = vrot.lane.b32.xlu1 %v1237_v19, %s2318_s22 }
  0x86   : > { %v872_v32 = vpop.permute.xlu1 %871 }
  0x87   : > { %v877_v34 = vsel %vm758_vm1, %v872_v32, 0 }
  0x8a   : > { %v869_v36 = vpop.permute.xlu1 %868 }
  0x8e   : > { %v983_v38 = vpop.permute.xlu1 %982 }
  0x92   : > { %v1097_v40 = vpop.permute.xlu1 %1096 }
  0x93   : > { %v1102_v41 = vsel %vm758_vm1, %v1097_v40, 0 }
  0x96   : > { %v1095_v42 = vpop.permute.xlu1 %1094 }
  0x9a   : > { %v1350_v44 = vpop.permute.xlu1 %1349 }
  0x9b   : > { %v1355_v46 = vsel %vm758_vm1, %v1350_v44, 0 }
  0x9e   : > { %v1347_v45 = vpop.permute.xlu1 %1346 }
  0xa2   : > { %v1463_v47 = vpop.permute.xlu1 %1462 }
  0xa3   : > { %v1468_v48 = vsel %vm758_vm1, %v1463_v47, 0 }
  0xa6   : > { %v1575_v49 = vpop.permute.xlu1 %1574 }
  0xa7   : > { %v1580_v51 = vsel %vm758_vm1, %v1575_v49, 0 }
  0xdc   : > { %v799_v10 = vpop.f32.mrf.mxu0 }
  0xdd   : > { %v805_v12 = vmul.f32 0.35355338, %v799_v10 }
  0xde   : > { %v2141_v13 = vpop.f32.mrf.mxu0 }
  0xdf   : > { %v806_v14 = vadd.f32 %v805_v12, %v2461_v11  ;;  %v1233_v13 = vadd.f32 %v2457_v7, %v1232_v9  ;;  %v1231_v9 = vld [vmem:[%s716_s23] sm:$0xff]  ;;  %s2322_s23 = smov 24  }
  0xe0   : > { %v802_v15 = vpop.f32.mrf.mxu0 }
  0xe1   : > { %v807_v16 = vsel %vm758_vm1, %v806_v14, -inf  ;;  %vm1234_vm4 = vcmp.gt.f32.partialorder %v1233_v13, 0.5 }
  0xe2   : > { %808 = vmax.xlane.f32.xlu0 %v807_v16  ;;  %v2142_v17 = vpop.f32.mrf.mxu0  ;;  %v1235_v20 = vsel %vm1234_vm4, -1e+09, %v2314_v1 }
 0x16b   : > { %v809_v22 = vpop.xlane.xlu0 %808 }
 0x16c   : > { %v810_v23 = vsub.f32 %v806_v14, %v809_v22 }
 0x16e   : > { %v811_v24 = vmul.f32 1.442695, %v810_v23 }
 0x170   : > { %2268 = vpow2.f32 %v811_v24 }
 0x17d   : > { %v2269_v25 = vpop.eup %2268 }
 0x17e   : > { %v813_v26 = vsel %vm758_vm1, %v2269_v25, 0.0 }
 0x17f   : > { %814 = vadd.xlane.f32.xlu0 %v813_v26 }
 0x195   : > { %984 = vrot.lane.b32.xlu0 %v757_v3, %s2317_s19 }
 0x199   : > { %1460 = vrot.lane.b32.xlu0 %v1236_v21, %s2317_s19 }
 0x19d   : > { %1572 = vrot.lane.b32.xlu0 %v1236_v21, %s2318_s22 }
 0x208   : > { %v815_v30 = vpop.xlane.xlu0 %814 }
 0x209   : > { %2270 = vrcp.f32 %v815_v30 }
 0x20c   : > { %v985_v37 = vpop.permute.xlu0 %984 }
 0x20d   : > { %v990_v39 = vsel %vm758_vm1, %v985_v37, 0 }
 0x210   : > { %v1461_v50 = vpop.permute.xlu0 %1460 }
 0x214   : > { %v1573_v52 = vpop.permute.xlu0 %1572 }
 0x216   : > { %v2271_v31 = vpop.eup %2270 }
 0x217   : > { %v817_v33 = vmul.f32 %v2271_v31, %v2269_v25 }
 0x219   : > { %v818_v35 = vpack.c.bf16 %v817_v33, %v817_v33 }
 0x21b   : > { %2146 = vmatmul.mubr.msk.bf16.vlgmr.msra.gmra.mxu1 %vm758_vm1, %v818_v35 }
 0x21c   : > { %2150 = vmatpush3.bf16.xpose.msra.mxu1 %v877_v34  ;;  %2151 = vmatprep.mubr.msk.bf16.mxu1 %vm2315_vm0, %v2314_v1 }
 0x21d   : > { %2161 = vmatprep.subr.bf16.mxu1 %v2314_v1 }
 0x223   : > { %2152 = vmatmul.mubr.msk.bf16.vlgmr.msra.gmra.mxu1 %vm758_vm1, %v869_v36 }
 0x224   : > { %2162 = vmatpush3.bf16.xpose.msra.mxu1 %v990_v39  ;;  %2163 = vmatprep.mubr.msk.bf16.mxu1 %vm2315_vm0, %v2314_v1 }
 0x225   : > { %2173 = vmatprep.subr.bf16.mxu1 %v2314_v1 }
 0x22b   : > { %2164 = vmatmul.mubr.msk.bf16.vlgmr.msra.gmra.mxu1 %vm758_vm1, %v983_v38 }
 0x22c   : > { %2174 = vmatpush3.bf16.xpose.msra.mxu1 %v1102_v41  ;;  %2175 = vmatprep.mubr.msk.bf16.mxu1 %vm2315_vm0, %v2314_v1 }
 0x22d   : > { %2185 = vmatprep.subr.bf16.mxu1 %v2314_v1 }
 0x233   : > { %2176 = vmatmul.mubr.msk.bf16.vlgmr.msra.gmra.mxu1 %vm758_vm1, %v1095_v42 }
 0x234   : > { %2186 = vmatpush3.bf16.xpose.msra.mxu1 %v1242_v43  ;;  %2187 = vmatprep.mubr.msk.bf16.mxu1 %vm2315_vm0, %v2314_v1 }
 0x235   : > { %2197 = vmatprep.subr.bf16.mxu1 %v2314_v1 }
 0x23b   : > { %2188 = vmatmul.mubr.msk.bf16.vlgmr.msra.gmra.mxu1 %vm758_vm1, %v1236_v21 }
 0x23c   : > { %2198 = vmatpush3.bf16.xpose.msra.mxu1 %v1355_v46  ;;  %2199 = vmatprep.mubr.msk.bf16.mxu1 %vm2315_vm0, %v2314_v1 }
 0x23d   : > { %2209 = vmatprep.subr.bf16.mxu1 %v2314_v1 }
 0x243   : > { %2200 = vmatmul.mubr.msk.bf16.vlgmr.msra.gmra.mxu1 %vm758_vm1, %v1347_v45 }
 0x244   : > { %2210 = vmatpush3.bf16.xpose.msra.mxu1 %v1468_v48  ;;  %2211 = vmatprep.mubr.msk.bf16.mxu1 %vm2315_vm0, %v2314_v1 }
 0x245   : > { %2221 = vmatprep.subr.bf16.mxu1 %v2314_v1 }
 0x24b   : > { %2212 = vmatmul.mubr.msk.bf16.vlgmr.msra.gmra.mxu1 %vm758_vm1, %v1461_v50 }
 0x24c   : > { %2222 = vmatpush3.bf16.xpose.msra.mxu1 %v1580_v51  ;;  %2223 = vmatprep.mubr.msk.bf16.mxu1 %vm2315_vm0, %v2314_v1 }
 0x24d   : > { %2233 = vmatprep.subr.bf16.mxu1 %v2314_v1 }
 0x253   : > { %2224 = vmatmul.mubr.msk.bf16.vlgmr.msra.gmra.mxu1 %vm758_vm1, %v1573_v52 }
 0x254   : > { %2237 = vmatprep.mubr.msk.bf16.mxu1 %vm2315_vm0, %v2314_v1 }
 0x2db   : > { %v2533_v53 = vpop.f32.mrf.mxu1 }
 0x2dd   : > { %v2147_v54 = vpop.f32.mrf.mxu1 }
 0x2df   : > { %v864_v55 = vpop.f32.mrf.mxu1 }
 0x2e1   : > { %v2148_v56 = vpop.f32.mrf.mxu1 }
 0x2e3   : > { %v913_v57 = vpop.f32.mrf.mxu1 }
 0x2e4   : > { %v919_v58 = vmul.f32 0.35355338, %v913_v57 }
 0x2e5   : > { %v2153_v59 = vpop.f32.mrf.mxu1 }
 0x2e6   : > { %v920_v60 = vadd.f32 %v919_v58, %v2461_v11 }
 0x2e7   : > { %v916_v61 = vpop.f32.mrf.mxu1 }
 0x2e8   : > { %v921_v62 = vsel %vm758_vm1, %v920_v60, -inf }
 0x2e9   : > { %922 = vmax.xlane.f32.xlu1 %v921_v62  ;;  %v2154_v63 = vpop.f32.mrf.mxu1 }
 0x2eb   : > { %v1026_v0 = vpop.f32.mrf.mxu1 }
 0x2ec   : > { %v1032_v2 = vmul.f32 0.35355338, %v1026_v0 }
 0x2ed   : > { %v2165_v3 = vpop.f32.mrf.mxu1 }
 0x2ee   : > { %v1033_v4 = vadd.f32 %v1032_v2, %v2461_v11 }
 0x2ef   : > { %v1029_v5 = vpop.f32.mrf.mxu1 }
 0x2f0   : > { %v1034_v6 = vsel %vm758_vm1, %v1033_v4, -inf }
 0x2f1   : > { %1035 = vmax.xlane.f32.xlu0 %v1034_v6  ;;  %v2166_v8 = vpop.f32.mrf.mxu1 }
 0x2f3   : > { %v1138_v10 = vpop.f32.mrf.mxu1 }
 0x2f4   : > { %v1144_v12 = vmul.f32 0.35355338, %v1138_v10  ;;  %v1298_v10 = vpack.c.bf16 %v1231_v9, %v1231_v9 }
 0x2f5   : > { %v2177_v14 = vpop.f32.mrf.mxu1 }
 0x2f6   : > { %v1145_v15 = vadd.f32 %v1144_v12, %v2461_v11 }
 0x2f7   : > { %v1141_v16 = vpop.f32.mrf.mxu1 }
 0x2f8   : > { %v1146_v17 = vsel %vm758_vm1, %v1145_v15, -inf }
 0x2f9   : > { %1147 = vmax.xlane.f32.xlu0 %v1146_v17  ;;  %v2178_v18 = vpop.f32.mrf.mxu1 }
 0x2fb   : > { %v1278_v19 = vpop.f32.mrf.mxu1 }
 0x2fc   : > { %v1284_v21 = vmul.f32 0.35355338, %v1278_v19 }
 0x2fd   : > { %v2189_v22 = vpop.f32.mrf.mxu1 }
 0x2fe   : > { %v1285_v23 = vadd.f32 %v1284_v21, %v1235_v20 }
 0x2ff   : > { %v1281_v24 = vpop.f32.mrf.mxu1 }
 0x300   : > { %v1286_v25 = vsel %vm758_vm1, %v1285_v23, -inf }
 0x301   : > { %1287 = vmax.xlane.f32.xlu1 %v1286_v25  ;;  %v2190_v7 = vpop.f32.mrf.mxu1  ;;  %v2319_v25 = vmov 0  }
 0x302   : > { %2266 = vset.pattern.permute.xlu1 %v2319_v25  ;;  %v742_v7 = vld [vmem:[%s731_s25] sm:$0xff]  ;;  %2267 = vset.pattern.permute.xlu0 %v2319_v25 }
 0x303   : > { %v1391_v26 = vpop.f32.mrf.mxu1 }
 0x304   : > { %v1397_v27 = vmul.f32 0.35355338, %v1391_v26 }
 0x305   : > { %v2201_v11 = vpop.f32.mrf.mxu1 }
 0x306   : > { %v2548_v29 = vadd.f32 %v1397_v27, %v1235_v20 }
 0x307   : > { %v1394_v30 = vpop.f32.mrf.mxu1 }
 0x308   : > { %v1399_v31 = vsel %vm758_vm1, %v2548_v29, -inf }
 0x309   : > { %1400 = vmax.xlane.f32.xlu0 %v1399_v31  ;;  %v2202_v32 = vpop.f32.mrf.mxu1 }
 0x30b   : > { %v1504_v33 = vpop.f32.mrf.mxu1 }
 0x30c   : > { %v1510_v34 = vmul.f32 0.35355338, %v1504_v33 }
 0x30d   : > { %v2213_v35 = vpop.f32.mrf.mxu1 }
 0x30e   : > { %v1511_v36 = vadd.f32 %v1510_v34, %v1235_v20 }
 0x30f   : > { %v1507_v37 = vpop.f32.mrf.mxu1 }
 0x310   : > { %v1512_v38 = vsel %vm758_vm1, %v1511_v36, -inf }
 0x311   : > { %1513 = vmax.xlane.f32.xlu1 %v1512_v38  ;;  %v2214_v39 = vpop.f32.mrf.mxu1 }
 0x313   : > { %v1616_v40 = vpop.f32.mrf.mxu1 }
 0x314   : > { %v1622_v41 = vmul.f32 0.35355338, %v1616_v40 }
 0x315   : > { %v2225_v42 = vpop.f32.mrf.mxu1 }
 0x316   : > { %v1623_v43 = vadd.f32 %v1622_v41, %v1235_v20 }
 0x317   : > { %v1619_v44 = vpop.f32.mrf.mxu1 }
 0x318   : > { %v1624_v45 = vsel %vm758_vm1, %v1623_v43, -inf }
 0x319   : > { %1625 = vmax.xlane.f32.xlu0 %v1624_v45  ;;  %v2226_v46 = vpop.f32.mrf.mxu1 }
 0x322   : > { %934 = vrot.lane.b32.xlu1 %v2487_v28, %s2316_s30 }
 0x32f   : > { %1046 = vrot.lane.b32.xlu0 %v2487_v28, %s2317_s19 }
 0x372   : > { %v923_v47 = vpop.xlane.xlu1 %922 }
 0x373   : > { %v924_v48 = vsub.f32 %v920_v60, %v923_v47 }
 0x375   : > { %v925_v49 = vmul.f32 1.442695, %v924_v48 }
 0x377   : > { %2272 = vpow2.f32 %v925_v49 }
 0x37a   : > { %v1036_v50 = vpop.xlane.xlu0 %1035 }
 0x37b   : > { %v1037_v51 = vsub.f32 %v1033_v4, %v1036_v50 }
 0x37d   : > { %v1038_v52 = vmul.f32 1.442695, %v1037_v51 }
 0x37f   : > { %2274 = vpow2.f32 %v1038_v52 }
 0x382   : > { %v1148_v54 = vpop.xlane.xlu0 %1147 }
 0x383   : > { %v1149_v55 = vsub.f32 %v1145_v15, %v1148_v54 }
 0x384   : > { %v2273_v56 = vpop.eup %2272 }
 0x385   : > { %v1150_v57 = vmul.f32 1.442695, %v1149_v55  ;;  %v927_v58 = vsel %vm758_vm1, %v2273_v56, 0.0 }
 0x386   : > { %928 = vadd.xlane.f32.xlu1 %v927_v58 }
 0x387   : > { %2276 = vpow2.f32 %v1150_v57 }
 0x38a   : > { %v1288_v59 = vpop.xlane.xlu1 %1287 }
 0x38b   : > { %v1289_v61 = vsub.f32 %v1285_v23, %v1288_v59 }
 0x38c   : > { %v2559_v62 = vpop.eup %2274 }
 0x38d   : > { %v1290_v60 = vmul.f32 1.442695, %v1289_v61  ;;  %v1040_v63 = vsel %vm758_vm1, %v2559_v62, 0.0 }
 0x38e   : > { %1041 = vadd.xlane.f32.xlu0 %v1040_v63 }
 0x38f   : > { %2278 = vpow2.f32 %v1290_v60 }
 0x392   : > { %v1401_v14 = vpop.xlane.xlu0 %1400 }
 0x393   : > { %v1402_v15 = vsub.f32 %v2548_v29, %v1401_v14 }
 0x394   : > { %v2563_v0 = vpop.eup %2276 }
 0x395   : > { %v1152_v2 = vsel %vm758_vm1, %v2563_v0, 0.0  ;;  %v1403_v17 = vmul.f32 1.442695, %v1402_v15 }
 0x396   : > { %1153 = vadd.xlane.f32.xlu1 %v1152_v2 }
 0x39a   : > { %v1514_v3 = vpop.xlane.xlu1 %1513 }
 0x39b   : > { %v1515_v12 = vsub.f32 %v1511_v36, %v1514_v3  ;;  %v1702_v3 = vld [vmem:[%s2699_s11 + $0x10] sm:$0xff] }
 0x39c   : > { %v2567_v4 = vpop.eup %2278 }
 0x39d   : > { %v1292_v5 = vsel %vm758_vm1, %v2567_v4, 0.0  ;;  %v1516_v13 = vmul.f32 1.442695, %v1515_v12  ;;  %v1701_v12 = vld [vmem:[%s2699_s11 + $0x8] sm:$0xff] }
 0x39e   : > { %1293 = vadd.xlane.f32.xlu0 %v1292_v5  ;;  %v935_v6 = vpop.permute.xlu1 %934 }
 0x39f   : > { %v940_v8 = vsel %vm823_vm3, %v935_v6, 0  ;;  %2280 = vpow2.f32 %v1516_v13 }
 0x3a0   : > { %2156 = vmatpush3.bf16.msra.mxu0 %v940_v8  ;;  %2282 = vpow2.f32 %v1403_v17 }
 0x3a1   : > { %2167 = vmatprep.subr.bf16.mxu0 %v2314_v1 }
 0x3a2   : > { %v1626_v16 = vpop.xlane.xlu0 %1625 }
 0x3a3   : > { %v1627_v18 = vsub.f32 %v1623_v43, %v1626_v16  ;;  %v1303_v43 = vsel %vm823_vm3, %v1298_v10, 0 }
 0x3a5   : > { %v1628_v19 = vmul.f32 1.442695, %v1627_v18 }
 0x3a6   : > { %v1047_v27 = vpop.permute.xlu0 %1046 }
 0x3a7   : > { %1412 = vrot.lane.b32.xlu1 %v1298_v10, %s2316_s30  ;;  %2284 = vpow2.f32 %v1628_v19  ;;  %v1052_v33 = vsel %vm823_vm3, %v1047_v27, 0 }
 0x3ac   : > { %v2581_v20 = vpop.eup %2280 }
 0x3ad   : > { %v1518_v21 = vsel %vm758_vm1, %v2581_v20, 0.0  ;;  %v2585_v22 = vpop.eup %2282 }
 0x3b4   : > { %1158 = vrot.lane.b32.xlu0 %v2487_v28, %s2318_s22  ;;  %v1405_v28 = vsel %vm758_vm1, %v2585_v22, 0.0  ;;  %v2589_v23 = vpop.eup %2284 }
 0x3b5   : > { %v1630_v24 = vsel %vm758_vm1, %v2589_v23, 0.0 }
 0x3cb   : > { %1519 = vadd.xlane.f32.xlu1 %v1518_v21 }
 0x3d3   : > { %1406 = vadd.xlane.f32.xlu0 %v1405_v28 }
 0x3d7   : > { %1631 = vadd.xlane.f32.xlu0 %v1630_v24 }
 0x3dc   : > { %1636 = vrot.lane.b32.xlu1 %v1298_v10, %s2318_s22 }
 0x3e0   : > { %1225 = vperm.xlu1 %2266, %v742_v7  }
 0x3ed   : > { %1524 = vrot.lane.b32.xlu0 %v1298_v10, %s2317_s19  ;;  %v1700_v10 = vld [vmem:[%s2699_s11] sm:$0xff] }
 0x3ee   : > { %v1706_v13 = vpack.c.bf16 %v1701_v12, %v1700_v10 }
 0x40f   : > { %v929_v26 = vpop.xlane.xlu1 %928 }
 0x410   : > { %2286 = vrcp.f32 %v929_v26 }
 0x417   : > { %v1042_v11 = vpop.xlane.xlu0 %1041 }
 0x418   : > { %2288 = vrcp.f32 %v1042_v11 }
 0x41d   : > { %v2287_v29 = vpop.eup %2286 }
 0x41e   : > { %v931_v30 = vmul.f32 %v2287_v29, %v2273_v56 }
 0x41f   : > { %v1154_v31 = vpop.xlane.xlu1 %1153 }
 0x420   : > { %2290 = vrcp.f32 %v1154_v31  ;;  %v932_v32 = vpack.c.bf16 %v931_v30, %v931_v30 }
 0x422   : > { %2158 = vmatmul.mubr.msk.bf16.vlgmr.msra.gmra.mxu0 %vm758_vm1, %v932_v32 }
 0x423   : > { %2168 = vmatpush3.bf16.msra.mxu0 %v1052_v33  ;;  %2169 = vmatprep.mubr.msk.bf16.mxu0 %vm2315_vm0, %v2314_v1  ;;  %v1413_v46 = vpop.permute.xlu1 %1412 }
 0x424   : > { %2179 = vmatprep.subr.bf16.mxu0 %v2314_v1  ;;  %v1418_v48 = vsel %vm823_vm3, %v1413_v46, 0 }
 0x425   : > { %v2289_v34 = vpop.eup %2288 }
 0x426   : > { %v1044_v35 = vmul.f32 %v2289_v34, %v2559_v62 }
 0x427   : > { %v1294_v36 = vpop.xlane.xlu0 %1293 }
 0x428   : > { %2292 = vrcp.f32 %v1294_v36  ;;  %v1045_v37 = vpack.c.bf16 %v1044_v35, %v1044_v35 }
 0x42a   : > { %2170 = vmatmul.mubr.msk.bf16.vlgmr.msra.gmra.mxu0 %vm758_vm1, %v1045_v37 }
 0x42b   : > { %v1159_v38 = vpop.permute.xlu0 %1158  ;;  %2181 = vmatprep.mubr.msk.bf16.mxu0 %vm2315_vm0, %v2314_v1 }
 0x42c   : > { %v1164_v39 = vsel %vm823_vm3, %v1159_v38, 0 }
 0x42d   : > { %v2291_v40 = vpop.eup %2290  ;;  %2180 = vmatpush3.bf16.msra.mxu0 %v1164_v39 }
 0x42e   : > { %v1156_v41 = vmul.f32 %v2291_v40, %v2563_v0  ;;  %2191 = vmatprep.subr.bf16.mxu0 %v2314_v1 }
 0x430   : > { %v1157_v42 = vpack.c.bf16 %v1156_v41, %v1156_v41 }
 0x432   : > { %2182 = vmatmul.mubr.msk.bf16.vlgmr.msra.gmra.mxu0 %vm758_vm1, %v1157_v42 }
 0x433   : > { %2192 = vmatpush3.bf16.msra.mxu0 %v1303_v43  ;;  %2193 = vmatprep.mubr.msk.bf16.mxu0 %vm2315_vm0, %v2314_v1 }
 0x434   : > { %2203 = vmatprep.subr.bf16.mxu0 %v2314_v1 }
 0x435   : > { %v2293_v44 = vpop.eup %2292 }
 0x436   : > { %v1296_v45 = vmul.f32 %v2293_v44, %v2567_v4  ;;  %v1703_v4 = vld [vmem:[%s2699_s11 + $0x18] sm:$0xff] }
 0x437   : > { %v1707_v5 = vpack.c.bf16 %v1703_v4, %v1702_v3 }
 0x438   : > { %v1297_v47 = vpack.c.bf16 %v1296_v45, %v1296_v45 }
 0x439   : > { %2234 = vmatpush3.bf16.msra.mxu1 %v1707_v5 }
 0x43a   : > { %2194 = vmatmul.mubr.msk.bf16.vlgmr.msra.gmra.mxu0 %vm758_vm1, %v1297_v47  ;;  %2235 = vmatprep.subr.bf16.mxu1 %v2314_v1 }
 0x43b   : > { %2204 = vmatpush3.bf16.msra.mxu0 %v1418_v48  ;;  %2205 = vmatprep.mubr.msk.bf16.mxu0 %vm2315_vm0, %v2314_v1 }
 0x43c   : > { %2215 = vmatprep.subr.bf16.mxu0 %v2314_v1 }
 0x43d   : > { %2236 = vmatpush3.bf16.msra.mxu1 %v1706_v13 }
 0x454   : > { %v1520_v50 = vpop.xlane.xlu1 %1519 }
 0x458   : > { %v1637_v61 = vpop.permute.xlu1 %1636 }
 0x459   : > { %v1642_v62 = vsel %vm823_vm3, %v1637_v61, 0 }
 0x45c   : > { %v1407_v49 = vpop.xlane.xlu0 %1406  ;;  %v1226_v36 = vpop.permute.xlu1 %1225 }
 0x45d   : > { %2294 = vrcp.f32 %v1407_v49 }
 0x45e   : > { %2296 = vrcp.f32 %v1520_v50 }
 0x460   : > { %v1632_v51 = vpop.xlane.xlu0 %1631 }
 0x461   : > { %2298 = vrcp.f32 %v1632_v51 }
 0x464   : > { %v1525_v54 = vpop.permute.xlu0 %1524 }
 0x465   : > { %v1530_v56 = vsel %vm823_vm3, %v1525_v54, 0 }
 0x46a   : > { %v2295_v52 = vpop.eup %2294 }
 0x46b   : > { %v1409_v55 = vmul.f32 %v2295_v52, %v2585_v22  ;;  %v2297_v58 = vpop.eup %2296 }
 0x46c   : > { %v1522_v59 = vmul.f32 %v2297_v58, %v2581_v20 }
 0x46d   : > { %v1410_v57 = vpack.c.bf16 %v1409_v55, %v1409_v55  ;;  %v2092_v55 = vld [vmem:[%s2701_s13] ss:$0 sm:$0xff] }
 0x46e   : > { %v1523_v60 = vpack.c.bf16 %v1522_v59, %v1522_v59  ;;  %v2299_v63 = vpop.eup %2298 }
 0x46f   : > { %2206 = vmatmul.mubr.msk.bf16.vlgmr.msra.gmra.mxu0 %vm758_vm1, %v1410_v57  ;;  %v1634_v0 = vmul.f32 %v2299_v63, %v2589_v23  ;;  %v2093_v63 = vld [vmem:[%s2702_s14] ss:$0 sm:$0xff] }
 0x470   : > { %2216 = vmatpush3.bf16.msra.mxu0 %v1530_v56  ;;  %2217 = vmatprep.mubr.msk.bf16.mxu0 %vm2315_vm0, %v2314_v1 }
 0x471   : > { %2227 = vmatprep.subr.bf16.mxu0 %v2314_v1  ;;  %v1635_v2 = vpack.c.bf16 %v1634_v0, %v1634_v0 }
 0x477   : > { %2218 = vmatmul.mubr.msk.bf16.vlgmr.msra.gmra.mxu0 %vm758_vm1, %v1523_v60 }
 0x478   : > { %2228 = vmatpush3.bf16.msra.mxu0 %v1642_v62  ;;  %2229 = vmatprep.mubr.msk.bf16.mxu0 %vm2315_vm0, %v2314_v1 }
 0x479   : > { %2241 = vmatprep.subr.bf16.mxu0 %v2314_v1 }
 0x47f   : > { %2230 = vmatmul.mubr.msk.bf16.vlgmr.msra.gmra.mxu0 %vm758_vm1, %v1635_v2 }
 0x480   : > { %2245 = vmatprep.mubr.msk.bf16.mxu0 %vm2315_vm0, %v2314_v1  ;;  %2242 = vmatpush3.bf16.msra.mxu0 %v1707_v5 }
 0x481   : > { %2243 = vmatprep.subr.bf16.mxu0 %v2314_v1 }
 0x484   : > { %2244 = vmatpush3.bf16.msra.mxu0 %v1706_v13 }
 0x4e2   : > { %v976_v6 = vpop.f32.mrf.mxu0 }
 0x4e3   : > { %1207 = vrot.lane.b32.xlu1 %v976_v6, %s2320_s28 }
 0x4e4   : > { %v2159_v8 = vpop.f32.mrf.mxu0 }
 0x4e6   : > { %v979_v9 = vpop.f32.mrf.mxu0 }
 0x4e7   : > { %v2094_v9 = vld [vmem:[#allocation2] ss:$0 sm:$0xff] }
 0x4e8   : > { %v2160_v14 = vpop.f32.mrf.mxu0 }
 0x4ea   : > { %v1088_v15 = vpop.f32.mrf.mxu0 }
 0x4eb   : > { %1211 = vrot.lane.b32.xlu0 %v1088_v15, %s2321_s2 }
 0x4ec   : > { %v2171_v1 = vpop.f32.mrf.mxu0 }
 0x4ee   : > { %v1091_v16 = vpop.f32.mrf.mxu0 }
 0x4f0   : > { %v2172_v17 = vpop.f32.mrf.mxu0 }
 0x4f2   : > { %v1200_v18 = vpop.f32.mrf.mxu0 }
 0x4f3   : > { %1215 = vrot.lane.b32.xlu0 %v1200_v18, %s2322_s23 }
 0x4f4   : > { %v2183_v19 = vpop.f32.mrf.mxu0 }
 0x4f6   : > { %v1203_v20 = vpop.f32.mrf.mxu0 }
 0x4f8   : > { %v2184_v21 = vpop.f32.mrf.mxu0 }
 0x4fa   : > { %v1339_v22 = vpop.f32.mrf.mxu0 }
 0x4fc   : > { %v2195_v28 = vpop.f32.mrf.mxu0 }
 0x4fd   : > { %v1853_v28 = vld [vmem:[%s735_s0] sm:$0xff] }
 0x4fe   : > { %v1342_v23 = vpop.f32.mrf.mxu0 }
 0x500   : > { %v2196_v24 = vpop.f32.mrf.mxu0 }
 0x52f   : > { %v1454_v25 = vpop.f32.mrf.mxu0 }
 0x530   : > { %1685 = vrot.lane.b32.xlu1 %v1454_v25, %s2320_s28 }
 0x531   : > { %v2207_v7 = vpop.f32.mrf.mxu0 }
 0x533   : > { %v1457_v26 = vpop.f32.mrf.mxu0 }
 0x535   : > { %v2208_v27 = vpop.f32.mrf.mxu0 }
 0x537   : > { %v1566_v11 = vpop.f32.mrf.mxu0 }
 0x538   : > { %1689 = vrot.lane.b32.xlu1 %v1566_v11, %s2321_s2 }
 0x539   : > { %v2219_v29 = vpop.f32.mrf.mxu0 }
 0x53b   : > { %v1569_v30 = vpop.f32.mrf.mxu0 }
 0x53d   : > { %v2220_v31 = vpop.f32.mrf.mxu0 }
 0x53f   : > { %v1678_v32 = vpop.f32.mrf.mxu0 }
 0x540   : > { %1693 = vrot.lane.b32.xlu1 %v1678_v32, %s2322_s23 }
 0x541   : > { %v2231_v33 = vpop.f32.mrf.mxu0 }
 0x543   : > { %v1681_v34 = vpop.f32.mrf.mxu0 }
 0x544   : > { %v2095_v34 = vld [vmem:[%s2704_s16] ss:$0 sm:$0xff] }
 0x545   : > { %v2232_v35 = vpop.f32.mrf.mxu0 }
 0x555   : > { %v1208_v37 = vpop.permute.xlu1 %1207 }
 0x556   : > { %v1218_v39 = vsel %vm758_vm1, %v2533_v53, %v1208_v37  ;;  %v2089_v53 = vld [vmem:[%s2700_s12] ss:$0 sm:$0xff] }
 0x55d   : > { %v1212_v38 = vpop.permute.xlu0 %1211 }
 0x55e   : > { %v1220_v40 = vsel %vm1219_vm5, %v1218_v39, %v1212_v38 }
 0x565   : > { %v1216_v41 = vpop.permute.xlu0 %1215 }
 0x566   : > { %v1222_v42 = vsel %vm1221_vm6, %v1220_v40, %v1216_v41 }
 0x567   : > { %v1228_v43 = vmul.f32 %v1226_v36, %v1222_v42 }
 0x569   : > { %v1705_v44 = vpack.c.bf16 %v1228_v43, %v1228_v43 }
 0x56b   : > { %2238 = vmatmul.mubr.msk.bf16.vlgmr.msra.gmra.mxu1 %vm1714_vm7, %v1705_v44 }
 0x5a2   : > { %v1686_v45 = vpop.permute.xlu1 %1685 }
 0x5a3   : > { %v1696_v47 = vsel %vm758_vm1, %v1339_v22, %v1686_v45 }
 0x5aa   : > { %v1690_v46 = vpop.permute.xlu1 %1689 }
 0x5ab   : > { %v1697_v48 = vsel %vm1219_vm5, %v1696_v47, %v1690_v46 }
 0x5b2   : > { %v1694_v49 = vpop.permute.xlu1 %1693 }
 0x5b3   : > { %v1698_v50 = vsel %vm1221_vm6, %v1697_v48, %v1694_v49 }
 0x5b4   : > { %v1699_v51 = vmul.f32 %v1698_v50, %v1226_v36  ;;  %v2096_v36 = vld [vmem:[%s2705_s17] ss:$0 sm:$0xff] }
 0x5b6   : > { %v1758_v52 = vpack.c.bf16 %v1699_v51, %v1699_v51 }
 0x5b8   : > { %2246 = vmatmul.mubr.msk.bf16.vlgmr.msra.gmra.mxu0 %vm1714_vm7, %v1758_v52 }
 0x62b   : > { %v1752_v54 = vpop.f32.mrf.mxu1 }
 0x62c   : > { %v1753_v56 = vadd.f32 %v2089_v53, %v1752_v54 }
 0x62d   : > { %v2239_v57 = vpop.f32.mrf.mxu1 }
 0x62e   : > { %v1809_v58 = vmul.f32 %v2092_v55, %v1753_v56 }
 0x62f   : > { %v1755_v59 = vpop.f32.mrf.mxu1 }
 0x630   : > { %v1810_v61 = vsel %vm1714_vm7, %v1809_v58, 0.0 }
 0x631   : > { %1811 = vadd.xlane.f32.xlu0 %v1810_v61  ;;  %v2240_v62 = vpop.f32.mrf.mxu1 }
 0x678   : > { %v1796_v60 = vpop.f32.mrf.mxu0 }
 0x679   : > { %v1797_v0 = vadd.f32 %v2089_v53, %v1796_v60 }
 0x67a   : > { %v2247_v2 = vpop.f32.mrf.mxu0 }
 0x67b   : > { %v1820_v3 = vmul.f32 %v2093_v63, %v1797_v0 }
 0x67c   : > { %v1799_v4 = vpop.f32.mrf.mxu0 }
 0x67d   : > { %v1821_v5 = vsel %vm1714_vm7, %v1820_v3, 0.0 }
 0x67e   : > { %1822 = vadd.xlane.f32.xlu1 %v1821_v5  ;;  %v2248_v6 = vpop.f32.mrf.mxu0 }
 0x6ba   : > { %v1812_v8 = vpop.xlane.xlu0 %1811 }
 0x707   : > { %v1823_v10 = vpop.xlane.xlu1 %1822 }
 0x708   : > { %v1824_v12 = vadd.f32 %v1823_v10, %v1812_v8 }
 0x70a   : > { %v1832_v13 = vadd.f32 %v2094_v9, %v1824_v12 }
 0x70c   : > { %v1833_v14 = vsub.f32 0.0, %v1832_v13 }
 0x70e   : > { %v1834_v15 = vmul.f32 1.442695, %v1833_v14 }
 0x710   : > { %2300 = vpow2.f32 %v1834_v15 }
 0x71d   : > { %v2301_v1 = vpop.eup %2300 }
 0x71e   : > { %v1836_v16 = vadd.f32 1.0, %v2301_v1 }
 0x720   : > { %2302 = vrcp.f32 %v1836_v16 }
 0x72d   : > { %v2303_v17 = vpop.eup %2302 }
 0x72e   : > { %1841 = vperm.xlu0 %2267, %v2303_v17   ;;  %v1845_v18 = vsub.f32 1.0, %v2303_v17 }
 0x730   : > { %1848 = vperm.xlu1 %2266, %v1845_v18  }
 0x7a9   : > { %v1842_v19 = vpop.permute.xlu0 %1841 }
 0x7aa   : > { %v1844_v21 = vmul.f32 %v1842_v19, %v1753_v56 }
 0x7ab   : > { %v1849_v20 = vpop.permute.xlu1 %1848 }
 0x7ac   : > { %v1851_v22 = vmul.f32 %v1849_v20, %v1797_v0 }
 0x7ae   : > { %v1852_v23 = vadd.f32 %v1851_v22, %v1844_v21 }
 0x7b0   : > { %v1854_v24 = vadd.f32 %v1853_v28, %v1852_v23 }
 0x7b2   : > { %v1857_v25 = vsel %vm1714_vm7, %v1854_v24, 0.0 }
 0x7b3   : > { %1858 = vadd.xlane.f32.xlu1 %v1857_v25 }
 0x83c   : > { %v1859_v7 = vpop.xlane.xlu1 %1858 }
 0x83d   : > { %v1861_v26 = vmul.f32 0.03125, %v1859_v7 }
 0x83f   : > { %v1862_v27 = vsub.f32 %v1854_v24, %v1861_v26 }
 0x841   : > { %v1863_v11 = vmul.f32 %v1862_v27, %v1862_v27 }
 0x843   : > { %v1864_v29 = vsel %vm1714_vm7, %v1863_v11, 0.0 }
 0x844   : > { %1865 = vadd.xlane.f32.xlu0 %v1864_v29 }
 0x8cd   : > { %v1866_v30 = vpop.xlane.xlu0 %1865 }
 0x8ce   : > { %v1867_v31 = vmul.f32 0.03125, %v1866_v30 }
 0x8d0   : > { %v1868_v32 = vadd.f32 1e-05, %v1867_v31 }
 0x8d2   : > { %2304 = vrsqrt.f32 %v1868_v32 }
 0x8df   : > { %v2305_v33 = vpop.eup %2304 }
 0x8e0   : > { %v1870_v35 = vmul.f32 %v2305_v33, %v1862_v27 }
 0x8e2   : > { %v1877_v37 = vmul.f32 %v2095_v34, %v1870_v35 }
 0x8e4   : > { %v1884_v38 = vadd.f32 %v2096_v36, %v1877_v37 }
 0x8e6   : > { %1885 = vst.msk [vmem:[%s739_s24] sm:$0xff] %vm1714_vm7, %v1884_v38 }
 0x8e7 PF: > { %s30_s29 = sadd.s32 1, %s2312_s29  }
 0x8e8   : > { %p27_p4 = scmp.ge.s32.totalorder %s30_s29, 4  }
 0x8ea   :  { %29 = sbr.rel (!%p27_p4) target bundleno = 4 (0x4), region = 152 }

</bundles_post_ra>
